<compile_context>
chip_gen: v7x
topology: tpu7x:2x2x1
jax: 0.10.0
libtpu: 0.0.40
codegen_flags: <defaults>
</compile_context>

<pallas_src>
import math
from functools import partial

import numpy as np
import jax
import jax.numpy as jnp
from jax.experimental import pallas as pl
from jax.experimental.pallas import tpu as pltpu


# ----------------------- interpolation tables (host side) -------------------

def _linear_interp_matrix(in_size, out_size):
    """(in_size, out_size) matrix for 1-D linear interpolation, align_corners=True."""
    m = np.zeros((in_size, out_size), np.float32)
    if out_size == 1:
        m[0, 0] = 1.0
        return m
    scale = (in_size - 1) / (out_size - 1) if in_size > 1 else 0.0
    for j in range(out_size):
        src = j * scale
        i0 = min(int(math.floor(src)), in_size - 1)
        i1 = min(i0 + 1, in_size - 1)
        frac = src - i0
        m[i0, j] += 1.0 - frac
        m[i1, j] += frac
    return m


def _linear_taps(in_size, out_size):
    """Static (i0, i1, frac) 2-tap table for 1-D linear interp, align_corners=True."""
    if out_size == 1:
        return ((0, 0, 0.0),)
    scale = (in_size - 1) / (out_size - 1) if in_size > 1 else 0.0
    taps = []
    for j in range(out_size):
        src = j * scale
        i0 = min(int(math.floor(src)), in_size - 1)
        i1 = min(i0 + 1, in_size - 1)
        taps.append((i0, i1, float(src - i0)))
    return tuple(taps)


# ------------------------------- Pallas kernel ------------------------------

def _resize_kernel(x_ref, w_ref, o_ref, *,
                   B, D, H, W, Dout, Hout, Wout, h_taps, d_taps):
    # ---- W resample on the MXU (scalar `factor` is pre-folded into w_ref) --
    x2 = x_ref[...].reshape(B * D * H, W)
    y = jnp.dot(x2, w_ref[...], preferred_element_type=jnp.float32)  # (B*D*H, Wout)
    y = y.reshape(B, D, H, Wout)          # free re-view when H % 8 == 0

    # ---- H resample: 2-tap lerp along the H (sublane) axis on the VPU ------
    # Each output row reads at most two adjacent source rows; taps are static.
    rows = []
    for (h0, h1, fh) in h_taps:
        lo = y[:, :, h0:h0 + 1, :]                                   # (B, D, 1, Wout)
        if fh == 0.0 or h1 == h0:
            rows.append(lo)
        else:
            hi = y[:, :, h1:h1 + 1, :]
            rows.append(lo + fh * (hi - lo))
    yh = jnp.concatenate(rows, axis=2) if len(rows) > 1 else rows[0]  # (B, D, Hout, Wout)

    # ---- D resample: 2-tap lerp along a major axis; assemble full block ----
    slabs = []
    for (d0, d1, fd) in d_taps:
        lo = yh[:, d0]                                                # (B, Hout, Wout)
        if fd == 0.0 or d1 == d0:
            slabs.append(lo)
        else:
            slabs.append(lo + fd * (yh[:, d1] - lo))
    if len(slabs) > 1:
        out = jnp.stack(slabs, axis=1)                                # (B, Dout, Hout, Wout)
    else:
        out = slabs[0][:, None]

    # Single large store; lane-dense when Wout % 128 == 0 (demo: Wout = 128).
    # TODO(synk): for Wout not a multiple of 128, emit the output as
    # (NC, Dout, Hout*Wout) to keep the write-back stores unmasked.
    o_ref[...] = out.astype(o_ref.dtype)


# ------------------------------ module wrapper -------------------------------

def resize_transform(x, vel_resize):
    """Forward pass of ResizeTransform(vel_resize, ndims=3). x: (N, C, D, H, W)."""
    factor = 1.0 / vel_resize
    if factor == 1.0:
        return x

    N, C, D, H, W = x.shape
    Dout = int(math.floor(D * factor))
    Hout = int(math.floor(H * factor))
    Wout = int(math.floor(W * factor))

    # Scalar rescale folded into the W interp matrix (commutes with linear interp).
    wmat = jnp.asarray(_linear_interp_matrix(W, Wout) * np.float32(factor))  # (W, Wout)
    h_taps = _linear_taps(H, Hout)
    d_taps = _linear_taps(D, Dout)

    NC = N * C
    x2 = x.reshape(NC, D * H, W)          # free, contiguous re-view

    in_isz = jnp.dtype(x.dtype).itemsize
    out_isz = in_isz

    def step_bytes(b):
        io = 2 * b * D * H * W * in_isz + 2 * b * Dout * Hout * Wout * out_isz
        mats = 2 * W * Wout * 4
        interm = 4 * b * (D * H * Wout + 2 * D * Hout * Wout + Dout * Hout * Wout)
        return io + mats + interm

    # Per-generation VMEM capacity (v7x: 64 MiB, v5e/v6e: 128 MiB).
    try:
        vmem_cap = int(pltpu.get_tpu_info().vmem_capacity_bytes)
    except Exception:
        vmem_cap = 64 * 1024 * 1024

    # Batch several volumes per grid step (bigger matmul M dim, bigger DMA
    # payload), but prefer >= 2 grid steps so both v7x TensorCores get work
    # and the input/output DMAs pipeline.
    budget = vmem_cap // 3
    fitting = [b for b in range(1, NC + 1) if NC % b == 0 and step_bytes(b) <= budget]
    if not fitting:
        # TODO(synk): for volumes whose blocks exceed VMEM (realistic
        # voxelmorph sizes on v7x), add a Dout-block grid axis with a 1-slab
        # input halo and feed the tap tables via scalar prefetch instead of
        # static unrolling.
        B = 1
    else:
        multi = [b for b in fitting if NC // b >= 2]
        B = max(multi) if multi else max(fitting)

    vmem_limit = int(min(max(2 * step_bytes(B), 16 * 1024 * 1024),
                         int(0.9 * vmem_cap)))

    kernel = partial(_resize_kernel, B=B, D=D, H=H, W=W,
                     Dout=Dout, Hout=Hout, Wout=Wout,
                     h_taps=h_taps, d_taps=d_taps)

    out = pl.pallas_call(
        kernel,
        out_shape=jax.ShapeDtypeStruct((NC, Dout, Hout, Wout), x.dtype),
        grid=(NC // B,),
        in_specs=[
            pl.BlockSpec((B, D * H, W), lambda i: (i, 0, 0)),   # B input volumes
            pl.BlockSpec((W, Wout), lambda i: (0, 0)),          # W interp matrix
        ],
        out_specs=pl.BlockSpec((B, Dout, Hout, Wout), lambda i: (i, 0, 0, 0)),
        compiler_params=pltpu.CompilerParams(
            dimension_semantics=("parallel",),
            vmem_limit_bytes=vmem_limit),
    )(x2, wmat)

    return out.reshape(N, C, Dout, Hout, Wout)


# Pure-JAX reference (same separable formulation) for a correctness check.
def _resize_transform_ref(x, vel_resize):
    factor = 1.0 / vel_resize
    if factor == 1.0:
        return x
    N, C, D, H, W = x.shape
    w_w = jnp.asarray(_linear_interp_matrix(W, int(math.floor(W * factor))))
    w_h = jnp.asarray(_linear_interp_matrix(H, int(math.floor(H * factor))))
    w_d = jnp.asarray(_linear_interp_matrix(D, int(math.floor(D * factor))))
    hi = jax.lax.Precision.HIGHEST
    y = factor * x
    y = jnp.einsum('ncdhw,wx->ncdhx', y, w_w, precision=hi)
    y = jnp.einsum('ncdhw,hy->ncdyw', y, w_h, precision=hi)
    y = jnp.einsum('ncdhw,dz->nczhw', y, w_d, precision=hi)
    return y


if __name__ == "__main__":
    # ResizeTransform(vel_resize=0.5, ndims=3) -> factor = 2.0 (upsample x2).
    vel_resize = 0.5

    key = jax.random.PRNGKey(0)
    # (N, C, D, H, W): 3-channel 3-D velocity field.  W is chosen so Wout = 128
    # (lane-dense stores); D, H are multiples of 8 so in-kernel re-views are free.
    x = jax.random.normal(key, (2, 3, 8, 8, 64), dtype=jnp.float32)

    out = resize_transform(x, vel_resize)
    out = jax.block_until_ready(out)

    assert out.shape == (2, 3, 16, 16, 128), out.shape
    ref = jax.block_until_ready(_resize_transform_ref(x, vel_resize))
    np.testing.assert_allclose(np.asarray(out), np.asarray(ref),
                               rtol=1e-4, atol=1e-4)

    print("KERNEL_OK")
</pallas_src>

<mosaic_0001>
module attributes {stable_mosaic.version = 11 : i64} {
  func.func @_resize_kernel(%arg0: i32, %arg1: memref<3x64x64xf32, #tpu.memory_space<vmem>>, %arg2: memref<64x128xf32, #tpu.memory_space<vmem>>, %arg3: memref<3x16x16x128xf32, #tpu.memory_space<vmem>>) attributes {dimension_semantics = [#tpu.dimension_semantics<parallel>], iteration_bounds = array<i64: 2>, scalar_prefetch = 0 : i64, scratch_operands = 0 : i64, tpu.core_type = #tpu.core_type<tc>, window_params = [{transform_indices = @transform_0, window_bounds = array<i64: 3, 64, 64>}, {pipeline_mode = #tpu.pipeline_mode<synchronous>, transform_indices = @transform_1, window_bounds = array<i64: 64, 128>}, {transform_indices = @transform_2, window_bounds = array<i64: 3, 16, 16, 128>}]} {
    %c0 = arith.constant 0 : index
    %c0_0 = arith.constant 0 : index
    %c0_1 = arith.constant 0 : index
    %0 = vector.load %arg1[%c0, %c0_0, %c0_1] : memref<3x64x64xf32, #tpu.memory_space<vmem>>, vector<3x64x64xf32>
    %1 = vector.shape_cast %0 : vector<3x64x64xf32> to vector<192x64xf32>
    %c0_2 = arith.constant 0 : index
    %c0_3 = arith.constant 0 : index
    %2 = vector.load %arg2[%c0_2, %c0_3] : memref<64x128xf32, #tpu.memory_space<vmem>>, vector<64x128xf32>
    %cst = arith.constant dense<0.000000e+00> : vector<192x128xf32>
    %3 = tpu.matmul %1, %2, %cst {dimension_numbers = #tpu.dot_dimension_numbers<[1], [0], [0], [1], [0, 0, 1, 1], [], []>} : vector<192x64xf32>, vector<64x128xf32>, vector<192x128xf32> -> vector<192x128xf32>
    %4 = vector.shape_cast %3 : vector<192x128xf32> to vector<3x8x8x128xf32>
    %5 = vector.extract_strided_slice %4 {offsets = [0, 0, 0, 0], sizes = [3, 8, 1, 128], strides = [1, 1, 1, 1]} : vector<3x8x8x128xf32> to vector<3x8x1x128xf32>
    %6 = vector.extract_strided_slice %4 {offsets = [0, 0, 0, 0], sizes = [3, 8, 1, 128], strides = [1, 1, 1, 1]} : vector<3x8x8x128xf32> to vector<3x8x1x128xf32>
    %7 = vector.extract_strided_slice %4 {offsets = [0, 0, 1, 0], sizes = [3, 8, 1, 128], strides = [1, 1, 1, 1]} : vector<3x8x8x128xf32> to vector<3x8x1x128xf32>
    %8 = arith.subf %7, %6 : vector<3x8x1x128xf32>
    %cst_4 = arith.constant 0.466666669 : f32
    %9 = vector.broadcast %cst_4 : f32 to vector<3x8x1x128xf32>
    %10 = arith.mulf %9, %8 : vector<3x8x1x128xf32>
    %11 = arith.addf %6, %10 : vector<3x8x1x128xf32>
    %12 = vector.extract_strided_slice %4 {offsets = [0, 0, 0, 0], sizes = [3, 8, 1, 128], strides = [1, 1, 1, 1]} : vector<3x8x8x128xf32> to vector<3x8x1x128xf32>
    %13 = vector.extract_strided_slice %4 {offsets = [0, 0, 1, 0], sizes = [3, 8, 1, 128], strides = [1, 1, 1, 1]} : vector<3x8x8x128xf32> to vector<3x8x1x128xf32>
    %14 = arith.subf %13, %12 : vector<3x8x1x128xf32>
    %cst_5 = arith.constant 0.933333337 : f32
    %15 = vector.broadcast %cst_5 : f32 to vector<3x8x1x128xf32>
    %16 = arith.mulf %15, %14 : vector<3x8x1x128xf32>
    %17 = arith.addf %12, %16 : vector<3x8x1x128xf32>
    %18 = vector.extract_strided_slice %4 {offsets = [0, 0, 1, 0], sizes = [3, 8, 1, 128], strides = [1, 1, 1, 1]} : vector<3x8x8x128xf32> to vector<3x8x1x128xf32>
    %19 = vector.extract_strided_slice %4 {offsets = [0, 0, 2, 0], sizes = [3, 8, 1, 128], strides = [1, 1, 1, 1]} : vector<3x8x8x128xf32> to vector<3x8x1x128xf32>
    %20 = arith.subf %19, %18 : vector<3x8x1x128xf32>
    %cst_6 = arith.constant 4.000000e-01 : f32
    %21 = vector.broadcast %cst_6 : f32 to vector<3x8x1x128xf32>
    %22 = arith.mulf %21, %20 : vector<3x8x1x128xf32>
    %23 = arith.addf %18, %22 : vector<3x8x1x128xf32>
    %24 = vector.extract_strided_slice %4 {offsets = [0, 0, 1, 0], sizes = [3, 8, 1, 128], strides = [1, 1, 1, 1]} : vector<3x8x8x128xf32> to vector<3x8x1x128xf32>
    %25 = vector.extract_strided_slice %4 {offsets = [0, 0, 2, 0], sizes = [3, 8, 1, 128], strides = [1, 1, 1, 1]} : vector<3x8x8x128xf32> to vector<3x8x1x128xf32>
    %26 = arith.subf %25, %24 : vector<3x8x1x128xf32>
    %cst_7 = arith.constant 0.866666674 : f32
    %27 = vector.broadcast %cst_7 : f32 to vector<3x8x1x128xf32>
    %28 = arith.mulf %27, %26 : vector<3x8x1x128xf32>
    %29 = arith.addf %24, %28 : vector<3x8x1x128xf32>
    %30 = vector.extract_strided_slice %4 {offsets = [0, 0, 2, 0], sizes = [3, 8, 1, 128], strides = [1, 1, 1, 1]} : vector<3x8x8x128xf32> to vector<3x8x1x128xf32>
    %31 = vector.extract_strided_slice %4 {offsets = [0, 0, 3, 0], sizes = [3, 8, 1, 128], strides = [1, 1, 1, 1]} : vector<3x8x8x128xf32> to vector<3x8x1x128xf32>
    %32 = arith.subf %31, %30 : vector<3x8x1x128xf32>
    %cst_8 = arith.constant 0.333333343 : f32
    %33 = vector.broadcast %cst_8 : f32 to vector<3x8x1x128xf32>
    %34 = arith.mulf %33, %32 : vector<3x8x1x128xf32>
    %35 = arith.addf %30, %34 : vector<3x8x1x128xf32>
    %36 = vector.extract_strided_slice %4 {offsets = [0, 0, 2, 0], sizes = [3, 8, 1, 128], strides = [1, 1, 1, 1]} : vector<3x8x8x128xf32> to vector<3x8x1x128xf32>
    %37 = vector.extract_strided_slice %4 {offsets = [0, 0, 3, 0], sizes = [3, 8, 1, 128], strides = [1, 1, 1, 1]} : vector<3x8x8x128xf32> to vector<3x8x1x128xf32>
    %38 = arith.subf %37, %36 : vector<3x8x1x128xf32>
    %cst_9 = arith.constant 8.000000e-01 : f32
    %39 = vector.broadcast %cst_9 : f32 to vector<3x8x1x128xf32>
    %40 = arith.mulf %39, %38 : vector<3x8x1x128xf32>
    %41 = arith.addf %36, %40 : vector<3x8x1x128xf32>
    %42 = vector.extract_strided_slice %4 {offsets = [0, 0, 3, 0], sizes = [3, 8, 1, 128], strides = [1, 1, 1, 1]} : vector<3x8x8x128xf32> to vector<3x8x1x128xf32>
    %43 = vector.extract_strided_slice %4 {offsets = [0, 0, 4, 0], sizes = [3, 8, 1, 128], strides = [1, 1, 1, 1]} : vector<3x8x8x128xf32> to vector<3x8x1x128xf32>
    %44 = arith.subf %43, %42 : vector<3x8x1x128xf32>
    %cst_10 = arith.constant 0.266666681 : f32
    %45 = vector.broadcast %cst_10 : f32 to vector<3x8x1x128xf32>
    %46 = arith.mulf %45, %44 : vector<3x8x1x128xf32>
    %47 = arith.addf %42, %46 : vector<3x8x1x128xf32>
    %48 = vector.extract_strided_slice %4 {offsets = [0, 0, 3, 0], sizes = [3, 8, 1, 128], strides = [1, 1, 1, 1]} : vector<3x8x8x128xf32> to vector<3x8x1x128xf32>
    %49 = vector.extract_strided_slice %4 {offsets = [0, 0, 4, 0], sizes = [3, 8, 1, 128], strides = [1, 1, 1, 1]} : vector<3x8x8x128xf32> to vector<3x8x1x128xf32>
    %50 = arith.subf %49, %48 : vector<3x8x1x128xf32>
    %cst_11 = arith.constant 0.733333349 : f32
    %51 = vector.broadcast %cst_11 : f32 to vector<3x8x1x128xf32>
    %52 = arith.mulf %51, %50 : vector<3x8x1x128xf32>
    %53 = arith.addf %48, %52 : vector<3x8x1x128xf32>
    %54 = vector.extract_strided_slice %4 {offsets = [0, 0, 4, 0], sizes = [3, 8, 1, 128], strides = [1, 1, 1, 1]} : vector<3x8x8x128xf32> to vector<3x8x1x128xf32>
    %55 = vector.extract_strided_slice %4 {offsets = [0, 0, 5, 0], sizes = [3, 8, 1, 128], strides = [1, 1, 1, 1]} : vector<3x8x8x128xf32> to vector<3x8x1x128xf32>
    %56 = arith.subf %55, %54 : vector<3x8x1x128xf32>
    %cst_12 = arith.constant 2.000000e-01 : f32
    %57 = vector.broadcast %cst_12 : f32 to vector<3x8x1x128xf32>
    %58 = arith.mulf %57, %56 : vector<3x8x1x128xf32>
    %59 = arith.addf %54, %58 : vector<3x8x1x128xf32>
    %60 = vector.extract_strided_slice %4 {offsets = [0, 0, 4, 0], sizes = [3, 8, 1, 128], strides = [1, 1, 1, 1]} : vector<3x8x8x128xf32> to vector<3x8x1x128xf32>
    %61 = vector.extract_strided_slice %4 {offsets = [0, 0, 5, 0], sizes = [3, 8, 1, 128], strides = [1, 1, 1, 1]} : vector<3x8x8x128xf32> to vector<3x8x1x128xf32>
    %62 = arith.subf %61, %60 : vector<3x8x1x128xf32>
    %cst_13 = arith.constant 0.666666686 : f32
    %63 = vector.broadcast %cst_13 : f32 to vector<3x8x1x128xf32>
    %64 = arith.mulf %63, %62 : vector<3x8x1x128xf32>
    %65 = arith.addf %60, %64 : vector<3x8x1x128xf32>
    %66 = vector.extract_strided_slice %4 {offsets = [0, 0, 5, 0], sizes = [3, 8, 1, 128], strides = [1, 1, 1, 1]} : vector<3x8x8x128xf32> to vector<3x8x1x128xf32>
    %67 = vector.extract_strided_slice %4 {offsets = [0, 0, 6, 0], sizes = [3, 8, 1, 128], strides = [1, 1, 1, 1]} : vector<3x8x8x128xf32> to vector<3x8x1x128xf32>
    %68 = arith.subf %67, %66 : vector<3x8x1x128xf32>
    %cst_14 = arith.constant 0.13333334 : f32
    %69 = vector.broadcast %cst_14 : f32 to vector<3x8x1x128xf32>
    %70 = arith.mulf %69, %68 : vector<3x8x1x128xf32>
    %71 = arith.addf %66, %70 : vector<3x8x1x128xf32>
    %72 = vector.extract_strided_slice %4 {offsets = [0, 0, 5, 0], sizes = [3, 8, 1, 128], strides = [1, 1, 1, 1]} : vector<3x8x8x128xf32> to vector<3x8x1x128xf32>
    %73 = vector.extract_strided_slice %4 {offsets = [0, 0, 6, 0], sizes = [3, 8, 1, 128], strides = [1, 1, 1, 1]} : vector<3x8x8x128xf32> to vector<3x8x1x128xf32>
    %74 = arith.subf %73, %72 : vector<3x8x1x128xf32>
    %cst_15 = arith.constant 6.000000e-01 : f32
    %75 = vector.broadcast %cst_15 : f32 to vector<3x8x1x128xf32>
    %76 = arith.mulf %75, %74 : vector<3x8x1x128xf32>
    %77 = arith.addf %72, %76 : vector<3x8x1x128xf32>
    %78 = vector.extract_strided_slice %4 {offsets = [0, 0, 6, 0], sizes = [3, 8, 1, 128], strides = [1, 1, 1, 1]} : vector<3x8x8x128xf32> to vector<3x8x1x128xf32>
    %79 = vector.extract_strided_slice %4 {offsets = [0, 0, 7, 0], sizes = [3, 8, 1, 128], strides = [1, 1, 1, 1]} : vector<3x8x8x128xf32> to vector<3x8x1x128xf32>
    %80 = arith.subf %79, %78 : vector<3x8x1x128xf32>
    %cst_16 = arith.constant 0.0666666701 : f32
    %81 = vector.broadcast %cst_16 : f32 to vector<3x8x1x128xf32>
    %82 = arith.mulf %81, %80 : vector<3x8x1x128xf32>
    %83 = arith.addf %78, %82 : vector<3x8x1x128xf32>
    %84 = vector.extract_strided_slice %4 {offsets = [0, 0, 6, 0], sizes = [3, 8, 1, 128], strides = [1, 1, 1, 1]} : vector<3x8x8x128xf32> to vector<3x8x1x128xf32>
    %85 = vector.extract_strided_slice %4 {offsets = [0, 0, 7, 0], sizes = [3, 8, 1, 128], strides = [1, 1, 1, 1]} : vector<3x8x8x128xf32> to vector<3x8x1x128xf32>
    %86 = arith.subf %85, %84 : vector<3x8x1x128xf32>
    %cst_17 = arith.constant 0.533333361 : f32
    %87 = vector.broadcast %cst_17 : f32 to vector<3x8x1x128xf32>
    %88 = arith.mulf %87, %86 : vector<3x8x1x128xf32>
    %89 = arith.addf %84, %88 : vector<3x8x1x128xf32>
    %90 = vector.extract_strided_slice %4 {offsets = [0, 0, 7, 0], sizes = [3, 8, 1, 128], strides = [1, 1, 1, 1]} : vector<3x8x8x128xf32> to vector<3x8x1x128xf32>
    %91 = tpu.concatenate %5, %11, %17, %23, %29, %35, %41, %47, %53, %59, %65, %71, %77, %83, %89, %90 in 2 : vector<3x8x1x128xf32>, vector<3x8x1x128xf32>, vector<3x8x1x128xf32>, vector<3x8x1x128xf32>, vector<3x8x1x128xf32>, vector<3x8x1x128xf32>, vector<3x8x1x128xf32>, vector<3x8x1x128xf32>, vector<3x8x1x128xf32>, vector<3x8x1x128xf32>, vector<3x8x1x128xf32>, vector<3x8x1x128xf32>, vector<3x8x1x128xf32>, vector<3x8x1x128xf32>, vector<3x8x1x128xf32>, vector<3x8x1x128xf32> -> vector<3x8x16x128xf32>
    %92 = vector.extract_strided_slice %91 {offsets = [0, 0, 0, 0], sizes = [3, 1, 16, 128], strides = [1, 1, 1, 1]} : vector<3x8x16x128xf32> to vector<3x1x16x128xf32>
    %93 = vector.shape_cast %92 : vector<3x1x16x128xf32> to vector<3x16x128xf32>
    %94 = vector.extract_strided_slice %91 {offsets = [0, 0, 0, 0], sizes = [3, 1, 16, 128], strides = [1, 1, 1, 1]} : vector<3x8x16x128xf32> to vector<3x1x16x128xf32>
    %95 = vector.shape_cast %94 : vector<3x1x16x128xf32> to vector<3x16x128xf32>
    %96 = vector.extract_strided_slice %91 {offsets = [0, 1, 0, 0], sizes = [3, 1, 16, 128], strides = [1, 1, 1, 1]} : vector<3x8x16x128xf32> to vector<3x1x16x128xf32>
    %97 = vector.shape_cast %96 : vector<3x1x16x128xf32> to vector<3x16x128xf32>
    %98 = arith.subf %97, %95 : vector<3x16x128xf32>
    %cst_18 = arith.constant 0.466666669 : f32
    %99 = vector.broadcast %cst_18 : f32 to vector<3x16x128xf32>
    %100 = arith.mulf %99, %98 : vector<3x16x128xf32>
    %101 = arith.addf %95, %100 : vector<3x16x128xf32>
    %102 = vector.extract_strided_slice %91 {offsets = [0, 0, 0, 0], sizes = [3, 1, 16, 128], strides = [1, 1, 1, 1]} : vector<3x8x16x128xf32> to vector<3x1x16x128xf32>
    %103 = vector.shape_cast %102 : vector<3x1x16x128xf32> to vector<3x16x128xf32>
    %104 = vector.extract_strided_slice %91 {offsets = [0, 1, 0, 0], sizes = [3, 1, 16, 128], strides = [1, 1, 1, 1]} : vector<3x8x16x128xf32> to vector<3x1x16x128xf32>
    %105 = vector.shape_cast %104 : vector<3x1x16x128xf32> to vector<3x16x128xf32>
    %106 = arith.subf %105, %103 : vector<3x16x128xf32>
    %cst_19 = arith.constant 0.933333337 : f32
    %107 = vector.broadcast %cst_19 : f32 to vector<3x16x128xf32>
    %108 = arith.mulf %107, %106 : vector<3x16x128xf32>
    %109 = arith.addf %103, %108 : vector<3x16x128xf32>
    %110 = vector.extract_strided_slice %91 {offsets = [0, 1, 0, 0], sizes = [3, 1, 16, 128], strides = [1, 1, 1, 1]} : vector<3x8x16x128xf32> to vector<3x1x16x128xf32>
    %111 = vector.shape_cast %110 : vector<3x1x16x128xf32> to vector<3x16x128xf32>
    %112 = vector.extract_strided_slice %91 {offsets = [0, 2, 0, 0], sizes = [3, 1, 16, 128], strides = [1, 1, 1, 1]} : vector<3x8x16x128xf32> to vector<3x1x16x128xf32>
    %113 = vector.shape_cast %112 : vector<3x1x16x128xf32> to vector<3x16x128xf32>
    %114 = arith.subf %113, %111 : vector<3x16x128xf32>
    %cst_20 = arith.constant 4.000000e-01 : f32
    %115 = vector.broadcast %cst_20 : f32 to vector<3x16x128xf32>
    %116 = arith.mulf %115, %114 : vector<3x16x128xf32>
    %117 = arith.addf %111, %116 : vector<3x16x128xf32>
    %118 = vector.extract_strided_slice %91 {offsets = [0, 1, 0, 0], sizes = [3, 1, 16, 128], strides = [1, 1, 1, 1]} : vector<3x8x16x128xf32> to vector<3x1x16x128xf32>
    %119 = vector.shape_cast %118 : vector<3x1x16x128xf32> to vector<3x16x128xf32>
    %120 = vector.extract_strided_slice %91 {offsets = [0, 2, 0, 0], sizes = [3, 1, 16, 128], strides = [1, 1, 1, 1]} : vector<3x8x16x128xf32> to vector<3x1x16x128xf32>
    %121 = vector.shape_cast %120 : vector<3x1x16x128xf32> to vector<3x16x128xf32>
    %122 = arith.subf %121, %119 : vector<3x16x128xf32>
    %cst_21 = arith.constant 0.866666674 : f32
    %123 = vector.broadcast %cst_21 : f32 to vector<3x16x128xf32>
    %124 = arith.mulf %123, %122 : vector<3x16x128xf32>
    %125 = arith.addf %119, %124 : vector<3x16x128xf32>
    %126 = vector.extract_strided_slice %91 {offsets = [0, 2, 0, 0], sizes = [3, 1, 16, 128], strides = [1, 1, 1, 1]} : vector<3x8x16x128xf32> to vector<3x1x16x128xf32>
    %127 = vector.shape_cast %126 : vector<3x1x16x128xf32> to vector<3x16x128xf32>
    %128 = vector.extract_strided_slice %91 {offsets = [0, 3, 0, 0], sizes = [3, 1, 16, 128], strides = [1, 1, 1, 1]} : vector<3x8x16x128xf32> to vector<3x1x16x128xf32>
    %129 = vector.shape_cast %128 : vector<3x1x16x128xf32> to vector<3x16x128xf32>
    %130 = arith.subf %129, %127 : vector<3x16x128xf32>
    %cst_22 = arith.constant 0.333333343 : f32
    %131 = vector.broadcast %cst_22 : f32 to vector<3x16x128xf32>
    %132 = arith.mulf %131, %130 : vector<3x16x128xf32>
    %133 = arith.addf %127, %132 : vector<3x16x128xf32>
    %134 = vector.extract_strided_slice %91 {offsets = [0, 2, 0, 0], sizes = [3, 1, 16, 128], strides = [1, 1, 1, 1]} : vector<3x8x16x128xf32> to vector<3x1x16x128xf32>
    %135 = vector.shape_cast %134 : vector<3x1x16x128xf32> to vector<3x16x128xf32>
    %136 = vector.extract_strided_slice %91 {offsets = [0, 3, 0, 0], sizes = [3, 1, 16, 128], strides = [1, 1, 1, 1]} : vector<3x8x16x128xf32> to vector<3x1x16x128xf32>
    %137 = vector.shape_cast %136 : vector<3x1x16x128xf32> to vector<3x16x128xf32>
    %138 = arith.subf %137, %135 : vector<3x16x128xf32>
    %cst_23 = arith.constant 8.000000e-01 : f32
    %139 = vector.broadcast %cst_23 : f32 to vector<3x16x128xf32>
    %140 = arith.mulf %139, %138 : vector<3x16x128xf32>
    %141 = arith.addf %135, %140 : vector<3x16x128xf32>
    %142 = vector.extract_strided_slice %91 {offsets = [0, 3, 0, 0], sizes = [3, 1, 16, 128], strides = [1, 1, 1, 1]} : vector<3x8x16x128xf32> to vector<3x1x16x128xf32>
    %143 = vector.shape_cast %142 : vector<3x1x16x128xf32> to vector<3x16x128xf32>
    %144 = vector.extract_strided_slice %91 {offsets = [0, 4, 0, 0], sizes = [3, 1, 16, 128], strides = [1, 1, 1, 1]} : vector<3x8x16x128xf32> to vector<3x1x16x128xf32>
    %145 = vector.shape_cast %144 : vector<3x1x16x128xf32> to vector<3x16x128xf32>
    %146 = arith.subf %145, %143 : vector<3x16x128xf32>
    %cst_24 = arith.constant 0.266666681 : f32
    %147 = vector.broadcast %cst_24 : f32 to vector<3x16x128xf32>
    %148 = arith.mulf %147, %146 : vector<3x16x128xf32>
    %149 = arith.addf %143, %148 : vector<3x16x128xf32>
    %150 = vector.extract_strided_slice %91 {offsets = [0, 3, 0, 0], sizes = [3, 1, 16, 128], strides = [1, 1, 1, 1]} : vector<3x8x16x128xf32> to vector<3x1x16x128xf32>
    %151 = vector.shape_cast %150 : vector<3x1x16x128xf32> to vector<3x16x128xf32>
    %152 = vector.extract_strided_slice %91 {offsets = [0, 4, 0, 0], sizes = [3, 1, 16, 128], strides = [1, 1, 1, 1]} : vector<3x8x16x128xf32> to vector<3x1x16x128xf32>
    %153 = vector.shape_cast %152 : vector<3x1x16x128xf32> to vector<3x16x128xf32>
    %154 = arith.subf %153, %151 : vector<3x16x128xf32>
    %cst_25 = arith.constant 0.733333349 : f32
    %155 = vector.broadcast %cst_25 : f32 to vector<3x16x128xf32>
    %156 = arith.mulf %155, %154 : vector<3x16x128xf32>
    %157 = arith.addf %151, %156 : vector<3x16x128xf32>
    %158 = vector.extract_strided_slice %91 {offsets = [0, 4, 0, 0], sizes = [3, 1, 16, 128], strides = [1, 1, 1, 1]} : vector<3x8x16x128xf32> to vector<3x1x16x128xf32>
    %159 = vector.shape_cast %158 : vector<3x1x16x128xf32> to vector<3x16x128xf32>
    %160 = vector.extract_strided_slice %91 {offsets = [0, 5, 0, 0], sizes = [3, 1, 16, 128], strides = [1, 1, 1, 1]} : vector<3x8x16x128xf32> to vector<3x1x16x128xf32>
    %161 = vector.shape_cast %160 : vector<3x1x16x128xf32> to vector<3x16x128xf32>
    %162 = arith.subf %161, %159 : vector<3x16x128xf32>
    %cst_26 = arith.constant 2.000000e-01 : f32
    %163 = vector.broadcast %cst_26 : f32 to vector<3x16x128xf32>
    %164 = arith.mulf %163, %162 : vector<3x16x128xf32>
    %165 = arith.addf %159, %164 : vector<3x16x128xf32>
    %166 = vector.extract_strided_slice %91 {offsets = [0, 4, 0, 0], sizes = [3, 1, 16, 128], strides = [1, 1, 1, 1]} : vector<3x8x16x128xf32> to vector<3x1x16x128xf32>
    %167 = vector.shape_cast %166 : vector<3x1x16x128xf32> to vector<3x16x128xf32>
    %168 = vector.extract_strided_slice %91 {offsets = [0, 5, 0, 0], sizes = [3, 1, 16, 128], strides = [1, 1, 1, 1]} : vector<3x8x16x128xf32> to vector<3x1x16x128xf32>
    %169 = vector.shape_cast %168 : vector<3x1x16x128xf32> to vector<3x16x128xf32>
    %170 = arith.subf %169, %167 : vector<3x16x128xf32>
    %cst_27 = arith.constant 0.666666686 : f32
    %171 = vector.broadcast %cst_27 : f32 to vector<3x16x128xf32>
    %172 = arith.mulf %171, %170 : vector<3x16x128xf32>
    %173 = arith.addf %167, %172 : vector<3x16x128xf32>
    %174 = vector.extract_strided_slice %91 {offsets = [0, 5, 0, 0], sizes = [3, 1, 16, 128], strides = [1, 1, 1, 1]} : vector<3x8x16x128xf32> to vector<3x1x16x128xf32>
    %175 = vector.shape_cast %174 : vector<3x1x16x128xf32> to vector<3x16x128xf32>
    %176 = vector.extract_strided_slice %91 {offsets = [0, 6, 0, 0], sizes = [3, 1, 16, 128], strides = [1, 1, 1, 1]} : vector<3x8x16x128xf32> to vector<3x1x16x128xf32>
    %177 = vector.shape_cast %176 : vector<3x1x16x128xf32> to vector<3x16x128xf32>
    %178 = arith.subf %177, %175 : vector<3x16x128xf32>
    %cst_28 = arith.constant 0.13333334 : f32
    %179 = vector.broadcast %cst_28 : f32 to vector<3x16x128xf32>
    %180 = arith.mulf %179, %178 : vector<3x16x128xf32>
    %181 = arith.addf %175, %180 : vector<3x16x128xf32>
    %182 = vector.extract_strided_slice %91 {offsets = [0, 5, 0, 0], sizes = [3, 1, 16, 128], strides = [1, 1, 1, 1]} : vector<3x8x16x128xf32> to vector<3x1x16x128xf32>
    %183 = vector.shape_cast %182 : vector<3x1x16x128xf32> to vector<3x16x128xf32>
    %184 = vector.extract_strided_slice %91 {offsets = [0, 6, 0, 0], sizes = [3, 1, 16, 128], strides = [1, 1, 1, 1]} : vector<3x8x16x128xf32> to vector<3x1x16x128xf32>
    %185 = vector.shape_cast %184 : vector<3x1x16x128xf32> to vector<3x16x128xf32>
    %186 = arith.subf %185, %183 : vector<3x16x128xf32>
    %cst_29 = arith.constant 6.000000e-01 : f32
    %187 = vector.broadcast %cst_29 : f32 to vector<3x16x128xf32>
    %188 = arith.mulf %187, %186 : vector<3x16x128xf32>
    %189 = arith.addf %183, %188 : vector<3x16x128xf32>
    %190 = vector.extract_strided_slice %91 {offsets = [0, 6, 0, 0], sizes = [3, 1, 16, 128], strides = [1, 1, 1, 1]} : vector<3x8x16x128xf32> to vector<3x1x16x128xf32>
    %191 = vector.shape_cast %190 : vector<3x1x16x128xf32> to vector<3x16x128xf32>
    %192 = vector.extract_strided_slice %91 {offsets = [0, 7, 0, 0], sizes = [3, 1, 16, 128], strides = [1, 1, 1, 1]} : vector<3x8x16x128xf32> to vector<3x1x16x128xf32>
    %193 = vector.shape_cast %192 : vector<3x1x16x128xf32> to vector<3x16x128xf32>
    %194 = arith.subf %193, %191 : vector<3x16x128xf32>
    %cst_30 = arith.constant 0.0666666701 : f32
    %195 = vector.broadcast %cst_30 : f32 to vector<3x16x128xf32>
    %196 = arith.mulf %195, %194 : vector<3x16x128xf32>
    %197 = arith.addf %191, %196 : vector<3x16x128xf32>
    %198 = vector.extract_strided_slice %91 {offsets = [0, 6, 0, 0], sizes = [3, 1, 16, 128], strides = [1, 1, 1, 1]} : vector<3x8x16x128xf32> to vector<3x1x16x128xf32>
    %199 = vector.shape_cast %198 : vector<3x1x16x128xf32> to vector<3x16x128xf32>
    %200 = vector.extract_strided_slice %91 {offsets = [0, 7, 0, 0], sizes = [3, 1, 16, 128], strides = [1, 1, 1, 1]} : vector<3x8x16x128xf32> to vector<3x1x16x128xf32>
    %201 = vector.shape_cast %200 : vector<3x1x16x128xf32> to vector<3x16x128xf32>
    %202 = arith.subf %201, %199 : vector<3x16x128xf32>
    %cst_31 = arith.constant 0.533333361 : f32
    %203 = vector.broadcast %cst_31 : f32 to vector<3x16x128xf32>
    %204 = arith.mulf %203, %202 : vector<3x16x128xf32>
    %205 = arith.addf %199, %204 : vector<3x16x128xf32>
    %206 = vector.extract_strided_slice %91 {offsets = [0, 7, 0, 0], sizes = [3, 1, 16, 128], strides = [1, 1, 1, 1]} : vector<3x8x16x128xf32> to vector<3x1x16x128xf32>
    %207 = vector.shape_cast %206 : vector<3x1x16x128xf32> to vector<3x16x128xf32>
    %208 = vector.shape_cast %93 : vector<3x16x128xf32> to vector<3x1x16x128xf32>
    %209 = vector.shape_cast %101 : vector<3x16x128xf32> to vector<3x1x16x128xf32>
    %210 = vector.shape_cast %109 : vector<3x16x128xf32> to vector<3x1x16x128xf32>
    %211 = vector.shape_cast %117 : vector<3x16x128xf32> to vector<3x1x16x128xf32>
    %212 = vector.shape_cast %125 : vector<3x16x128xf32> to vector<3x1x16x128xf32>
    %213 = vector.shape_cast %133 : vector<3x16x128xf32> to vector<3x1x16x128xf32>
    %214 = vector.shape_cast %141 : vector<3x16x128xf32> to vector<3x1x16x128xf32>
    %215 = vector.shape_cast %149 : vector<3x16x128xf32> to vector<3x1x16x128xf32>
    %216 = vector.shape_cast %157 : vector<3x16x128xf32> to vector<3x1x16x128xf32>
    %217 = vector.shape_cast %165 : vector<3x16x128xf32> to vector<3x1x16x128xf32>
    %218 = vector.shape_cast %173 : vector<3x16x128xf32> to vector<3x1x16x128xf32>
    %219 = vector.shape_cast %181 : vector<3x16x128xf32> to vector<3x1x16x128xf32>
    %220 = vector.shape_cast %189 : vector<3x16x128xf32> to vector<3x1x16x128xf32>
    %221 = vector.shape_cast %197 : vector<3x16x128xf32> to vector<3x1x16x128xf32>
    %222 = vector.shape_cast %205 : vector<3x16x128xf32> to vector<3x1x16x128xf32>
    %223 = vector.shape_cast %207 : vector<3x16x128xf32> to vector<3x1x16x128xf32>
    %224 = tpu.concatenate %208, %209, %210, %211, %212, %213, %214, %215, %216, %217, %218, %219, %220, %221, %222, %223 in 1 : vector<3x1x16x128xf32>, vector<3x1x16x128xf32>, vector<3x1x16x128xf32>, vector<3x1x16x128xf32>, vector<3x1x16x128xf32>, vector<3x1x16x128xf32>, vector<3x1x16x128xf32>, vector<3x1x16x128xf32>, vector<3x1x16x128xf32>, vector<3x1x16x128xf32>, vector<3x1x16x128xf32>, vector<3x1x16x128xf32>, vector<3x1x16x128xf32>, vector<3x1x16x128xf32>, vector<3x1x16x128xf32>, vector<3x1x16x128xf32> -> vector<3x16x16x128xf32>
    %c0_32 = arith.constant 0 : index
    %c0_33 = arith.constant 0 : index
    %c0_34 = arith.constant 0 : index
    %c0_35 = arith.constant 0 : index
    %225 = vector.load %arg3[%c0_32, %c0_33, %c0_34, %c0_35] : memref<3x16x16x128xf32, #tpu.memory_space<vmem>>, vector<3x16x16x128xf32>
    tpu.vector_store %arg3[%c0_32, %c0_33, %c0_34, %c0_35], %224 {strides = array<i32>} : memref<3x16x16x128xf32, #tpu.memory_space<vmem>>, vector<3x16x16x128xf32>,
    return
  }
  func.func @transform_0(%arg0: i32) -> (i32, i32, i32) {
    %c0_i32 = arith.constant 0 : i32
    %c0_i32_0 = arith.constant 0 : i32
    %c0_i32_1 = arith.constant 0 : i32
    return %arg0, %c0_i32, %c0_i32_0 : i32, i32, i32
  }
  func.func @transform_1(%arg0: i32) -> (i32, i32) {
    %c0_i32 = arith.constant 0 : i32
    %c0_i32_0 = arith.constant 0 : i32
    %c0_i32_1 = arith.constant 0 : i32
    return %c0_i32, %c0_i32_0 : i32, i32
  }
  func.func @transform_2(%arg0: i32) -> (i32, i32, i32, i32) {
    %c0_i32 = arith.constant 0 : i32
    %c0_i32_0 = arith.constant 0 : i32
    %c0_i32_1 = arith.constant 0 : i32
    %c0_i32_2 = arith.constant 0 : i32
    return %arg0, %c0_i32, %c0_i32_0, %c0_i32_1 : i32, i32, i32, i32
  }
}

</mosaic_0001>

<bundles_post_ra>
// kernel: tpu_custom_call.1
= control target key start
LH: loop header
LB: loop body
LE: loop exit
PB: predicated region body
PF: predicated region fallthrough
CT: control target
= control target key end

     0   :  { %7 = vsyncpa [#allocation3], 0  ;;  %s6138_s0 = inlined_call_operand.hbm [shape: f32[6,64,64], index: 0, kind: input, shape index: {}]   ;;  %s6139_s1 = inlined_call_operand.hbm [shape: f32[64,128], index: 1, kind: input, shape index: {}]   ;;  %s6140_s2 = inlined_call_operand.hbm [shape: f32[6,16,16,128], index: 2, kind: output, shape index: {}]  }
   0x1   :  { %9 = vsyncpa [#allocation3 + $0x1], 0 }
   0x2   :  { %10 = vsyncpa [#allocation6], 0 }
   0x3   :  { %11 = vsyncpa [#allocation4], 0 }
   0x4   :  { %13 = vsyncpa [#allocation4 + $0x1], 0  ;;  %s4295_s9 = smov 0   ;;  %s4297_s10 = smov 0  }
   0x5   :  { %s4299_s11 = smov 0   ;;  %s4301_s12 = smov 0  }
   0x6 LB: > { %s4316_s13 = sadd.s32 4294967295, %s4271_s12   ;;  %s3929_s14 = sadd.s32 4294967294, %s4271_s12   ;;  %s4271_s12 = sphi %s4301_s12, %s6164_s12   ;;  %s4267_s11 = sphi %s4299_s11, %s6163_s11   ;;  %s4263_s10 = sphi %s4297_s10, %s6162_s10   ;;  %s4259_s9 = sphi %s4295_s9, %s6161_s9  }
   0x7   : > { %p39_p0 = scmp.ne.s32.totalorder %s4263_s10, %s4259_s9  ;;  %p6141_p1 = scmp.eq.s32.totalorder %s4316_s13, 0 }
   0x8   : > { %p90_p3 = scmp.eq.s32.totalorder %s3929_s14, 1  ;;  %p3930_p5 = scmp.ge.s32.totalorder %s4271_s12, 1 }
   0x9   : > { %p4325_p4 = por %p6141_p1, %p39_p0  ;;  %p97_p7 = scmp.lt.s32.totalorder %s4271_s12, 3 }
   0xa   : > { %p4330_p6 = por %p90_p3, %p39_p0  ;;  %s4273_s18 = smov [#allocation5]  }
   0xb   : > { %s6144_s15 = scalar_select %p4325_p4, 1, 0 }
   0xc   : > { %s6145_s16 = scalar_select %p4330_p6, 1, 0 }
   0xd   : > { %p4335_p8 = pnand %p3930_p5, %p97_p7  ;;  %s109_s19 = sshll.u32 %s4273_s18, 4  ;;  %s4339_s19 = int_to_ptr.vmem [resolvable:$true] %s109_s19 }
   0xe   : > { %s4351_s21 = sadd.s32 1, %s4271_s12   ;;  %s26_s22 = sadd.s32 1, %s4267_s11 }
   0xf   : > { %s6146_s17 = scalar_select %p4335_p8, 1, 0 }
  0x10   : > { %p4090_p9 = pneg %p4335_p8  ;;  %s23_s23 = ssub.s32 %s4271_s12, %s4351_s21 }
  0x11   : > { %s4143_s26 = scalar_lea.hbm %s6139_s1, 1024 }
  0x12   : > { %p4346_p11 = pnand %p4090_p9, %p6141_p1  ;;  %p4144_p12 = scmp.ne.s32.totalorder %s6139_s1, %s4143_s26 }
  0x13   : > { %p4150_p5 = scmp.lt.u32.totalorder %s4143_s26, %s6139_s1 }
  0x14   : > { %p4145_p13 = pneg %p4346_p11 }
  0x16   : > { %p4146_p0 = pnand %p4145_p13, %p4144_p12 }
  0x18   : > { %p4147_p3 = pneg %p4146_p0 }
  0x1a   : > { %p4152_p7 = pnand %p4150_p5, %p4147_p3 }
  0x1c   : > { %4155 = shalt.err (!%p4152_p7)
}
  0x1d   : > { %s4156_s3 = scalar_lea.vmem %s4339_s19, 1024  ;;  %p4164_p2 = scmp.lt.s32.totalorder %s4339_s19, %s4339_s19 }
  0x1e   : > { %p4157_p9 = scmp.ne.s32.totalorder %s4339_s19, %s4156_s3  ;;  %p4165_p6 = scmp.lt.s32.totalorder %s4156_s3, %s4156_s3 }
  0x20   : > { %p4159_p10 = pnand %p4157_p9, %p4145_p13  ;;  %p4166_p4 = por %p4165_p6, %p4164_p2 }
  0x22   : > { %p4160_p1 = pneg %p4159_p10 }
  0x24   : > { %p4167_p8 = pnand %p4166_p4, %p4160_p1 }
  0x26   : > { %4170 = shalt.err (!%p4167_p8)
}
  0x27   : > { %s4274_s4 = smov 128   ;;  %s4275_s5 = smov 8  }
  0x28   : > { %4093 = dma.hbm_to_vmem [thread:$0]  (!%p4346_p11), %s6139_s1, 1024, %s4339_s19, [#allocation6], %s4274_s4, %s4274_s4, %s4275_s5  }
  0x29   : > { %p24_p1 = scmp.eq.s32.totalorder %s23_s23, 0  ;;  %p33_p2 = scmp.ne.s32.totalorder %s4267_s11, %s4263_s10 }
  0x2a   : > { %p34_p4 = scmp.eq.s32.totalorder %s4271_s12, 0  ;;  %p4103_p6 = scmp.lt.s32.totalorder %s4271_s12, 2 }
  0x2b   : > { %s4385_s8 = scalar_select %p24_p1, %s4267_s11, %s26_s22  }
  0x2c   : > { %p35_p8 = por %p34_p4, %p33_p2  ;;  %p6148_p10 = scmp.eq.s32.totalorder %s4316_s13, 1 }
  0x2d   : > { %s123_s18 = sand.u32 1, %s4267_s11   ;;  %s3969_s20 = smul.u32 3072, %s4271_s12 }
  0x2e   : > { %p4389_p12 = por %p6148_p10, %p33_p2  ;;  %s4079_s24 = smul.u32 192, %s123_s18 }
  0x2f   : > { %p4395_p13 = pnand %p4103_p6, %p35_p8  ;;  %s4402_s22 = scalar_lea.hbm %s6138_s0, %s3969_s20 }
  0x30   : > { %s127_s26 = scalar_lea.vmem [#allocation2], %s4079_s24  ;;  %s4406_s28 = scalar_lea.sflag [#allocation3], %s123_s18 }
  0x31   : > { %s135_s27 = sshll.u32 %s127_s26, 4  ;;  %s4171_s29 = scalar_lea.hbm %s4402_s22, 3072  ;;  %s4404_s27 = int_to_ptr.vmem [resolvable:$true] %s135_s27 }
  0x32   : > { %p4172_p11 = scmp.ne.s32.totalorder %s4402_s22, %s4171_s29  ;;  %p4173_p0 = pneg %p4395_p13 }
  0x33   : > { %s4176_s6 = scalar_lea.hbm %s6138_s0, 6144  ;;  %p4177_p7 = scmp.lt.u32.totalorder %s4402_s22, %s6138_s0 }
  0x34   : > { %p4174_p3 = pnand %p4173_p0, %p4172_p11  ;;  %p4178_p9 = scmp.lt.u32.totalorder %s4176_s6, %s4171_s29 }
  0x35   : > { %p4180_p2 = scmp.lt.u32.totalorder %s4171_s29, %s4402_s22 }
  0x36   : > { %p4175_p5 = pneg %p4174_p3  ;;  %p4179_p1 = por %p4178_p9, %p4177_p7 }
  0x38   : > { %p4181_p4 = por %p4180_p2, %p4179_p1 }
  0x3a   : > { %p4182_p6 = pnand %p4181_p4, %p4175_p5 }
  0x3c   : > { %4185 = shalt.err (!%p4182_p6)
}
  0x3d   : > { %s4186_s18 = scalar_lea.vmem %s4404_s27, 3072  ;;  %s4276_s24 = smov [#allocation2]  }
  0x3e   : > { %p4187_p8 = scmp.ne.s32.totalorder %s4404_s27, %s4186_s18  ;;  %s4191_s19 = sshll.u32 %s4276_s24, 4  ;;  %s4192_s19 = int_to_ptr.vmem [resolvable:$false] %s4191_s19 }
  0x3f   : > { %s4193_s23 = scalar_lea.vmem %s4192_s19, 6144  ;;  %p4194_p3 = scmp.lt.s32.totalorder %s4404_s27, %s4192_s19 }
  0x40   : > { %p4189_p10 = pnand %p4187_p8, %p4173_p0  ;;  %p4195_p7 = scmp.lt.s32.totalorder %s4193_s23, %s4186_s18 }
  0x42   : > { %p4190_p11 = pneg %p4189_p10  ;;  %p4196_p9 = por %p4195_p7, %p4194_p3 }
  0x44   : > { %p4197_p1 = pnand %p4196_p9, %p4190_p11 }
  0x46   : > { %4200 = shalt.err (!%p4197_p1)
}
  0x47   : > { %4097 = dma.hbm_to_vmem [thread:$0]  (!%p4395_p13), %s4402_s22, 3072, %s4404_s27, %s4406_s28, %s4274_s4, %s4274_s4, %s4275_s5  }
  0x48   : > { %p6151_p0 = scmp.ne.s32.totalorder %s6146_s17, 0 }
  0x49   : > { %s4440_s26 = sand.u32 (!%p6151_p0), 1, %s4263_s10   ;;  %p6152_p5 = scmp.ne.s32.totalorder (!%p6151_p0), %s6144_s15, 0 }
  0x4a   : > { %147 = sbr.rel (%p6151_p0) target bundleno = 820 (0x334), region = 28  ;;  %s150_s30 = scalar_lea.sflag (!%p6151_p0), [#allocation3], %s4440_s26 }
  0x4b   : > { %s4080_s29 = smul.u32 (!%p6151_p0), 192, %s4440_s26 }
  0x4d   : > { %s4444_s3 = scalar_lea.vmem (!%p6151_p0), [#allocation2], %s4080_s29 }
  0x51   : > { %4246 = dma.done.wait (%p6152_p5), %s150_s30, 3072  }
  0x52   : > { %4248 = vsyncadd (%p6152_p5), %s150_s30, 4294964224  ;;  %p6153_p13 = scmp.eq.s32.totalorder %s4316_s13, 0 }
  0x54   : > { %4250 = dma.done.wait (%p6153_p13), [#allocation6], 1024   ;;  %p6154_p2 = pmov %p6153_p13 }
  0x55   : > { %v204_v0 = vld [vmem:[#allocation5] sm:$0xff]  ;;  %v205_v1 = vld [vmem:[#allocation5 + $0x8] sm:$0xff]  ;;  %v206_v2 = vld [vmem:[#allocation5 + $0x10] sm:$0xff]  ;;  %vm212_vm0 = vcmask 523264   ;;  %vm3182_vm1 = vcmask 1040384   ;;  %vm3207_vm2 = vcmask 1041408  }
  0x56   : > { %4252 = vsyncadd (%p6154_p2), [#allocation6], 4294966272  ;;  %v4055_v3 = vpack.c.bf16 %v205_v1, %v204_v0  ;;  %v207_v4 = vld [vmem:[#allocation5 + $0x18] sm:$0xff]  ;;  %v208_v6 = vld [vmem:[#allocation5 + $0x20] sm:$0xff]  ;;  %vm3232_vm3 = vcmask 1042432   ;;  %vm3257_vm4 = vcmask 1043456  }
  0x57   : > { %v4059_v5 = vpack.c.bf16 %v207_v4, %v206_v2  ;;  %v209_v7 = vld [vmem:[#allocation5 + $0x28] sm:$0xff]  ;;  %v180_v8 = vld [vmem:[%s4444_s3] sm:$0xff]  ;;  %v210_v11 = vld [vmem:[#allocation5 + $0x30] sm:$0xff]  ;;  %vm3282_vm5 = vcmask 1044480   ;;  %vm3307_vm6 = vcmask 1045504   ;;  %vm3332_vm7 = vcmask 1046528  }
  0x58   : > { %4056 = vmatprep.subr.bf16.mxu0 %v4055_v3  ;;  %4071 = vmatprep.subr.bf16.mxu1 %v4055_v3  ;;  %v192_v9 = vld [vmem:[%s4444_s3 + $0x60] sm:$0xff]  ;;  %v4063_v10 = vpack.c.bf16 %v209_v7, %v208_v6  ;;  %v211_v12 = vld [vmem:[#allocation5 + $0x38] sm:$0xff]  ;;  %v181_v14 = vld [vmem:[%s4444_s3 + $0x8] sm:$0xff]  ;;  %s4081_s15 = smul.u32 768, %s4440_s26  ;;  %s3832_s27 = scalar_lea.sflag [#allocation4], %s4440_s26 }
  0x59   : > { %4058 = vmatpush3.bf16.msra.mxu0 %v4055_v3  ;;  %4075 = vmatpush3.bf16.msra.mxu1 %v4055_v3  ;;  %v4067_v13 = vpack.c.bf16 %v211_v12, %v210_v11  ;;  %v193_v15 = vld [vmem:[%s4444_s3 + $0x68] sm:$0xff]  ;;  %v182_v16 = vld [vmem:[%s4444_s3 + $0x10] sm:$0xff]  ;;  %v183_v18 = vld [vmem:[%s4444_s3 + $0x18] sm:$0xff]  ;;  %s3970_s4 = smul.u32 12288, %s4316_s13  ;;  %s4277_s6 = smov [#allocation7]  }
  0x5a   : > { %4060 = vmatprep.subr.bf16.mxu0 %v4059_v5  ;;  %4072 = vmatprep.subr.bf16.mxu1 %v4059_v5  ;;  %v194_v17 = vld [vmem:[%s4444_s3 + $0x70] sm:$0xff]  ;;  %v195_v19 = vld [vmem:[%s4444_s3 + $0x78] sm:$0xff]  ;;  %v184_v20 = vld [vmem:[%s4444_s3 + $0x20] sm:$0xff]  ;;  %s4684_s17 = scalar_lea.vmem [#allocation7], %s4081_s15  ;;  %s4205_s7 = sshll.u32 %s4277_s6, 4  ;;  %s4206_s7 = int_to_ptr.vmem [resolvable:$false] %s4205_s7 }
  0x5b   : > { %4019 = vmatprep.mubr.msk.f32.mxu0 %vm212_vm0, %v180_v8  ;;  %4037 = vmatprep.mubr.msk.f32.mxu1 %vm212_vm0, %v192_v9  ;;  %v196_v21 = vld [vmem:[%s4444_s3 + $0x80] sm:$0xff]  ;;  %v185_v22 = vld [vmem:[%s4444_s3 + $0x28] sm:$0xff]  ;;  %v186_v24 = vld [vmem:[%s4444_s3 + $0x30] sm:$0xff]  ;;  %s3846_s5 = sshll.u32 %s4684_s17, 4  ;;  %s6084_s22 = scalar_lea.hbm %s6140_s2, %s3970_s4  ;;  %s6089_s5 = int_to_ptr.vmem [resolvable:$true] %s3846_s5 }
  0x5c   : > { %v197_v23 = vld [vmem:[%s4444_s3 + $0x88] sm:$0xff]  ;;  %v198_v25 = vld [vmem:[%s4444_s3 + $0x90] sm:$0xff]  ;;  %v187_v26 = vld [vmem:[%s4444_s3 + $0x38] sm:$0xff]  ;;  %s4201_s28 = scalar_lea.vmem %s6089_s5, 12288  ;;  %s4207_s20 = scalar_lea.vmem %s4206_s7, 24576 }
  0x5d   : > { %4062 = vmatpush3.bf16.msra.mxu0 %v4059_v5  ;;  %4076 = vmatpush3.bf16.msra.mxu1 %v4059_v5  ;;  %v199_v27 = vld [vmem:[%s4444_s3 + $0x98] sm:$0xff]  ;;  %v188_v28 = vld [vmem:[%s4444_s3 + $0x40] sm:$0xff]  ;;  %v189_v30 = vld [vmem:[%s4444_s3 + $0x48] sm:$0xff]  ;;  %p4202_p4 = scmp.ne.s32.totalorder %s6089_s5, %s4201_s28  ;;  %p4208_p10 = scmp.lt.s32.totalorder %s6089_s5, %s4206_s7 }
  0x5e   : > { %4064 = vmatprep.subr.bf16.mxu0 %v4063_v10  ;;  %4073 = vmatprep.subr.bf16.mxu1 %v4063_v10  ;;  %v200_v29 = vld [vmem:[%s4444_s3 + $0xa0] sm:$0xff]  ;;  %v201_v31 = vld [vmem:[%s4444_s3 + $0xa8] sm:$0xff]  ;;  %v190_v32 = vld [vmem:[%s4444_s3 + $0x50] sm:$0xff]  ;;  %p4209_p11 = scmp.lt.s32.totalorder %s4207_s20, %s4201_s28 }
  0x5f   : > { %v202_v33 = vld [vmem:[%s4444_s3 + $0xb0] sm:$0xff]  ;;  %v191_v34 = vld [vmem:[%s4444_s3 + $0x58] sm:$0xff]  ;;  %p4203_p6 = pnand %p4202_p4, %p4389_p12 }
  0x60   : > { %v203_v35 = vld [vmem:[%s4444_s3 + $0xb8] sm:$0xff]  ;;  %p4210_p3 = por %p4209_p11, %p4208_p10 }
  0x61   : > { %4066 = vmatpush3.bf16.msra.mxu0 %v4063_v10  ;;  %4077 = vmatpush3.bf16.msra.mxu1 %v4063_v10  ;;  %p4204_p8 = pneg %p4203_p6 }
  0x62   : > { %4068 = vmatprep.subr.bf16.mxu0 %v4067_v13  ;;  %4074 = vmatprep.subr.bf16.mxu1 %v4067_v13 }
  0x63   : > { %p4211_p7 = pnand %p4210_p3, %p4204_p8 }
  0x65   : > { %4070 = vmatpush3.bf16.msra.mxu0 %v4067_v13  ;;  %4078 = vmatpush3.bf16.msra.mxu1 %v4067_v13 }
  0x68   : > { %4020 = vmatmul.mubr.msk.f32.vlgmr.msra.gmra.mrb[0].mxu0 %vm212_vm0, %v181_v14  ;;  %4038 = vmatmul.mubr.msk.f32.vlgmr.msra.gmra.mrb[0].mxu1 %vm212_vm0, %v193_v15 }
  0x69   : > { %4022 = vmatprep.mubr.msk.f32.mxu0 %vm212_vm0, %v182_v16  ;;  %4040 = vmatprep.mubr.msk.f32.mxu1 %vm212_vm0, %v194_v17 }
  0x6c   : > { %4023 = vmatmul.mubr.msk.f32.gmra.mrb[2].mxu0 %vm212_vm0, %v183_v18  ;;  %4041 = vmatmul.mubr.msk.f32.gmra.mrb[2].mxu1 %vm212_vm0, %v195_v19 }
  0x6d   : > { %4025 = vmatprep.mubr.msk.f32.mxu0 %vm212_vm0, %v184_v20  ;;  %4043 = vmatprep.mubr.msk.f32.mxu1 %vm212_vm0, %v196_v21 }
  0x70   : > { %4026 = vmatmul.mubr.msk.f32.gmra.mrb[4].mxu0 %vm212_vm0, %v185_v22  ;;  %4044 = vmatmul.mubr.msk.f32.gmra.mrb[4].mxu1 %vm212_vm0, %v197_v23 }
  0x71   : > { %4028 = vmatprep.mubr.msk.f32.mxu0 %vm212_vm0, %v186_v24  ;;  %4046 = vmatprep.mubr.msk.f32.mxu1 %vm212_vm0, %v198_v25 }
  0x74   : > { %4029 = vmatmul.mubr.msk.f32.gmra.mrb[6].mxu0 %vm212_vm0, %v187_v26  ;;  %4047 = vmatmul.mubr.msk.f32.gmra.mrb[6].mxu1 %vm212_vm0, %v199_v27 }
  0x75   : > { %4031 = vmatprep.mubr.msk.f32.mxu0 %vm212_vm0, %v188_v28  ;;  %4049 = vmatprep.mubr.msk.f32.mxu1 %vm212_vm0, %v200_v29 }
  0x78   : > { %4032 = vmatmul.mubr.msk.f32.gmra.mrb[8].mxu0 %vm212_vm0, %v189_v30  ;;  %4050 = vmatmul.mubr.msk.f32.gmra.mrb[8].mxu1 %vm212_vm0, %v201_v31 }
  0x79   : > { %4034 = vmatprep.mubr.msk.f32.mxu0 %vm212_vm0, %v190_v32  ;;  %4052 = vmatprep.mubr.msk.f32.mxu1 %vm212_vm0, %v202_v33 }
  0x7c   : > { %4035 = vmatmul.mubr.msk.f32.gmra.mrb[10].mxu0 %vm212_vm0, %v191_v34  ;;  %4053 = vmatmul.mubr.msk.f32.gmra.mrb[10].mxu1 %vm212_vm0, %v203_v35 }
 0x13b   : > { %v4502_v36 = vpop.f32.mrb[0].mxu0  ;;  %v4504_v37 = vpop.f32.mrb[0].mxu1 }
 0x13c   : > { %v495_v38 = vrot.slane %v4502_v36, 7  ;;  %v4507_v39 = vpop.f32.mrb[1].mxu0  ;;  %v4509_v40 = vpop.f32.mrb[1].mxu1  ;;  %v507_v42 = vrot.slane %v4504_v37, 7 }
 0x13d   : > { %v494_v43 = vrot.slane %v4507_v39, 7  ;;  %v506_v44 = vrot.slane %v4509_v40, 7 }
 0x13e   : > { %v543_v41 = vsub.f32 %v4502_v36, %v495_v38  ;;  %v4522_v60 = vsub.f32 %v4504_v37, %v507_v42 }
 0x13f   : > { %v4515_v45 = vpop.f32.mrb[2].mxu0  ;;  %v4517_v46 = vpop.f32.mrb[2].mxu1  ;;  %v4527_v0 = vsub.f32 %v4507_v39, %v494_v43  ;;  %v4530_v1 = vsub.f32 %v4509_v40, %v506_v44 }
 0x140   : > { %v567_v47 = vmul.f32 0.46666667, %v543_v41  ;;  %v687_v48 = vmul.f32 0.93333334, %v543_v41  ;;  %v807_v49 = vmul.f32 0.4, %v543_v41 }
 0x141   : > { %v927_v50 = vmul.f32 0.8666667, %v543_v41  ;;  %v1047_v51 = vmul.f32 0.33333334, %v543_v41  ;;  %v1167_v52 = vmul.f32 0.8, %v543_v41 }
 0x142   : > { %v615_v53 = vrot.slane %v567_v47, 1  ;;  %v735_v54 = vrot.slane %v687_v48, 1  ;;  %v855_v55 = vrot.slane %v807_v49, 1  ;;  %v1287_v56 = vmul.f32 0.26666668, %v543_v41  ;;  %v4519_v57 = vpop.f32.mrb[3].mxu0 }
 0x143   : > { %v975_v58 = vrot.slane %v927_v50, 1  ;;  %v1407_v59 = vmul.f32 0.73333335, %v543_v41  ;;  %v4524_v61 = vpop.f32.mrb[3].mxu1  ;;  %v1095_v62 = vrot.slane %v1047_v51, 1  ;;  %v1215_v63 = vrot.slane %v1167_v52, 1 }
 0x144   : > { %v663_v2 = vadd.f32 %v4502_v36, %v615_v53  ;;  %v783_v3 = vadd.f32 %v4502_v36, %v735_v54  ;;  %v1335_v4 = vrot.slane %v1287_v56, 1  ;;  %v903_v6 = vadd.f32 %v4502_v36, %v855_v55  ;;  %v4547_v34 = vpop.f32.mrb[4].mxu0 }
 0x145   : > { %v1455_v5 = vrot.slane %v1407_v59, 1  ;;  %v1527_v7 = vmul.f32 0.2, %v543_v41  ;;  %v1647_v8 = vmul.f32 0.6666667, %v543_v41  ;;  %v1023_v10 = vadd.f32 %v4502_v36, %v975_v58 }
 0x146   : > { %v1767_v9 = vmul.f32 0.13333334, %v543_v41  ;;  %v1887_v11 = vmul.f32 0.6, %v543_v41  ;;  %v2007_v12 = vmul.f32 0.06666667, %v543_v41  ;;  %v1143_v18 = vadd.f32 %v4502_v36, %v1095_v62 }
 0x147   : > { %v2127_v13 = vmul.f32 0.53333336, %v543_v41  ;;  %v1503_v14 = vadd.f32 %v4502_v36, %v1455_v5  ;;  %v1575_v15 = vrot.slane %v1527_v7, 1  ;;  %v1695_v16 = vrot.slane %v1647_v8, 1 }
 0x148   : > { %v1815_v17 = vrot.slane %v1767_v9, 1  ;;  %v1263_v19 = vadd.f32 %v4502_v36, %v1215_v63  ;;  %v1935_v20 = vrot.slane %v1887_v11, 1  ;;  %v2055_v21 = vrot.slane %v2007_v12, 1 }
 0x149   : > { %v1623_v22 = vadd.f32 %v4502_v36, %v1575_v15  ;;  %v1743_v23 = vadd.f32 %v4502_v36, %v1695_v16  ;;  %v2271_v25 = vrot.slane %v663_v2, 7  ;;  %v4543_v26 = vadd.f32 %v4502_v36, %v1335_v4 }
 0x14a   : > { %v1863_v24 = vadd.f32 %v4502_v36, %v1815_v17  ;;  %v1983_v27 = vadd.f32 %v4502_v36, %v1935_v20  ;;  %v2175_v28 = vrot.slane %v2127_v13, 1  ;;  %v2343_v29 = vrot.slane %v783_v3, 6 }
 0x14b   : > { %v2103_v30 = vadd.f32 %v4502_v36, %v2055_v21  ;;  %v2415_v31 = vrot.slane %v903_v6, 6  ;;  %v2487_v32 = vrot.slane %v1023_v10, 5  ;;  %v2775_v33 = vrot.slane %v1503_v14, 3 }
 0x14c   : > { %v2559_v35 = vrot.slane %v1143_v18, 5  ;;  %v2847_v38 = vrot.slane %v1623_v22, 3  ;;  %v2919_v41 = vrot.slane %v1743_v23, 2  ;;  %v2991_v42 = vrot.slane %v1863_v24, 2 }
 0x14d   : > { %v3063_v43 = vrot.slane %v1983_v27, 1  ;;  %v3184_v44 = vsel %vm3182_vm1, %v4502_v36, %v2271_v25  ;;  %v579_v47 = vmul.f32 0.46666667, %v4522_v60  ;;  %v699_v48 = vmul.f32 0.93333334, %v4522_v60 }
 0x14e   : > { %v3209_v49 = vsel %vm3207_vm2, %v3184_v44, %v2343_v29  ;;  %v3358_v50 = vsel %vm3182_vm1, %v2775_v33, %v2847_v38  ;;  %v819_v51 = vmul.f32 0.4, %v4522_v60  ;;  %v939_v52 = vmul.f32 0.8666667, %v4522_v60 }
 0x14f   : > { %v3234_v53 = vsel %vm3232_vm3, %v3209_v49, %v2415_v31  ;;  %v3382_v54 = vsel %vm3207_vm2, %v3358_v50, %v2919_v41  ;;  %v627_v55 = vrot.slane %v579_v47, 1  ;;  %v747_v56 = vrot.slane %v699_v48, 1 }
 0x150   : > { %v2223_v58 = vadd.f32 %v4502_v36, %v2175_v28  ;;  %v3259_v59 = vsel %vm3257_vm4, %v3234_v53, %v2487_v32  ;;  %v3406_v62 = vsel %vm3232_vm3, %v3382_v54, %v2991_v42  ;;  %v867_v63 = vrot.slane %v819_v51, 1 }
 0x151   : > { %v2631_v2 = vrot.slane %v1263_v19, 4  ;;  %v3135_v3 = vrot.slane %v2103_v30, 1  ;;  %v3284_v4 = vsel %vm3282_vm5, %v3259_v59, %v2559_v35  ;;  %v3430_v5 = vsel %vm3257_vm4, %v3406_v62, %v3063_v43 }
 0x152   : > { %v2703_v6 = vrot.slane %v4543_v26, 4  ;;  %v675_v7 = vadd.f32 %v4504_v37, %v627_v55  ;;  %v795_v8 = vadd.f32 %v4504_v37, %v747_v56  ;;  %v987_v9 = vrot.slane %v939_v52, 1 }
 0x153   : > { %v4568_v10 = vsel %vm3307_vm6, %v3284_v4, %v2631_v2  ;;  %v3454_v11 = vsel %vm3282_vm5, %v3430_v5, %v3135_v3  ;;  %v1059_v12 = vmul.f32 0.33333334, %v4522_v60  ;;  %v1179_v13 = vmul.f32 0.8, %v4522_v60 }
 0x154   : > { %v915_v14 = vadd.f32 %v4504_v37, %v867_v63  ;;  %v1299_v15 = vmul.f32 0.26666668, %v4522_v60  ;;  %v1419_v16 = vmul.f32 0.73333335, %v4522_v60  ;;  %v1539_v17 = vmul.f32 0.2, %v4522_v60 }
 0x155   : > { %v1107_v18 = vrot.slane %v1059_v12, 1  ;;  %v1227_v19 = vrot.slane %v1179_v13, 1  ;;  %v1659_v20 = vmul.f32 0.6666667, %v4522_v60  ;;  %v1779_v21 = vmul.f32 0.13333334, %v4522_v60 }
 0x156   : > { %v1347_v22 = vrot.slane %v1299_v15, 1  ;;  %v1467_v23 = vrot.slane %v1419_v16, 1  ;;  %v1587_v24 = vrot.slane %v1539_v17, 1  ;;  %v1899_v25 = vmul.f32 0.6, %v4522_v60  ;;  %v4603_v16 = vpop.f32.mrb[4].mxu1 }
 0x157   : > { %v1035_v27 = vadd.f32 %v4504_v37, %v987_v9  ;;  %v1155_v28 = vadd.f32 %v4504_v37, %v1107_v18  ;;  %v1707_v29 = vrot.slane %v1659_v20, 1  ;;  %v1827_v30 = vrot.slane %v1779_v21, 1 }
 0x158   : > { %v1275_v31 = vadd.f32 %v4504_v37, %v1227_v19  ;;  %v1515_v32 = vadd.f32 %v4504_v37, %v1467_v23  ;;  %v1635_v33 = vadd.f32 %v4504_v37, %v1587_v24  ;;  %v1947_v35 = vrot.slane %v1899_v25, 1 }
 0x159   : > { %v1755_v38 = vadd.f32 %v4504_v37, %v1707_v29  ;;  %v1875_v41 = vadd.f32 %v4504_v37, %v1827_v30  ;;  %v2019_v42 = vmul.f32 0.06666667, %v4522_v60  ;;  %v2139_v43 = vmul.f32 0.53333336, %v4522_v60 }
 0x15a   : > { %v3478_v44 = vsel %vm3307_vm6, %v3454_v11, %v2223_v58  ;;  %v1395_v47 = vadd.f32 %v4504_v37, %v1347_v22  ;;  %v1995_v48 = vadd.f32 %v4504_v37, %v1947_v35  ;;  %v2283_v49 = vrot.slane %v675_v7, 7 }
 0x15b   : > { %v2067_v50 = vrot.slane %v2019_v42, 1  ;;  %v2187_v51 = vrot.slane %v2139_v43, 1  ;;  %v2355_v52 = vrot.slane %v795_v8, 6  ;;  %v2427_v53 = vrot.slane %v915_v14, 6 }
 0x15c   : > { %v2499_v54 = vrot.slane %v1035_v27, 5  ;;  %v2571_v55 = vrot.slane %v1155_v28, 5  ;;  %v2787_v56 = vrot.slane %v1515_v32, 3  ;;  %v2859_v59 = vrot.slane %v1635_v33, 3 }
 0x15d   : > { %v2115_v62 = vadd.f32 %v4504_v37, %v2067_v50  ;;  %v2643_v63 = vrot.slane %v1275_v31, 4  ;;  %v2931_v2 = vrot.slane %v1755_v38, 2  ;;  %v3003_v60 = vrot.slane %v1875_v41, 2 }
 0x15e   : > { %v3075_v3 = vrot.slane %v1995_v48, 1  ;;  %v3196_v58 = vsel %vm3182_vm1, %v4504_v37, %v2283_v49  ;;  %v3370_v4 = vsel %vm3182_vm1, %v2787_v56, %v2859_v59  ;;  %v566_v5 = vmul.f32 0.46666667, %v4527_v0 }
 0x15f   : > { %v3147_v7 = vrot.slane %v2115_v62, 1  ;;  %v3221_v8 = vsel %vm3207_vm2, %v3196_v58, %v2355_v52  ;;  %v3394_v9 = vsel %vm3207_vm2, %v3370_v4, %v2931_v2  ;;  %v686_v11 = vmul.f32 0.93333334, %v4527_v0 }
 0x160   : > { %v3246_v12 = vsel %vm3232_vm3, %v3221_v8, %v2427_v53  ;;  %v3418_v13 = vsel %vm3232_vm3, %v3394_v9, %v3003_v60  ;;  %v614_v14 = vrot.slane %v566_v5, 1  ;;  %v806_v15 = vmul.f32 0.4, %v4527_v0 }
 0x161   : > { %v3271_v17 = vsel %vm3257_vm4, %v3246_v12, %v2499_v54  ;;  %v3442_v18 = vsel %vm3257_vm4, %v3418_v13, %v3075_v3  ;;  %v734_v19 = vrot.slane %v686_v11, 1  ;;  %v926_v20 = vmul.f32 0.8666667, %v4527_v0 }
 0x162   : > { %v4612_v21 = vsel %vm3332_vm7, %v4568_v10, %v2703_v6  ;;  %v2235_v22 = vadd.f32 %v4504_v37, %v2187_v51  ;;  %v3296_v23 = vsel %vm3282_vm5, %v3271_v17, %v2571_v55  ;;  %v3466_v24 = vsel %vm3282_vm5, %v3442_v18, %v3147_v7 }
 0x163   : > { %v4619_v25 = vsel %vm3332_vm7, %v3478_v44, %v4502_v36  ;;  %v2715_v27 = vrot.slane %v1395_v47, 4  ;;  %v3321_v28 = vsel %vm3307_vm6, %v3296_v23, %v2643_v63  ;;  %v662_v29 = vadd.f32 %v614_v14, %v4507_v39 }
 0x164   : > { %v4624_v26 = vsel %vm3307_vm6, %v3466_v24, %v2235_v22  ;;  %v854_v6 = vrot.slane %v806_v15, 1  ;;  %v974_v10 = vrot.slane %v926_v20, 1  ;;  %v1046_v30 = vmul.f32 0.33333334, %v4527_v0 }
 0x165   : > { %v782_v31 = vadd.f32 %v734_v19, %v4507_v39  ;;  %v1166_v32 = vmul.f32 0.8, %v4527_v0  ;;  %v1286_v33 = vmul.f32 0.26666668, %v4527_v0  ;;  %v1406_v36 = vmul.f32 0.73333335, %v4527_v0 }
 0x166   : > { %v4632_v35 = vsel %vm3332_vm7, %v3321_v28, %v2715_v27  ;;  %v1094_v38 = vrot.slane %v1046_v30, 1  ;;  %v1526_v41 = vmul.f32 0.2, %v4527_v0  ;;  %v1646_v42 = vmul.f32 0.6666667, %v4527_v0 }
 0x167   : > { %v1214_v43 = vrot.slane %v1166_v32, 1  ;;  %v1334_v44 = vrot.slane %v1286_v33, 1  ;;  %v1454_v47 = vrot.slane %v1406_v36, 1  ;;  %v1766_v48 = vmul.f32 0.13333334, %v4527_v0 }
 0x168   : > { %v902_v49 = vadd.f32 %v854_v6, %v4507_v39  ;;  %v1574_v50 = vrot.slane %v1526_v41, 1  ;;  %v1694_v51 = vrot.slane %v1646_v42, 1  ;;  %v1886_v52 = vmul.f32 0.6, %v4527_v0 }
 0x169   : > { %v1022_v53 = vadd.f32 %v974_v10, %v4507_v39  ;;  %v1142_v54 = vadd.f32 %v1094_v38, %v4507_v39  ;;  %v1502_v55 = vadd.f32 %v1454_v47, %v4507_v39  ;;  %v1814_v56 = vrot.slane %v1766_v48, 1  ;;  %v4666_v47 = vpop.f32.mrb[5].mxu0 }
 0x16a   : > { %v1622_v59 = vadd.f32 %v1574_v50, %v4507_v39  ;;  %v1742_v62 = vadd.f32 %v1694_v51, %v4507_v39  ;;  %v1934_v63 = vrot.slane %v1886_v52, 1  ;;  %v2006_v2 = vmul.f32 0.06666667, %v4527_v0 }
 0x16b   : > { %v1262_v60 = vadd.f32 %v1214_v43, %v4507_v39  ;;  %v1382_v3 = vadd.f32 %v1334_v44, %v4507_v39  ;;  %v2126_v58 = vmul.f32 0.53333336, %v4527_v0  ;;  %v2270_v4 = vrot.slane %v662_v29, 7 }
 0x16c   : > { %v1862_v5 = vadd.f32 %v1814_v56, %v4507_v39  ;;  %v2054_v7 = vrot.slane %v2006_v2, 1  ;;  %v2342_v8 = vrot.slane %v782_v31, 6  ;;  %v2414_v9 = vrot.slane %v902_v49, 6 }
 0x16d   : > { %v1982_v11 = vadd.f32 %v1934_v63, %v4507_v39  ;;  %v2486_v12 = vrot.slane %v1022_v53, 5  ;;  %v2558_v13 = vrot.slane %v1142_v54, 5  ;;  %v2774_v14 = vrot.slane %v1502_v55, 3 }
 0x16e   : > { %v2102_v15 = vadd.f32 %v2054_v7, %v4507_v39  ;;  %v2174_v17 = vrot.slane %v2126_v58, 1  ;;  %v2846_v18 = vrot.slane %v1622_v59, 3  ;;  %v2918_v19 = vrot.slane %v1742_v62, 2 }
 0x16f   : > { %v2630_v20 = vrot.slane %v1262_v60, 4  ;;  %v2702_v22 = vrot.slane %v1382_v3, 4  ;;  %v3183_v0 = vsel %vm3182_vm1, %v4507_v39, %v2270_v4  ;;  %v578_v23 = vmul.f32 0.46666667, %v4530_v1 }
 0x170   : > { %v2990_v24 = vrot.slane %v1862_v5, 2  ;;  %v3208_v27 = vsel %vm3207_vm2, %v3183_v0, %v2342_v8  ;;  %v3357_v28 = vsel %vm3182_vm1, %v2774_v14, %v2846_v18  ;;  %v698_v29 = vmul.f32 0.93333334, %v4530_v1 }
 0x171   : > { %v3062_v6 = vrot.slane %v1982_v11, 1  ;;  %v3233_v10 = vsel %vm3232_vm3, %v3208_v27, %v2414_v9  ;;  %v3381_v30 = vsel %vm3207_vm2, %v3357_v28, %v2918_v19  ;;  %v818_v31 = vmul.f32 0.4, %v4530_v1 }
 0x172   : > { %v3134_v32 = vrot.slane %v2102_v15, 1  ;;  %v3258_v33 = vsel %vm3257_vm4, %v3233_v10, %v2486_v12  ;;  %v3405_v36 = vsel %vm3232_vm3, %v3381_v30, %v2990_v24  ;;  %v626_v38 = vrot.slane %v578_v23, 1 }
 0x173   : > { %v2222_v41 = vadd.f32 %v2174_v17, %v4507_v39  ;;  %v3283_v42 = vsel %vm3282_vm5, %v3258_v33, %v2558_v13  ;;  %v3429_v43 = vsel %vm3257_vm4, %v3405_v36, %v3062_v6  ;;  %v746_v44 = vrot.slane %v698_v29, 1 }
 0x174   : > { %v3308_v48 = vsel %vm3307_vm6, %v3283_v42, %v2630_v20  ;;  %v3453_v49 = vsel %vm3282_vm5, %v3429_v43, %v3134_v32  ;;  %v866_v50 = vrot.slane %v818_v31, 1  ;;  %v938_v51 = vmul.f32 0.8666667, %v4530_v1 }
 0x175   : > { %v4674_v52 = vsel %vm3332_vm7, %v4624_v26, %v4504_v37  ;;  %v3333_v53 = vsel %vm3332_vm7, %v3308_v48, %v2702_v22  ;;  %v3477_v54 = vsel %vm3307_vm6, %v3453_v49, %v2222_v41  ;;  %v1058_v55 = vmul.f32 0.33333334, %v4530_v1 }
 0x176   : > { %v3501_v56 = vsel %vm3332_vm7, %v3477_v54, %v4507_v39  ;;  %v3525_v59 = vsub.f32 %v4612_v21, %v3333_v53  ;;  %3735 = vst [vmem:[%s4684_s17] sm:$0xff] %v3333_v53  ;;  %v674_v37 = vadd.f32 %v626_v38, %v4509_v40  ;;  %v1178_v26 = vmul.f32 0.8, %v4530_v1 }
 0x177   : > { %v3526_v62 = vsub.f32 %v4619_v25, %v3501_v56  ;;  %3736 = vst [vmem:[%s4684_s17 + $0x8] sm:$0xff] %v3501_v56  ;;  %v794_v63 = vadd.f32 %v746_v44, %v4509_v40  ;;  %v1298_v2 = vmul.f32 0.26666668, %v4530_v1  ;;  %v1418_v39 = vmul.f32 0.73333335, %v4530_v1 }
 0x178   : > { %v3531_v60 = vmul.f32 0.46666667, %v3525_v59  ;;  %v3543_v3 = vmul.f32 0.93333334, %v3525_v59  ;;  %v914_v58 = vadd.f32 %v866_v50, %v4509_v40  ;;  %v986_v4 = vrot.slane %v938_v51, 1 }
 0x179   : > { %v3532_v5 = vmul.f32 0.46666667, %v3526_v62  ;;  %v3544_v7 = vmul.f32 0.93333334, %v3526_v62  ;;  %v1106_v8 = vrot.slane %v1058_v55, 1  ;;  %v1226_v9 = vrot.slane %v1178_v26, 1 }
 0x17a   : > { %v3537_v11 = vadd.f32 %v3531_v60, %v3333_v53  ;;  %v3549_v12 = vadd.f32 %v3543_v3, %v3333_v53  ;;  %v1466_v13 = vrot.slane %v1418_v39, 1  ;;  %v2282_v14 = vrot.slane %v674_v37, 7  ;;  %v4719_v62 = vpop.f32.mrb[5].mxu1 }
 0x17b   : > { %v3538_v15 = vadd.f32 %v3532_v5, %v3501_v56  ;;  %v3550_v17 = vadd.f32 %v3544_v7, %v3501_v56  ;;  %v1346_v18 = vrot.slane %v1298_v2, 1  ;;  %v1538_v19 = vmul.f32 0.2, %v4530_v1 }
 0x17c   : > { %3737 = vst [vmem:[%s4684_s17 + $0x10] sm:$0xff] %v3537_v11  ;;  %3739 = vst [vmem:[%s4684_s17 + $0x20] sm:$0xff] %v3549_v12  ;;  %v1034_v20 = vadd.f32 %v986_v4, %v4509_v40  ;;  %v1658_v22 = vmul.f32 0.6666667, %v4530_v1  ;;  %v1778_v0 = vmul.f32 0.13333334, %v4530_v1  ;;  %v1154_v24 = vadd.f32 %v1106_v8, %v4509_v40 }
 0x17d   : > { %v1898_v23 = vmul.f32 0.6, %v4530_v1  ;;  %3738 = vst [vmem:[%s4684_s17 + $0x18] sm:$0xff] %v3538_v15  ;;  %3740 = vst [vmem:[%s4684_s17 + $0x28] sm:$0xff] %v3550_v17  ;;  %v1586_v27 = vrot.slane %v1538_v19, 1  ;;  %v1514_v6 = vadd.f32 %v1466_v13, %v4509_v40  ;;  %v1274_v32 = vadd.f32 %v1226_v9, %v4509_v40 }
 0x17e   : > { %v2018_v28 = vmul.f32 0.06666667, %v4530_v1  ;;  %v2138_v29 = vmul.f32 0.53333336, %v4530_v1  ;;  %v1706_v10 = vrot.slane %v1658_v22, 1  ;;  %v1826_v30 = vrot.slane %v1778_v0, 1 }
 0x17f   : > { %v1946_v31 = vrot.slane %v1898_v23, 1  ;;  %v1634_v33 = vadd.f32 %v1586_v27, %v4509_v40  ;;  %v1394_v41 = vadd.f32 %v1346_v18, %v4509_v40  ;;  %v2354_v44 = vrot.slane %v794_v63, 6 }
 0x180   : > { %v2066_v36 = vrot.slane %v2018_v28, 1  ;;  %v2186_v38 = vrot.slane %v2138_v29, 1  ;;  %v1754_v42 = vadd.f32 %v1706_v10, %v4509_v40  ;;  %v1874_v43 = vadd.f32 %v1826_v30, %v4509_v40 }
 0x181   : > { %v1994_v1 = vadd.f32 %v1946_v31, %v4509_v40  ;;  %v2426_v48 = vrot.slane %v914_v58, 6  ;;  %v2498_v49 = vrot.slane %v1034_v20, 5  ;;  %v2570_v50 = vrot.slane %v1154_v24, 5 }
 0x182   : > { %v2114_v51 = vadd.f32 %v2066_v36, %v4509_v40  ;;  %v2786_v53 = vrot.slane %v1514_v6, 3  ;;  %v2858_v54 = vrot.slane %v1634_v33, 3  ;;  %v2930_v55 = vrot.slane %v1754_v42, 2 }
 0x183   : > { %v2234_v56 = vadd.f32 %v2186_v38, %v4509_v40  ;;  %v2642_v59 = vrot.slane %v1274_v32, 4  ;;  %v3195_v37 = vsel %vm3182_vm1, %v4509_v40, %v2282_v14  ;;  %v497_v26 = vrot.slane %v4515_v45, 7 }
 0x184   : > { %v2714_v63 = vrot.slane %v1394_v41, 4  ;;  %v3002_v2 = vrot.slane %v1874_v43, 2  ;;  %v3220_v39 = vsel %vm3207_vm2, %v3195_v37, %v2354_v44  ;;  %v3369_v60 = vsel %vm3182_vm1, %v2786_v53, %v2858_v54 }
 0x185   : > { %v3074_v3 = vrot.slane %v1994_v1, 1  ;;  %v3245_v58 = vsel %vm3232_vm3, %v3220_v39, %v2426_v48  ;;  %v3393_v4 = vsel %vm3207_vm2, %v3369_v60, %v2930_v55  ;;  %v4726_v5 = vsub.f32 %v4515_v45, %v497_v26 }
 0x186   : > { %v3146_v7 = vrot.slane %v2114_v51, 1  ;;  %v3270_v8 = vsel %vm3257_vm4, %v3245_v58, %v2498_v49  ;;  %v3417_v9 = vsel %vm3232_vm3, %v3393_v4, %v3002_v2  ;;  %v509_v11 = vrot.slane %v4517_v46, 7 }
 0x187   : > { %v3295_v12 = vsel %vm3282_vm5, %v3270_v8, %v2570_v50  ;;  %v3441_v13 = vsel %vm3257_vm4, %v3417_v9, %v3074_v3  ;;  %v569_v14 = vmul.f32 0.46666667, %v4726_v5  ;;  %v689_v15 = vmul.f32 0.93333334, %v4726_v5 }
 0x188   : > { %v3320_v17 = vsel %vm3307_vm6, %v3295_v12, %v2642_v59  ;;  %v3465_v18 = vsel %vm3282_vm5, %v3441_v13, %v3146_v7  ;;  %v809_v19 = vmul.f32 0.4, %v4726_v5  ;;  %v929_v20 = vmul.f32 0.8666667, %v4726_v5 }
 0x189   : > { %v4740_v22 = vsel %vm3332_vm7, %v3320_v17, %v2714_v63  ;;  %v3489_v0 = vsel %vm3307_vm6, %v3465_v18, %v2234_v56  ;;  %v617_v23 = vrot.slane %v569_v14, 1  ;;  %v737_v24 = vrot.slane %v689_v15, 1 }
 0x18a   : > { %v4745_v27 = vsel %vm3332_vm7, %v3489_v0, %v4509_v40  ;;  %v3647_v28 = vsub.f32 %v4632_v35, %v4740_v22  ;;  %v496_v29 = vrot.slane %v4519_v57, 7  ;;  %v857_v10 = vrot.slane %v809_v19, 1 }
 0x18b   : > { %v3648_v6 = vsub.f32 %v4674_v52, %v4745_v27  ;;  %v1049_v30 = vmul.f32 0.33333334, %v4726_v5  ;;  %v4754_v31 = vsub.f32 %v4517_v46, %v509_v11  ;;  %v665_v40 = vadd.f32 %v4515_v45, %v617_v23 }
 0x18c   : > { %v3653_v32 = vmul.f32 0.2, %v3647_v28  ;;  %v3665_v33 = vmul.f32 0.6666667, %v3647_v28  ;;  %v977_v36 = vrot.slane %v929_v20, 1  ;;  %v785_v42 = vadd.f32 %v4515_v45, %v737_v24 }
 0x18d   : > { %v3654_v38 = vmul.f32 0.2, %v3648_v6  ;;  %v3666_v41 = vmul.f32 0.6666667, %v3648_v6  ;;  %v1097_v43 = vrot.slane %v1049_v30, 1  ;;  %v905_v53 = vadd.f32 %v4515_v45, %v857_v10 }
 0x18e   : > { %v3659_v44 = vadd.f32 %v3653_v32, %v4740_v22  ;;  %v3671_v1 = vadd.f32 %v3665_v33, %v4740_v22  ;;  %v1169_v48 = vmul.f32 0.8, %v4726_v5  ;;  %v1289_v49 = vmul.f32 0.26666668, %v4726_v5 }
 0x18f   : > { %v3660_v50 = vadd.f32 %v3654_v38, %v4745_v27  ;;  %v3672_v51 = vadd.f32 %v3666_v41, %v4745_v27  ;;  %v1409_v54 = vmul.f32 0.73333335, %v4726_v5  ;;  %v1025_v55 = vadd.f32 %v4515_v45, %v977_v36 }
 0x190   : > { %3785 = vst [vmem:[%s4684_s17 + $0x190] sm:$0xff] %v3659_v44  ;;  %3787 = vst [vmem:[%s4684_s17 + $0x1a0] sm:$0xff] %v3671_v1  ;;  %v1217_v56 = vrot.slane %v1169_v48, 1  ;;  %v1529_v59 = vmul.f32 0.2, %v4726_v5  ;;  %v2273_v39 = vrot.slane %v665_v40, 7  ;;  %v1145_v60 = vadd.f32 %v4515_v45, %v1097_v43 }
 0x191   : > { %v1649_v37 = vmul.f32 0.6666667, %v4726_v5  ;;  %3786 = vst [vmem:[%s4684_s17 + $0x198] sm:$0xff] %v3660_v50  ;;  %3788 = vst [vmem:[%s4684_s17 + $0x1a8] sm:$0xff] %v3672_v51  ;;  %v1457_v26 = vrot.slane %v1409_v54, 1  ;;  %v1337_v3 = vrot.slane %v1289_v49, 1 }
 0x192   : > { %v1769_v63 = vmul.f32 0.13333334, %v4726_v5  ;;  %v1889_v2 = vmul.f32 0.6, %v4726_v5  ;;  %v1577_v58 = vrot.slane %v1529_v59, 1  ;;  %v1265_v12 = vadd.f32 %v4515_v45, %v1217_v56 }
 0x193   : > { %v1697_v4 = vrot.slane %v1649_v37, 1  ;;  %v1505_v7 = vadd.f32 %v4515_v45, %v1457_v26  ;;  %v2009_v11 = vmul.f32 0.06666667, %v4726_v5  ;;  %v2129_v15 = vmul.f32 0.53333336, %v4726_v5  ;;  %v4800_v26 = vpop.f32.mrb[6].mxu0 }
 0x194   : > { %v1817_v8 = vrot.slane %v1769_v63, 1  ;;  %v1937_v9 = vrot.slane %v1889_v2, 1  ;;  %v1625_v13 = vadd.f32 %v4515_v45, %v1577_v58  ;;  %v2345_v20 = vrot.slane %v785_v42, 6 }
 0x195   : > { %v1745_v14 = vadd.f32 %v4515_v45, %v1697_v4  ;;  %v2057_v19 = vrot.slane %v2009_v11, 1  ;;  %v1385_v0 = vadd.f32 %v4515_v45, %v1337_v3  ;;  %v2177_v23 = vrot.slane %v2129_v15, 1 }
 0x196   : > { %v1865_v17 = vadd.f32 %v4515_v45, %v1817_v8  ;;  %v1985_v18 = vadd.f32 %v4515_v45, %v1937_v9  ;;  %v2417_v24 = vrot.slane %v905_v53, 6  ;;  %v2489_v28 = vrot.slane %v1025_v55, 5 }
 0x197   : > { %v2561_v6 = vrot.slane %v1145_v60, 5  ;;  %v2777_v10 = vrot.slane %v1505_v7, 3  ;;  %v2849_v30 = vrot.slane %v1625_v13, 3  ;;  %v2921_v32 = vrot.slane %v1745_v14, 2 }
 0x198   : > { %v2105_v33 = vadd.f32 %v4515_v45, %v2057_v19  ;;  %v2633_v40 = vrot.slane %v1265_v12, 4  ;;  %v2993_v36 = vrot.slane %v1865_v17, 2  ;;  %v3186_v5 = vsel %vm3182_vm1, %v4515_v45, %v2273_v39 }
 0x199   : > { %v3065_v38 = vrot.slane %v1985_v18, 1  ;;  %v3211_v41 = vsel %vm3207_vm2, %v3186_v5, %v2345_v20  ;;  %v3360_v42 = vsel %vm3182_vm1, %v2777_v10, %v2849_v30  ;;  %v581_v43 = vmul.f32 0.46666667, %v4754_v31 }
 0x19a   : > { %v3236_v44 = vsel %vm3232_vm3, %v3211_v41, %v2417_v24  ;;  %v3384_v1 = vsel %vm3207_vm2, %v3360_v42, %v2921_v32  ;;  %v701_v48 = vmul.f32 0.93333334, %v4754_v31  ;;  %v821_v49 = vmul.f32 0.4, %v4754_v31 }
 0x19b   : > { %v3261_v50 = vsel %vm3257_vm4, %v3236_v44, %v2489_v28  ;;  %v3408_v51 = vsel %vm3232_vm3, %v3384_v1, %v2993_v36  ;;  %v629_v53 = vrot.slane %v581_v43, 1  ;;  %v941_v54 = vmul.f32 0.8666667, %v4754_v31 }
 0x19c   : > { %v3137_v55 = vrot.slane %v2105_v33, 1  ;;  %v3286_v56 = vsel %vm3282_vm5, %v3261_v50, %v2561_v6  ;;  %v3432_v59 = vsel %vm3257_vm4, %v3408_v51, %v3065_v38  ;;  %v749_v37 = vrot.slane %v701_v48, 1 }
 0x19d   : > { %v2705_v63 = vrot.slane %v1385_v0, 4  ;;  %v3311_v2 = vsel %vm3307_vm6, %v3286_v56, %v2633_v40  ;;  %v4806_v39 = vsub.f32 %v4519_v57, %v496_v29  ;;  %v508_v60 = vrot.slane %v4524_v61, 7 }
 0x19e   : > { %v4810_v3 = vadd.f32 %v4515_v45, %v2177_v23  ;;  %v4813_v58 = vsel %vm3282_vm5, %v3432_v59, %v3137_v55  ;;  %v677_v4 = vadd.f32 %v4517_v46, %v629_v53  ;;  %v869_v7 = vrot.slane %v821_v49, 1 }
 0x19f   : > { %v4817_v8 = vsel %vm3332_vm7, %v3311_v2, %v2705_v63  ;;  %v989_v9 = vrot.slane %v941_v54, 1  ;;  %v1061_v11 = vmul.f32 0.33333334, %v4754_v31  ;;  %v1181_v29 = vmul.f32 0.8, %v4754_v31 }
 0x1a0   : > { %v797_v12 = vadd.f32 %v4517_v46, %v749_v37  ;;  %v1301_v13 = vmul.f32 0.26666668, %v4754_v31  ;;  %v1421_v14 = vmul.f32 0.73333335, %v4754_v31  ;;  %v1541_v15 = vmul.f32 0.2, %v4754_v31 }
 0x1a1   : > { %v1109_v17 = vrot.slane %v1061_v11, 1  ;;  %v1229_v18 = vrot.slane %v1181_v29, 1  ;;  %v1661_v19 = vmul.f32 0.6666667, %v4754_v31  ;;  %v1781_v20 = vmul.f32 0.13333334, %v4754_v31 }
 0x1a2   : > { %v1349_v0 = vrot.slane %v1301_v13, 1  ;;  %v1469_v23 = vrot.slane %v1421_v14, 1  ;;  %v1589_v24 = vrot.slane %v1541_v15, 1  ;;  %v1901_v28 = vmul.f32 0.6, %v4754_v31 }
 0x1a3   : > { %v917_v6 = vadd.f32 %v4517_v46, %v869_v7  ;;  %v1037_v10 = vadd.f32 %v4517_v46, %v989_v9  ;;  %v1709_v30 = vrot.slane %v1661_v19, 1  ;;  %v1829_v32 = vrot.slane %v1781_v20, 1 }
 0x1a4   : > { %v1157_v33 = vadd.f32 %v4517_v46, %v1109_v17  ;;  %v1517_v40 = vadd.f32 %v4517_v46, %v1469_v23  ;;  %v1637_v36 = vadd.f32 %v4517_v46, %v1589_v24  ;;  %v1949_v5 = vrot.slane %v1901_v28, 1 }
 0x1a5   : > { %v1277_v38 = vadd.f32 %v4517_v46, %v1229_v18  ;;  %v1757_v41 = vadd.f32 %v4517_v46, %v1709_v30  ;;  %v2021_v42 = vmul.f32 0.06666667, %v4754_v31  ;;  %v2141_v43 = vmul.f32 0.53333336, %v4754_v31 }
 0x1a6   : > { %v1397_v44 = vadd.f32 %v4517_v46, %v1349_v0  ;;  %v1877_v1 = vadd.f32 %v4517_v46, %v1829_v32  ;;  %v1997_v48 = vadd.f32 %v4517_v46, %v1949_v5  ;;  %v2285_v49 = vrot.slane %v677_v4, 7 }
 0x1a7   : > { %v2069_v50 = vrot.slane %v2021_v42, 1  ;;  %v2189_v51 = vrot.slane %v2141_v43, 1  ;;  %v2357_v53 = vrot.slane %v797_v12, 6  ;;  %v2429_v54 = vrot.slane %v917_v6, 6 }
 0x1a8   : > { %v2501_v55 = vrot.slane %v1037_v10, 5  ;;  %v2573_v56 = vrot.slane %v1157_v33, 5  ;;  %v2789_v59 = vrot.slane %v1517_v40, 3  ;;  %v2861_v37 = vrot.slane %v1637_v36, 3 }
 0x1a9   : > { %v2117_v63 = vadd.f32 %v4517_v46, %v2069_v50  ;;  %v2237_v2 = vadd.f32 %v4517_v46, %v2189_v51  ;;  %v2645_v31 = vrot.slane %v1277_v38, 4  ;;  %v2933_v7 = vrot.slane %v1757_v41, 2  ;;  %v4864_v38 = vpop.f32.mrb[6].mxu1 }
 0x1aa   : > { %v3005_v9 = vrot.slane %v1877_v1, 2  ;;  %v3198_v11 = vsel %vm3182_vm1, %v4517_v46, %v2285_v49  ;;  %v3372_v4 = vsel %vm3182_vm1, %v2789_v59, %v2861_v37  ;;  %v568_v29 = vmul.f32 0.46666667, %v4806_v39 }
 0x1ab   : > { %v3077_v12 = vrot.slane %v1997_v48, 1  ;;  %v3223_v13 = vsel %vm3207_vm2, %v3198_v11, %v2357_v53  ;;  %v3396_v14 = vsel %vm3207_vm2, %v3372_v4, %v2933_v7  ;;  %v688_v15 = vmul.f32 0.93333334, %v4806_v39 }
 0x1ac   : > { %v3149_v17 = vrot.slane %v2117_v63, 1  ;;  %v3248_v18 = vsel %vm3232_vm3, %v3223_v13, %v2429_v54  ;;  %v3420_v19 = vsel %vm3232_vm3, %v3396_v14, %v3005_v9  ;;  %v808_v20 = vmul.f32 0.4, %v4806_v39 }
 0x1ad   : > { %v3273_v0 = vsel %vm3257_vm4, %v3248_v18, %v2501_v55  ;;  %v3444_v23 = vsel %vm3257_vm4, %v3420_v19, %v3077_v12  ;;  %v616_v24 = vrot.slane %v568_v29, 1  ;;  %v928_v28 = vmul.f32 0.8666667, %v4806_v39 }
 0x1ae   : > { %v2717_v6 = vrot.slane %v1397_v44, 4  ;;  %v3298_v10 = vsel %vm3282_vm5, %v3273_v0, %v2573_v56  ;;  %v3468_v30 = vsel %vm3282_vm5, %v3444_v23, %v3149_v17  ;;  %v736_v32 = vrot.slane %v688_v15, 1 }
 0x1af   : > { %v4860_v33 = vsel %vm3307_vm6, %v4813_v58, %v4810_v3  ;;  %v3323_v40 = vsel %vm3307_vm6, %v3298_v10, %v2645_v31  ;;  %v3492_v36 = vsel %vm3307_vm6, %v3468_v30, %v2237_v2  ;;  %v856_v5 = vrot.slane %v808_v20, 1 }
 0x1b0   : > { %v4867_v41 = vsel %vm3332_vm7, %v3323_v40, %v2717_v6  ;;  %v4871_v42 = vsel %vm3332_vm7, %v3492_v36, %v4517_v46  ;;  %v976_v43 = vrot.slane %v928_v28, 1  ;;  %v1048_v44 = vmul.f32 0.33333334, %v4806_v39 }
 0x1b1   : > { %3797 = vst [vmem:[%s4684_s17 + $0x1f0] sm:$0xff] %v4867_v41  ;;  %3798 = vst [vmem:[%s4684_s17 + $0x1f8] sm:$0xff] %v4871_v42  ;;  %v664_v3 = vadd.f32 %v616_v24, %v4519_v57  ;;  %v1168_v58 = vmul.f32 0.8, %v4806_v39  ;;  %v1288_v1 = vmul.f32 0.26666668, %v4806_v39  ;;  %v784_v49 = vadd.f32 %v736_v32, %v4519_v57 }
 0x1b2   : > { %v1408_v48 = vmul.f32 0.73333335, %v4806_v39  ;;  %v1096_v50 = vrot.slane %v1048_v44, 1  ;;  %v1528_v46 = vmul.f32 0.2, %v4806_v39  ;;  %v904_v53 = vadd.f32 %v856_v5, %v4519_v57 }
 0x1b3   : > { %v1648_v51 = vmul.f32 0.6666667, %v4806_v39  ;;  %v1216_v54 = vrot.slane %v1168_v58, 1  ;;  %v1768_v56 = vmul.f32 0.13333334, %v4806_v39  ;;  %v1024_v59 = vadd.f32 %v976_v43, %v4519_v57 }
 0x1b4   : > { %v1456_v55 = vrot.slane %v1408_v48, 1  ;;  %v1576_v37 = vrot.slane %v1528_v46, 1  ;;  %v1888_v2 = vmul.f32 0.6, %v4806_v39  ;;  %v1144_v31 = vadd.f32 %v1096_v50, %v4519_v57 }
 0x1b5   : > { %v1696_v63 = vrot.slane %v1648_v51, 1  ;;  %v1336_v7 = vrot.slane %v1288_v1, 1  ;;  %v1816_v11 = vrot.slane %v1768_v56, 1  ;;  %v2008_v13 = vmul.f32 0.06666667, %v4806_v39 }
 0x1b6   : > { %v1504_v9 = vadd.f32 %v1456_v55, %v4519_v57  ;;  %v1624_v4 = vadd.f32 %v1576_v37, %v4519_v57  ;;  %v1936_v12 = vrot.slane %v1888_v2, 1  ;;  %v1264_v14 = vadd.f32 %v1216_v54, %v4519_v57 }
 0x1b7   : > { %v1744_v29 = vadd.f32 %v1696_v63, %v4519_v57  ;;  %v1864_v15 = vadd.f32 %v1816_v11, %v4519_v57  ;;  %v2128_v17 = vmul.f32 0.53333336, %v4806_v39  ;;  %v2272_v18 = vrot.slane %v664_v3, 7 }
 0x1b8   : > { %v1984_v19 = vadd.f32 %v1936_v12, %v4519_v57  ;;  %v2056_v20 = vrot.slane %v2008_v13, 1  ;;  %v2344_v0 = vrot.slane %v784_v49, 6  ;;  %v4901_v23 = vsub.f32 %v4524_v61, %v508_v60 }
 0x1b9   : > { %v1384_v24 = vadd.f32 %v1336_v7, %v4519_v57  ;;  %v2416_v28 = vrot.slane %v904_v53, 6  ;;  %v2488_v6 = vrot.slane %v1024_v59, 5  ;;  %v2776_v10 = vrot.slane %v1504_v9, 3 }
 0x1ba   : > { %v2104_v30 = vadd.f32 %v2056_v20, %v4519_v57  ;;  %v2560_v32 = vrot.slane %v1144_v31, 5  ;;  %v2848_v40 = vrot.slane %v1624_v4, 3  ;;  %v2920_v39 = vrot.slane %v1744_v29, 2 }
 0x1bb   : > { %v2176_v36 = vrot.slane %v2128_v17, 1  ;;  %v2632_v5 = vrot.slane %v1264_v14, 4  ;;  %v2992_v43 = vrot.slane %v1864_v15, 2  ;;  %v3185_v44 = vsel %vm3182_vm1, %v4519_v57, %v2272_v18 }
 0x1bc   : > { %v3064_v3 = vrot.slane %v1984_v19, 1  ;;  %v3210_v60 = vsel %vm3207_vm2, %v3185_v44, %v2344_v0  ;;  %v3359_v58 = vsel %vm3182_vm1, %v2776_v10, %v2848_v40  ;;  %v580_v1 = vmul.f32 0.46666667, %v4901_v23 }
 0x1bd   : > { %v3235_v48 = vsel %vm3232_vm3, %v3210_v60, %v2416_v28  ;;  %v3383_v49 = vsel %vm3207_vm2, %v3359_v58, %v2920_v39  ;;  %v700_v50 = vmul.f32 0.93333334, %v4901_v23  ;;  %v820_v46 = vmul.f32 0.4, %v4901_v23 }
 0x1be   : > { %v3136_v51 = vrot.slane %v2104_v30, 1  ;;  %v3260_v53 = vsel %vm3257_vm4, %v3235_v48, %v2488_v6  ;;  %v3407_v54 = vsel %vm3232_vm3, %v3383_v49, %v2992_v43  ;;  %v4917_v55 = vmul.f32 0.8666667, %v4901_v23 }
 0x1bf   : > { %v2224_v56 = vadd.f32 %v2176_v36, %v4519_v57  ;;  %v2704_v59 = vrot.slane %v1384_v24, 4  ;;  %v3285_v37 = vsel %vm3282_vm5, %v3260_v53, %v2560_v32  ;;  %v3431_v63 = vsel %vm3257_vm4, %v3407_v54, %v3064_v3 }
 0x1c0   : > { %v4925_v2 = vsel %vm3332_vm7, %v4860_v33, %v4515_v45  ;;  %v3310_v31 = vsel %vm3307_vm6, %v3285_v37, %v2632_v5  ;;  %v3455_v7 = vsel %vm3282_vm5, %v3431_v63, %v3136_v51  ;;  %v628_v9 = vrot.slane %v580_v1, 1  ;;  %v4936_v33 = vpop.f32.mrb[7].mxu0 }
 0x1c1   : > { %v3335_v11 = vsel %vm3332_vm7, %v3310_v31, %v2704_v59  ;;  %v3479_v4 = vsel %vm3307_vm6, %v3455_v7, %v2224_v56  ;;  %v748_v29 = vrot.slane %v700_v50, 1  ;;  %v868_v12 = vrot.slane %v820_v46, 1 }
 0x1c2   : > { %v3503_v13 = vsel %vm3332_vm7, %v3479_v4, %v4519_v57  ;;  %v3555_v14 = vsub.f32 %v3335_v11, %v4612_v21  ;;  %v3585_v15 = vsub.f32 %v4817_v8, %v3335_v11  ;;  %v988_v45 = vrot.slane %v4917_v55, 1 }
 0x1c3   : > { %v3556_v17 = vsub.f32 %v3503_v13, %v4619_v25  ;;  %v3586_v18 = vsub.f32 %v4925_v2, %v3503_v13  ;;  %v1060_v19 = vmul.f32 0.33333334, %v4901_v23  ;;  %v1180_v20 = vmul.f32 0.8, %v4901_v23 }
 0x1c4   : > { %v3561_v0 = vmul.f32 0.4, %v3555_v14  ;;  %v3573_v24 = vmul.f32 0.8666667, %v3555_v14  ;;  %v3591_v57 = vmul.f32 0.33333334, %v3585_v15  ;;  %v4943_v28 = vadd.f32 %v628_v9, %v4524_v61 }
 0x1c5   : > { %v3562_v6 = vmul.f32 0.4, %v3556_v17  ;;  %v3574_v10 = vmul.f32 0.8666667, %v3556_v17  ;;  %v3592_v30 = vmul.f32 0.33333334, %v3586_v18  ;;  %v4946_v32 = vadd.f32 %v748_v29, %v4524_v61 }
 0x1c6   : > { %v3567_v40 = vadd.f32 %v3561_v0, %v4612_v21  ;;  %v3579_v39 = vadd.f32 %v3573_v24, %v4612_v21  ;;  %v3597_v36 = vadd.f32 %v3591_v57, %v3335_v11  ;;  %v3603_v5 = vmul.f32 0.8, %v3585_v15 }
 0x1c7   : > { %v3568_v43 = vadd.f32 %v3562_v6, %v4619_v25  ;;  %v3580_v44 = vadd.f32 %v3574_v10, %v4619_v25  ;;  %v3598_v3 = vadd.f32 %v3592_v30, %v3503_v13  ;;  %v3604_v60 = vmul.f32 0.8, %v3586_v18 }
 0x1c8   : > { %v3609_v58 = vadd.f32 %v3603_v5, %v3335_v11  ;;  %3741 = vst [vmem:[%s4684_s17 + $0x30] sm:$0xff] %v3567_v40  ;;  %3743 = vst [vmem:[%s4684_s17 + $0x40] sm:$0xff] %v3579_v39  ;;  %v916_v1 = vadd.f32 %v868_v12, %v4524_v61  ;;  %v1300_v21 = vmul.f32 0.26666668, %v4901_v23  ;;  %v1420_v48 = vmul.f32 0.73333335, %v4901_v23 }
 0x1c9   : > { %3745 = vst [vmem:[%s4684_s17 + $0x50] sm:$0xff] %v3597_v36  ;;  %v3610_v49 = vadd.f32 %v3604_v60, %v3503_v13  ;;  %3742 = vst [vmem:[%s4684_s17 + $0x38] sm:$0xff] %v3568_v43  ;;  %v1540_v25 = vmul.f32 0.2, %v4901_v23  ;;  %v1660_v50 = vmul.f32 0.6666667, %v4901_v23  ;;  %v1036_v4 = vadd.f32 %v988_v45, %v4524_v61 }
 0x1ca   : > { %3744 = vst [vmem:[%s4684_s17 + $0x48] sm:$0xff] %v3580_v44  ;;  %3746 = vst [vmem:[%s4684_s17 + $0x58] sm:$0xff] %v3598_v3  ;;  %v1780_v46 = vmul.f32 0.13333334, %v4901_v23  ;;  %v1108_v51 = vrot.slane %v1060_v19, 1  ;;  %v1228_v53 = vrot.slane %v1180_v20, 1 }
 0x1cb   : > { %3747 = vst [vmem:[%s4684_s17 + $0x60] sm:$0xff] %v3609_v58  ;;  %v1468_v54 = vrot.slane %v1420_v48, 1  ;;  %v1900_v55 = vmul.f32 0.6, %v4901_v23  ;;  %3748 = vst [vmem:[%s4684_s17 + $0x68] sm:$0xff] %v3610_v49  ;;  %v1588_v56 = vrot.slane %v1540_v25, 1 }
 0x1cc   : > { %v1708_v59 = vrot.slane %v1660_v50, 1  ;;  %v1828_v37 = vrot.slane %v1780_v46, 1  ;;  %v2020_v63 = vmul.f32 0.06666667, %v4901_v23  ;;  %v1348_v31 = vrot.slane %v1300_v21, 1 }
 0x1cd   : > { %v1516_v7 = vadd.f32 %v1468_v54, %v4524_v61  ;;  %v1948_v9 = vrot.slane %v1900_v55, 1  ;;  %v2140_v11 = vmul.f32 0.53333336, %v4901_v23  ;;  %v1636_v29 = vadd.f32 %v1588_v56, %v4524_v61 }
 0x1ce   : > { %v1756_v12 = vadd.f32 %v1708_v59, %v4524_v61  ;;  %v2068_v13 = vrot.slane %v2020_v63, 1  ;;  %v1156_v14 = vadd.f32 %v1108_v51, %v4524_v61  ;;  %v2284_v17 = vrot.slane %v4943_v28, 7 }
 0x1cf   : > { %v2188_v15 = vrot.slane %v2140_v11, 1  ;;  %v1276_v18 = vadd.f32 %v1228_v53, %v4524_v61  ;;  %v1876_v19 = vadd.f32 %v1828_v37, %v4524_v61  ;;  %v2356_v20 = vrot.slane %v4946_v32, 6  ;;  %v4985_v32 = vpop.f32.mrb[7].mxu1 }
 0x1d0   : > { %v1396_v23 = vadd.f32 %v1348_v31, %v4524_v61  ;;  %v1996_v45 = vadd.f32 %v1948_v9, %v4524_v61  ;;  %v2116_v0 = vadd.f32 %v2068_v13, %v4524_v61  ;;  %v2788_v24 = vrot.slane %v1516_v7, 3 }
 0x1d1   : > { %v2428_v57 = vrot.slane %v916_v1, 6  ;;  %v2500_v6 = vrot.slane %v1036_v4, 5  ;;  %v2860_v10 = vrot.slane %v1636_v29, 3  ;;  %v2932_v30 = vrot.slane %v1756_v12, 2 }
 0x1d2   : > { %v2236_v40 = vadd.f32 %v2188_v15, %v4524_v61  ;;  %v2572_v28 = vrot.slane %v1156_v14, 5  ;;  %v3197_v39 = vsel %vm3182_vm1, %v4524_v61, %v2284_v17  ;;  %v499_v36 = vrot.slane %v4547_v34, 7 }
 0x1d3   : > { %v2644_v5 = vrot.slane %v1276_v18, 4  ;;  %v3004_v43 = vrot.slane %v1876_v19, 2  ;;  %v3222_v44 = vsel %vm3207_vm2, %v3197_v39, %v2356_v20  ;;  %v3371_v3 = vsel %vm3182_vm1, %v2788_v24, %v2860_v10 }
 0x1d4   : > { %v3076_v60 = vrot.slane %v1996_v45, 1  ;;  %v3247_v58 = vsel %vm3232_vm3, %v3222_v44, %v2428_v57  ;;  %v3395_v1 = vsel %vm3207_vm2, %v3371_v3, %v2932_v30  ;;  %v4992_v21 = vsub.f32 %v4547_v34, %v499_v36 }
 0x1d5   : > { %v2716_v48 = vrot.slane %v1396_v23, 4  ;;  %v3148_v49 = vrot.slane %v2116_v0, 1  ;;  %v3272_v25 = vsel %vm3257_vm4, %v3247_v58, %v2500_v6  ;;  %v3419_v50 = vsel %vm3232_vm3, %v3395_v1, %v3004_v43 }
 0x1d6   : > { %v3297_v46 = vsel %vm3282_vm5, %v3272_v25, %v2572_v28  ;;  %v3443_v51 = vsel %vm3257_vm4, %v3419_v50, %v3076_v60  ;;  %v571_v53 = vmul.f32 0.46666667, %v4992_v21  ;;  %v691_v54 = vmul.f32 0.93333334, %v4992_v21 }
 0x1d7   : > { %v3322_v55 = vsel %vm3307_vm6, %v3297_v46, %v2644_v5  ;;  %v3467_v56 = vsel %vm3282_vm5, %v3443_v51, %v3148_v49  ;;  %v811_v59 = vmul.f32 0.4, %v4992_v21  ;;  %v511_v37 = vrot.slane %v4603_v16, 7 }
 0x1d8   : > { %v3347_v63 = vsel %vm3332_vm7, %v3322_v55, %v2716_v48  ;;  %v3491_v31 = vsel %vm3307_vm6, %v3467_v56, %v2236_v40  ;;  %v931_v7 = vmul.f32 0.8666667, %v4992_v21  ;;  %v498_v9 = vrot.slane %v4666_v47, 7 }
 0x1d9   : > { %v3515_v11 = vsel %vm3332_vm7, %v3491_v31, %v4524_v61  ;;  %v3677_v4 = vsub.f32 %v3347_v63, %v4632_v35  ;;  %v3707_v29 = vsub.f32 %v4867_v41, %v3347_v63  ;;  %v619_v12 = vrot.slane %v571_v53, 1 }
 0x1da   : > { %v3678_v13 = vsub.f32 %v3515_v11, %v4674_v52  ;;  %v3708_v14 = vsub.f32 %v4871_v42, %v3515_v11  ;;  %v739_v15 = vrot.slane %v691_v54, 1  ;;  %v859_v17 = vrot.slane %v811_v59, 1 }
 0x1db   : > { %v3683_v18 = vmul.f32 0.13333334, %v3677_v4  ;;  %v3695_v19 = vmul.f32 0.6, %v3677_v4  ;;  %v3713_v20 = vmul.f32 0.06666667, %v3707_v29  ;;  %v667_v44 = vadd.f32 %v4547_v34, %v619_v12 }
 0x1dc   : > { %v3684_v23 = vmul.f32 0.13333334, %v3678_v13  ;;  %v3696_v45 = vmul.f32 0.6, %v3678_v13  ;;  %v3714_v61 = vmul.f32 0.06666667, %v3708_v14  ;;  %v787_v3 = vadd.f32 %v4547_v34, %v739_v15 }
 0x1dd   : > { %v3689_v0 = vadd.f32 %v3683_v18, %v4632_v35  ;;  %v3701_v41 = vadd.f32 %v3695_v19, %v4632_v35  ;;  %v3719_v24 = vadd.f32 %v3713_v20, %v3347_v63  ;;  %v3725_v42 = vmul.f32 0.53333336, %v3707_v29 }
 0x1de   : > { %v3690_v57 = vadd.f32 %v3684_v23, %v4674_v52  ;;  %v3702_v6 = vadd.f32 %v3696_v45, %v4674_v52  ;;  %v3720_v10 = vadd.f32 %v3714_v61, %v3515_v11  ;;  %v3726_v30 = vmul.f32 0.53333336, %v3708_v14 }
 0x1df   : > { %v3731_v40 = vadd.f32 %v3725_v42, %v3347_v63  ;;  %3789 = vst [vmem:[%s4684_s17 + $0x1b0] sm:$0xff] %v3689_v0  ;;  %3791 = vst [vmem:[%s4684_s17 + $0x1c0] sm:$0xff] %v3701_v41  ;;  %v979_v28 = vrot.slane %v931_v7, 1  ;;  %v1051_v39 = vmul.f32 0.33333334, %v4992_v21  ;;  %v907_v60 = vadd.f32 %v4547_v34, %v859_v17 }
 0x1e0   : > { %3793 = vst [vmem:[%s4684_s17 + $0x1d0] sm:$0xff] %v3719_v24  ;;  %v1171_v35 = vmul.f32 0.8, %v4992_v21  ;;  %v3732_v36 = vadd.f32 %v3726_v30, %v3515_v11  ;;  %3790 = vst [vmem:[%s4684_s17 + $0x1b8] sm:$0xff] %v3690_v57  ;;  %v1291_v5 = vmul.f32 0.26666668, %v4992_v21  ;;  %v5047_v12 = vsub.f32 %v4603_v16, %v511_v37 }
 0x1e1   : > { %3792 = vst [vmem:[%s4684_s17 + $0x1c8] sm:$0xff] %v3702_v6  ;;  %3794 = vst [vmem:[%s4684_s17 + $0x1d8] sm:$0xff] %v3720_v10  ;;  %v1411_v52 = vmul.f32 0.73333335, %v4992_v21  ;;  %v1531_v43 = vmul.f32 0.2, %v4992_v21  ;;  %v1027_v50 = vadd.f32 %v4547_v34, %v979_v28 }
 0x1e2   : > { %3795 = vst [vmem:[%s4684_s17 + $0x1e0] sm:$0xff] %v3731_v40  ;;  %v1651_v58 = vmul.f32 0.6666667, %v4992_v21  ;;  %3796 = vst [vmem:[%s4684_s17 + $0x1e8] sm:$0xff] %v3732_v36  ;;  %v1099_v1 = vrot.slane %v1051_v39, 1  ;;  %v1219_v46 = vrot.slane %v1171_v35, 1 }
 0x1e3   : > { %v1459_v48 = vrot.slane %v1411_v52, 1  ;;  %v1579_v49 = vrot.slane %v1531_v43, 1  ;;  %v1771_v25 = vmul.f32 0.13333334, %v4992_v21  ;;  %v1891_v53 = vmul.f32 0.6, %v4992_v21 }
 0x1e4   : > { %v1699_v51 = vrot.slane %v1651_v58, 1  ;;  %v1339_v54 = vrot.slane %v1291_v5, 1  ;;  %v2011_v7 = vmul.f32 0.06666667, %v4992_v21  ;;  %v2131_v11 = vmul.f32 0.53333336, %v4992_v21 }
 0x1e5   : > { %v1507_v55 = vadd.f32 %v4547_v34, %v1459_v48  ;;  %v1627_v56 = vadd.f32 %v4547_v34, %v1579_v49  ;;  %v1819_v59 = vrot.slane %v1771_v25, 1  ;;  %v1939_v31 = vrot.slane %v1891_v53, 1  ;;  %v5066_v5 = vpop.f32.mrb[8].mxu0 }
 0x1e6   : > { %v1747_v63 = vadd.f32 %v4547_v34, %v1699_v51  ;;  %v1147_v4 = vadd.f32 %v4547_v34, %v1099_v1  ;;  %v2275_v29 = vrot.slane %v667_v44, 7  ;;  %v510_v13 = vrot.slane %v4719_v62, 7 }
 0x1e7   : > { %v1267_v14 = vadd.f32 %v4547_v34, %v1219_v46  ;;  %v1867_v15 = vadd.f32 %v4547_v34, %v1819_v59  ;;  %v2059_v17 = vrot.slane %v2011_v7, 1  ;;  %v2347_v18 = vrot.slane %v787_v3, 6 }
 0x1e8   : > { %v5053_v19 = vadd.f32 %v4547_v34, %v1339_v54  ;;  %v1987_v21 = vadd.f32 %v4547_v34, %v1939_v31  ;;  %v2419_v20 = vrot.slane %v907_v60, 6  ;;  %v2779_v23 = vrot.slane %v1507_v55, 3 }
 0x1e9   : > { %v2179_v45 = vrot.slane %v2131_v11, 1  ;;  %v2491_v61 = vrot.slane %v1027_v50, 5  ;;  %v2851_v0 = vrot.slane %v1627_v56, 3  ;;  %v2923_v37 = vrot.slane %v1747_v63, 2 }
 0x1ea   : > { %v2107_v41 = vadd.f32 %v4547_v34, %v2059_v17  ;;  %v2563_v24 = vrot.slane %v1147_v4, 5  ;;  %v3188_v42 = vsel %vm3182_vm1, %v4547_v34, %v2275_v29  ;;  %v583_v57 = vmul.f32 0.46666667, %v5047_v12 }
 0x1eb   : > { %v2995_v6 = vrot.slane %v1867_v15, 2  ;;  %v3213_v10 = vsel %vm3207_vm2, %v3188_v42, %v2347_v18  ;;  %v3362_v30 = vsel %vm3182_vm1, %v2779_v23, %v2851_v0  ;;  %v703_v40 = vmul.f32 0.93333334, %v5047_v12 }
 0x1ec   : > { %v3067_v28 = vrot.slane %v1987_v21, 1  ;;  %v3238_v39 = vsel %vm3232_vm3, %v3213_v10, %v2419_v20  ;;  %v3386_v35 = vsel %vm3207_vm2, %v3362_v30, %v2923_v37  ;;  %v823_v36 = vmul.f32 0.4, %v5047_v12 }
 0x1ed   : > { %v3263_v52 = vsel %vm3257_vm4, %v3238_v39, %v2491_v61  ;;  %v3410_v43 = vsel %vm3232_vm3, %v3386_v35, %v2995_v6  ;;  %v631_v44 = vrot.slane %v583_v57, 1  ;;  %v943_v3 = vmul.f32 0.8666667, %v5047_v12 }
 0x1ee   : > { %v3288_v60 = vsel %vm3282_vm5, %v3263_v52, %v2563_v24  ;;  %v751_v58 = vrot.slane %v703_v40, 1  ;;  %v5075_v1 = vsub.f32 %v4666_v47, %v498_v9  ;;  %v5078_v48 = vsub.f32 %v4719_v62, %v510_v13 }
 0x1ef   : > { %v2635_v49 = vrot.slane %v1267_v14, 4  ;;  %v2707_v25 = vrot.slane %v5053_v19, 4  ;;  %v3434_v50 = vsel %vm3257_vm4, %v3410_v43, %v3067_v28  ;;  %v871_v46 = vrot.slane %v823_v36, 1  ;;  %v5141_v19 = vpop.f32.mrb[8].mxu1 }
 0x1f0   : > { %v2227_v51 = vadd.f32 %v4547_v34, %v2179_v45  ;;  %v3139_v53 = vrot.slane %v2107_v41, 1  ;;  %v991_v54 = vrot.slane %v943_v3, 1  ;;  %v1063_v55 = vmul.f32 0.33333334, %v5047_v12 }
 0x1f1   : > { %v3313_v56 = vsel %vm3307_vm6, %v3288_v60, %v2635_v49  ;;  %v679_v9 = vadd.f32 %v4603_v16, %v631_v44  ;;  %v1183_v59 = vmul.f32 0.8, %v5047_v12  ;;  %v1303_v63 = vmul.f32 0.26666668, %v5047_v12 }
 0x1f2   : > { %v3458_v31 = vsel %vm3282_vm5, %v3434_v50, %v3139_v53  ;;  %v799_v7 = vadd.f32 %v4603_v16, %v751_v58  ;;  %v1423_v11 = vmul.f32 0.73333335, %v5047_v12  ;;  %v1543_v4 = vmul.f32 0.2, %v5047_v12 }
 0x1f3   : > { %v919_v29 = vadd.f32 %v4603_v16, %v871_v46  ;;  %v1111_v13 = vrot.slane %v1063_v55, 1  ;;  %v1663_v14 = vmul.f32 0.6666667, %v5047_v12  ;;  %v1783_v15 = vmul.f32 0.13333334, %v5047_v12 }
 0x1f4   : > { %v1039_v17 = vadd.f32 %v4603_v16, %v991_v54  ;;  %v1471_v18 = vrot.slane %v1423_v11, 1  ;;  %v1591_v21 = vrot.slane %v1543_v4, 1  ;;  %v1903_v20 = vmul.f32 0.6, %v5047_v12 }
 0x1f5   : > { %v1231_v23 = vrot.slane %v1183_v59, 1  ;;  %v1351_v45 = vrot.slane %v1303_v63, 1  ;;  %v1711_v61 = vrot.slane %v1663_v14, 1  ;;  %v1831_v0 = vrot.slane %v1783_v15, 1 }
 0x1f6   : > { %v1519_v37 = vadd.f32 %v4603_v16, %v1471_v18  ;;  %v1639_v41 = vadd.f32 %v4603_v16, %v1591_v21  ;;  %v1951_v24 = vrot.slane %v1903_v20, 1  ;;  %v2023_v42 = vmul.f32 0.06666667, %v5047_v12 }
 0x1f7   : > { %v1159_v57 = vadd.f32 %v4603_v16, %v1111_v13  ;;  %v1759_v6 = vadd.f32 %v4603_v16, %v1711_v61  ;;  %v2143_v10 = vmul.f32 0.53333336, %v5047_v12  ;;  %v2287_v30 = vrot.slane %v679_v9, 7 }
 0x1f8   : > { %v3482_v40 = vsel %vm3307_vm6, %v3458_v31, %v2227_v51  ;;  %v1879_v28 = vadd.f32 %v4603_v16, %v1831_v0  ;;  %v2071_v39 = vrot.slane %v2023_v42, 1  ;;  %v2359_v35 = vrot.slane %v799_v7, 6 }
 0x1f9   : > { %v1279_v36 = vadd.f32 %v4603_v16, %v1231_v23  ;;  %v5107_v52 = vadd.f32 %v4603_v16, %v1351_v45  ;;  %v1999_v43 = vadd.f32 %v4603_v16, %v1951_v24  ;;  %v2431_v44 = vrot.slane %v919_v29, 6 }
 0x1fa   : > { %v2503_v3 = vrot.slane %v1039_v17, 5  ;;  %v2791_v60 = vrot.slane %v1519_v37, 3  ;;  %v2863_v58 = vrot.slane %v1639_v41, 3  ;;  %v2935_v49 = vrot.slane %v1759_v6, 2 }
 0x1fb   : > { %v2119_v12 = vadd.f32 %v4603_v16, %v2071_v39  ;;  %v2191_v50 = vrot.slane %v2143_v10, 1  ;;  %v2575_v46 = vrot.slane %v1159_v57, 5  ;;  %v3200_v51 = vsel %vm3182_vm1, %v4603_v16, %v2287_v30 }
 0x1fc   : > { %v3007_v53 = vrot.slane %v1879_v28, 2  ;;  %v3225_v54 = vsel %vm3207_vm2, %v3200_v51, %v2359_v35  ;;  %v3374_v55 = vsel %vm3182_vm1, %v2791_v60, %v2863_v58  ;;  %v570_v9 = vmul.f32 0.46666667, %v5075_v1 }
 0x1fd   : > { %v3250_v59 = vsel %vm3232_vm3, %v3225_v54, %v2431_v44  ;;  %v3398_v63 = vsel %vm3207_vm2, %v3374_v55, %v2935_v49  ;;  %v690_v31 = vmul.f32 0.93333334, %v5075_v1  ;;  %v810_v7 = vmul.f32 0.4, %v5075_v1 }
 0x1fe   : > { %v3275_v11 = vsel %vm3257_vm4, %v3250_v59, %v2503_v3  ;;  %v3422_v4 = vsel %vm3232_vm3, %v3398_v63, %v3007_v53  ;;  %v618_v29 = vrot.slane %v570_v9, 1  ;;  %v930_v13 = vmul.f32 0.8666667, %v5075_v1 }
 0x1ff   : > { %v2647_v14 = vrot.slane %v1279_v36, 4  ;;  %v3079_v15 = vrot.slane %v1999_v43, 1  ;;  %v3300_v17 = vsel %vm3282_vm5, %v3275_v11, %v2575_v46  ;;  %v738_v18 = vrot.slane %v690_v31, 1 }
 0x200   : > { %v5127_v21 = vsel %vm3332_vm7, %v3313_v56, %v2707_v25  ;;  %v5131_v20 = vsel %vm3332_vm7, %v3482_v40, %v4547_v34  ;;  %v5134_v23 = vadd.f32 %v4603_v16, %v2191_v50  ;;  %v2719_v45 = vrot.slane %v5107_v52, 4 }
 0x201   : > { %v3151_v61 = vrot.slane %v2119_v12, 1  ;;  %v5138_v0 = vsel %vm3307_vm6, %v3300_v17, %v2647_v14  ;;  %v3446_v37 = vsel %vm3257_vm4, %v3422_v4, %v3079_v15  ;;  %v858_v41 = vrot.slane %v810_v7, 1 }
 0x202   : > { %v666_v25 = vadd.f32 %v618_v29, %v4666_v47  ;;  %v978_v56 = vrot.slane %v930_v13, 1  ;;  %v1050_v34 = vmul.f32 0.33333334, %v5075_v1  ;;  %v1170_v24 = vmul.f32 0.8, %v5075_v1 }
 0x203   : > { %v786_v42 = vadd.f32 %v738_v18, %v4666_v47  ;;  %v1290_v57 = vmul.f32 0.26666668, %v5075_v1  ;;  %v1410_v6 = vmul.f32 0.73333335, %v5075_v1  ;;  %v1530_v10 = vmul.f32 0.2, %v5075_v1 }
 0x204   : > { %v1098_v30 = vrot.slane %v1050_v34, 1  ;;  %v1218_v40 = vrot.slane %v1170_v24, 1  ;;  %v1650_v28 = vmul.f32 0.6666667, %v5075_v1  ;;  %v1770_v39 = vmul.f32 0.13333334, %v5075_v1 }
 0x205   : > { %v1338_v35 = vrot.slane %v1290_v57, 1  ;;  %v1458_v36 = vrot.slane %v1410_v6, 1  ;;  %v1578_v43 = vrot.slane %v1530_v10, 1  ;;  %v1890_v44 = vmul.f32 0.6, %v5075_v1 }
 0x206   : > { %v906_v3 = vadd.f32 %v858_v41, %v4666_v47  ;;  %v1026_v60 = vadd.f32 %v978_v56, %v4666_v47  ;;  %v1698_v58 = vrot.slane %v1650_v28, 1  ;;  %v1818_v49 = vrot.slane %v1770_v39, 1 }
 0x207   : > { %v1146_v12 = vadd.f32 %v1098_v30, %v4666_v47  ;;  %v1506_v50 = vadd.f32 %v1458_v36, %v4666_v47  ;;  %v1626_v46 = vadd.f32 %v1578_v43, %v4666_v47  ;;  %v1938_v51 = vrot.slane %v1890_v44, 1 }
 0x208   : > { %v1266_v53 = vadd.f32 %v1218_v40, %v4666_v47  ;;  %v1746_v54 = vadd.f32 %v1698_v58, %v4666_v47  ;;  %v2010_v55 = vmul.f32 0.06666667, %v5075_v1  ;;  %v2130_v9 = vmul.f32 0.53333336, %v5075_v1 }
 0x209   : > { %v3470_v59 = vsel %vm3282_vm5, %v3446_v37, %v3151_v61  ;;  %v1386_v63 = vadd.f32 %v1338_v35, %v4666_v47  ;;  %v1866_v31 = vadd.f32 %v1818_v49, %v4666_v47  ;;  %v2274_v7 = vrot.slane %v666_v25, 7 }
 0x20a   : > { %v1986_v11 = vadd.f32 %v1938_v51, %v4666_v47  ;;  %v2058_v4 = vrot.slane %v2010_v55, 1  ;;  %v2346_v29 = vrot.slane %v786_v42, 6  ;;  %v2418_v13 = vrot.slane %v906_v3, 6 }
 0x20b   : > { %v2178_v14 = vrot.slane %v2130_v9, 1  ;;  %v2490_v15 = vrot.slane %v1026_v60, 5  ;;  %v2778_v17 = vrot.slane %v1506_v50, 3  ;;  %v2850_v18 = vrot.slane %v1626_v46, 3 }
 0x20c   : > { %v2106_v41 = vadd.f32 %v2058_v4, %v4666_v47  ;;  %v2562_v56 = vrot.slane %v1146_v12, 5  ;;  %v2634_v1 = vrot.slane %v1266_v53, 4  ;;  %v2922_v34 = vrot.slane %v1746_v54, 2  ;;  %v5189_v53 = vpop.f32.mrb[9].mxu0 }
 0x20d   : > { %v2994_v61 = vrot.slane %v1866_v31, 2  ;;  %v3187_v37 = vsel %vm3182_vm1, %v4666_v47, %v2274_v7  ;;  %v3361_v25 = vsel %vm3182_vm1, %v2778_v17, %v2850_v18  ;;  %v582_v24 = vmul.f32 0.46666667, %v5078_v48 }
 0x20e   : > { %v3066_v57 = vrot.slane %v1986_v11, 1  ;;  %v3212_v42 = vsel %vm3207_vm2, %v3187_v37, %v2346_v29  ;;  %v3385_v6 = vsel %vm3207_vm2, %v3361_v25, %v2922_v34  ;;  %v702_v10 = vmul.f32 0.93333334, %v5078_v48 }
 0x20f   : > { %v3138_v30 = vrot.slane %v2106_v41, 1  ;;  %v3237_v40 = vsel %vm3232_vm3, %v3212_v42, %v2418_v13  ;;  %v3409_v28 = vsel %vm3232_vm3, %v3385_v6, %v2994_v61  ;;  %v822_v39 = vmul.f32 0.4, %v5078_v48 }
 0x210   : > { %v2226_v35 = vadd.f32 %v2178_v14, %v4666_v47  ;;  %v3262_v36 = vsel %vm3257_vm4, %v3237_v40, %v2490_v15  ;;  %v3433_v43 = vsel %vm3257_vm4, %v3409_v28, %v3066_v57  ;;  %v942_v44 = vmul.f32 0.8666667, %v5078_v48 }
 0x211   : > { %v2706_v3 = vrot.slane %v1386_v63, 4  ;;  %v3287_v60 = vsel %vm3282_vm5, %v3262_v36, %v2562_v56  ;;  %v3457_v58 = vsel %vm3282_vm5, %v3433_v43, %v3138_v30  ;;  %v630_v49 = vrot.slane %v582_v24, 1 }
 0x212   : > { %v5185_v12 = vsel %vm3307_vm6, %v3470_v59, %v5134_v23  ;;  %v3312_v50 = vsel %vm3307_vm6, %v3287_v60, %v2634_v1  ;;  %v3481_v46 = vsel %vm3307_vm6, %v3457_v58, %v2226_v35  ;;  %v750_v51 = vrot.slane %v702_v10, 1 }
 0x213   : > { %v3337_v54 = vsel %vm3332_vm7, %v3312_v50, %v2706_v3  ;;  %v3505_v55 = vsel %vm3332_vm7, %v3481_v46, %v4666_v47  ;;  %v870_v9 = vrot.slane %v822_v39, 1  ;;  %v990_v63 = vrot.slane %v942_v44, 1 }
 0x214   : > { %v3615_v31 = vsub.f32 %v3337_v54, %v4817_v8  ;;  %v3616_v7 = vsub.f32 %v3505_v55, %v4925_v2  ;;  %v3645_v23 = vsub.f32 %v5127_v21, %v3337_v54  ;;  %v3646_v59 = vsub.f32 %v5131_v20, %v3505_v55 }
 0x215   : > { %v5199_v11 = vadd.f32 %v630_v49, %v4719_v62  ;;  %v1062_v4 = vmul.f32 0.33333334, %v5078_v48  ;;  %v1182_v29 = vmul.f32 0.8, %v5078_v48  ;;  %v1302_v13 = vmul.f32 0.26666668, %v5078_v48 }
 0x216   : > { %v3621_v47 = vmul.f32 0.26666668, %v3615_v31  ;;  %v3622_v14 = vmul.f32 0.26666668, %v3616_v7  ;;  %v3633_v15 = vmul.f32 0.73333335, %v3615_v31  ;;  %v5205_v17 = vadd.f32 %v750_v51, %v4719_v62 }
 0x217   : > { %v3634_v18 = vmul.f32 0.73333335, %v3616_v7  ;;  %v3651_v41 = vmul.f32 0.2, %v3645_v23  ;;  %v3652_v56 = vmul.f32 0.2, %v3646_v59  ;;  %v5208_v1 = vadd.f32 %v870_v9, %v4719_v62 }
 0x218   : > { %v3627_v34 = vadd.f32 %v3621_v47, %v4817_v8  ;;  %v3628_v61 = vadd.f32 %v3622_v14, %v4925_v2  ;;  %v3639_v37 = vadd.f32 %v3633_v15, %v4817_v8  ;;  %v3663_v25 = vmul.f32 0.6666667, %v3645_v23 }
 0x219   : > { %v3640_v24 = vadd.f32 %v3634_v18, %v4925_v2  ;;  %v3657_v57 = vadd.f32 %v3651_v41, %v3337_v54  ;;  %v3658_v42 = vadd.f32 %v3652_v56, %v3505_v55  ;;  %v3664_v6 = vmul.f32 0.6666667, %v3646_v59  ;;  %v5253_v18 = vpop.f32.mrb[9].mxu1 }
 0x21a   : > { %v3669_v10 = vadd.f32 %v3663_v25, %v3337_v54  ;;  %3749 = vst [vmem:[%s4684_s17 + $0x70] sm:$0xff] %v3627_v34  ;;  %3750 = vst [vmem:[%s4684_s17 + $0x78] sm:$0xff] %v3628_v61  ;;  %v1110_v30 = vrot.slane %v1062_v4, 1  ;;  %v1230_v40 = vrot.slane %v1182_v29, 1  ;;  %v1422_v28 = vmul.f32 0.73333335, %v5078_v48 }
 0x21b   : > { %3751 = vst [vmem:[%s4684_s17 + $0x80] sm:$0xff] %v3639_v37  ;;  %v3670_v39 = vadd.f32 %v3664_v6, %v3505_v55  ;;  %3752 = vst [vmem:[%s4684_s17 + $0x88] sm:$0xff] %v3640_v24  ;;  %v1542_v8 = vmul.f32 0.2, %v5078_v48  ;;  %v1662_v2 = vmul.f32 0.6666667, %v5078_v48  ;;  %v1038_v36 = vadd.f32 %v990_v63, %v4719_v62 }
 0x21c   : > { %3753 = vst [vmem:[%s4684_s17 + $0x90] sm:$0xff] %v3657_v57  ;;  %3754 = vst [vmem:[%s4684_s17 + $0x98] sm:$0xff] %v3658_v42  ;;  %v1782_v35 = vmul.f32 0.13333334, %v5078_v48  ;;  %v1350_v43 = vrot.slane %v1302_v13, 1  ;;  %v1470_v44 = vrot.slane %v1422_v28, 1  ;;  %v1158_v46 = vadd.f32 %v1110_v30, %v4719_v62 }
 0x21d   : > { %3755 = vst [vmem:[%s4684_s17 + $0xa0] sm:$0xff] %v3669_v10  ;;  %v1902_v3 = vmul.f32 0.6, %v5078_v48  ;;  %3756 = vst [vmem:[%s4684_s17 + $0xa8] sm:$0xff] %v3670_v39  ;;  %v1590_v60 = vrot.slane %v1542_v8, 1  ;;  %v1710_v58 = vrot.slane %v1662_v2, 1  ;;  %v1278_v9 = vadd.f32 %v1230_v40, %v4719_v62 }
 0x21e   : > { %v1830_v49 = vrot.slane %v1782_v35, 1  ;;  %v2022_v50 = vmul.f32 0.06666667, %v5078_v48  ;;  %v1518_v51 = vadd.f32 %v1470_v44, %v4719_v62  ;;  %v2142_v55 = vmul.f32 0.53333336, %v5078_v48 }
 0x21f   : > { %v1950_v54 = vrot.slane %v1902_v3, 1  ;;  %v1638_v63 = vadd.f32 %v1590_v60, %v4719_v62  ;;  %v1758_v31 = vadd.f32 %v1710_v58, %v4719_v62  ;;  %v5239_v23 = vsel %vm3332_vm7, %v5138_v0, %v2719_v45 }
 0x220   : > { %v2070_v7 = vrot.slane %v2022_v50, 1  ;;  %v5244_v59 = vsel %vm3332_vm7, %v5185_v12, %v4603_v16  ;;  %v1878_v48 = vadd.f32 %v1830_v49, %v4719_v62  ;;  %v2286_v4 = vrot.slane %v5199_v11, 7 }
 0x221   : > { %v1398_v29 = vadd.f32 %v1350_v43, %v4719_v62  ;;  %v1998_v13 = vadd.f32 %v1950_v54, %v4719_v62  ;;  %v2190_v47 = vrot.slane %v2142_v55, 1  ;;  %v2358_v52 = vrot.slane %v5205_v17, 6 }
 0x222   : > { %v2118_v14 = vadd.f32 %v2070_v7, %v4719_v62  ;;  %v2430_v45 = vrot.slane %v5208_v1, 6  ;;  %v2790_v0 = vrot.slane %v1518_v51, 3  ;;  %v2862_v15 = vrot.slane %v1638_v63, 3 }
 0x223   : > { %v2502_v16 = vrot.slane %v1038_v36, 5  ;;  %v2574_v12 = vrot.slane %v1158_v46, 5  ;;  %v2646_v41 = vrot.slane %v1278_v9, 4  ;;  %v2934_v56 = vrot.slane %v1758_v31, 2 }
 0x224   : > { %v3006_v11 = vrot.slane %v1878_v48, 2  ;;  %v3199_v34 = vsel %vm3182_vm1, %v4719_v62, %v2286_v4  ;;  %v3373_v61 = vsel %vm3182_vm1, %v2790_v0, %v2862_v15  ;;  %v501_v17 = vrot.slane %v4800_v26, 7 }
 0x225   : > { %v2238_v37 = vadd.f32 %v2190_v47, %v4719_v62  ;;  %v3078_v25 = vrot.slane %v1998_v13, 1  ;;  %v3224_v1 = vsel %vm3207_vm2, %v3199_v34, %v2358_v52  ;;  %v3397_v24 = vsel %vm3207_vm2, %v3373_v61, %v2934_v56 }
 0x226   : > { %v3150_v57 = vrot.slane %v2118_v14, 1  ;;  %v3249_v42 = vsel %vm3232_vm3, %v3224_v1, %v2430_v45  ;;  %v3421_v6 = vsel %vm3232_vm3, %v3397_v24, %v3006_v11  ;;  %v549_v10 = vsub.f32 %v4800_v26, %v501_v17 }
 0x227   : > { %v2718_v30 = vrot.slane %v1398_v29, 4  ;;  %v3274_v40 = vsel %vm3257_vm4, %v3249_v42, %v2502_v16  ;;  %v3445_v28 = vsel %vm3257_vm4, %v3421_v6, %v3078_v25  ;;  %v513_v39 = vrot.slane %v4864_v38, 7 }
 0x228   : > { %v3299_v8 = vsel %vm3282_vm5, %v3274_v40, %v2574_v12  ;;  %v3469_v2 = vsel %vm3282_vm5, %v3445_v28, %v3150_v57  ;;  %v573_v35 = vmul.f32 0.46666667, %v549_v10  ;;  %v693_v36 = vmul.f32 0.93333334, %v549_v10 }
 0x229   : > { %v3324_v43 = vsel %vm3307_vm6, %v3299_v8, %v2646_v41  ;;  %v3493_v44 = vsel %vm3307_vm6, %v3469_v2, %v2238_v37  ;;  %v813_v3 = vmul.f32 0.4, %v549_v10  ;;  %v933_v60 = vmul.f32 0.8666667, %v549_v10 }
 0x22a   : > { %v3349_v58 = vsel %vm3332_vm7, %v3324_v43, %v2718_v30  ;;  %v3517_v49 = vsel %vm3332_vm7, %v3493_v44, %v4719_v62  ;;  %v621_v50 = vrot.slane %v573_v35, 1  ;;  %v500_v46 = vrot.slane %v4936_v33, 7 }
 0x22b   : > { %v3529_v51 = vsub.f32 %v5239_v23, %v3349_v58  ;;  %v3530_v54 = vsub.f32 %v5244_v59, %v3517_v49  ;;  %3799 = vst [vmem:[%s4684_s17 + $0x200] sm:$0xff] %v3349_v58  ;;  %3800 = vst [vmem:[%s4684_s17 + $0x208] sm:$0xff] %v3517_v49  ;;  %v741_v55 = vrot.slane %v693_v36, 1  ;;  %v512_v9 = vrot.slane %v4985_v32, 7 }
 0x22c   : > { %v861_v63 = vrot.slane %v813_v3, 1  ;;  %v981_v31 = vrot.slane %v933_v60, 1  ;;  %v1053_v7 = vmul.f32 0.33333334, %v549_v10  ;;  %v1173_v48 = vmul.f32 0.8, %v549_v10 }
 0x22d   : > { %v3535_v4 = vmul.f32 0.46666667, %v3529_v51  ;;  %v3536_v29 = vmul.f32 0.46666667, %v3530_v54  ;;  %v3547_v62 = vmul.f32 0.93333334, %v3529_v51  ;;  %v5282_v13 = vsub.f32 %v4864_v38, %v513_v39 }
 0x22e   : > { %v3548_v47 = vmul.f32 0.93333334, %v3530_v54  ;;  %v669_v52 = vadd.f32 %v4800_v26, %v621_v50  ;;  %v1101_v14 = vrot.slane %v1053_v7, 1  ;;  %v1221_v45 = vrot.slane %v1173_v48, 1  ;;  %v5300_v51 = vpop.f32.mrb[10].mxu0 }
 0x22f   : > { %v3541_v0 = vadd.f32 %v3535_v4, %v3349_v58  ;;  %v3542_v15 = vadd.f32 %v3536_v29, %v3517_v49  ;;  %v3553_v16 = vadd.f32 %v3547_v62, %v3349_v58  ;;  %v1293_v12 = vmul.f32 0.26666668, %v549_v10 }
 0x230   : > { %v3554_v41 = vadd.f32 %v3548_v47, %v3517_v49  ;;  %v789_v56 = vadd.f32 %v4800_v26, %v741_v55  ;;  %v909_v11 = vadd.f32 %v4800_v26, %v861_v63  ;;  %v1413_v34 = vmul.f32 0.73333335, %v549_v10 }
 0x231   : > { %3801 = vst [vmem:[%s4684_s17 + $0x210] sm:$0xff] %v3541_v0  ;;  %3802 = vst [vmem:[%s4684_s17 + $0x218] sm:$0xff] %v3542_v15  ;;  %v1029_v61 = vadd.f32 %v4800_v26, %v981_v31  ;;  %v1149_v17 = vadd.f32 %v4800_v26, %v1101_v14  ;;  %v1533_v37 = vmul.f32 0.2, %v549_v10  ;;  %v1653_v25 = vmul.f32 0.6666667, %v549_v10 }
 0x232   : > { %3803 = vst [vmem:[%s4684_s17 + $0x220] sm:$0xff] %v3553_v16  ;;  %3804 = vst [vmem:[%s4684_s17 + $0x228] sm:$0xff] %v3554_v41  ;;  %v1341_v1 = vrot.slane %v1293_v12, 1  ;;  %v1461_v24 = vrot.slane %v1413_v34, 1  ;;  %v1773_v57 = vmul.f32 0.13333334, %v549_v10  ;;  %v1269_v6 = vadd.f32 %v4800_v26, %v1221_v45 }
 0x233   : > { %v1893_v42 = vmul.f32 0.6, %v549_v10  ;;  %v1581_v30 = vrot.slane %v1533_v37, 1  ;;  %v1701_v40 = vrot.slane %v1653_v25, 1  ;;  %v2013_v28 = vmul.f32 0.06666667, %v549_v10 }
 0x234   : > { %v1509_v39 = vadd.f32 %v4800_v26, %v1461_v24  ;;  %v1821_v8 = vrot.slane %v1773_v57, 1  ;;  %v2133_v35 = vmul.f32 0.53333336, %v549_v10  ;;  %v2277_v3 = vrot.slane %v669_v52, 7 }
 0x235   : > { %v1941_v2 = vrot.slane %v1893_v42, 1  ;;  %v1629_v36 = vadd.f32 %v4800_v26, %v1581_v30  ;;  %v1749_v43 = vadd.f32 %v4800_v26, %v1701_v40  ;;  %v2061_v44 = vrot.slane %v2013_v28, 1 }
 0x236   : > { %v1389_v60 = vadd.f32 %v4800_v26, %v1341_v1  ;;  %v1869_v58 = vadd.f32 %v4800_v26, %v1821_v8  ;;  %v2349_v50 = vrot.slane %v789_v56, 6  ;;  %v2181_v55 = vrot.slane %v2133_v35, 1 }
 0x237   : > { %v1989_v49 = vadd.f32 %v4800_v26, %v1941_v2  ;;  %v2109_v54 = vadd.f32 %v4800_v26, %v2061_v44  ;;  %v2421_v63 = vrot.slane %v909_v11, 6  ;;  %v2493_v10 = vrot.slane %v1029_v61, 5 }
 0x238   : > { %v2565_v31 = vrot.slane %v1149_v17, 5  ;;  %v2781_v7 = vrot.slane %v1509_v39, 3  ;;  %v2853_v48 = vrot.slane %v1629_v36, 3  ;;  %v2925_v4 = vrot.slane %v1749_v43, 2 }
 0x239   : > { %v2637_v29 = vrot.slane %v1269_v6, 4  ;;  %v2997_v62 = vrot.slane %v1869_v58, 2  ;;  %v3069_v47 = vrot.slane %v1989_v49, 1  ;;  %v3190_v52 = vsel %vm3182_vm1, %v4800_v26, %v2277_v3 }
 0x23a   : > { %v3215_v14 = vsel %vm3207_vm2, %v3190_v52, %v2349_v50  ;;  %v3364_v45 = vsel %vm3182_vm1, %v2781_v7, %v2853_v48  ;;  %v585_v0 = vmul.f32 0.46666667, %v5282_v13  ;;  %v705_v15 = vmul.f32 0.93333334, %v5282_v13 }
 0x23b   : > { %v3240_v16 = vsel %vm3232_vm3, %v3215_v14, %v2421_v63  ;;  %v3388_v12 = vsel %vm3207_vm2, %v3364_v45, %v2925_v4  ;;  %v825_v41 = vmul.f32 0.4, %v5282_v13  ;;  %v945_v56 = vmul.f32 0.8666667, %v5282_v13 }
 0x23c   : > { %v2709_v11 = vrot.slane %v1389_v60, 4  ;;  %v3141_v34 = vrot.slane %v2109_v54, 1  ;;  %v3265_v61 = vsel %vm3257_vm4, %v3240_v16, %v2493_v10  ;;  %v3412_v17 = vsel %vm3232_vm3, %v3388_v12, %v2997_v62 }
 0x23d   : > { %v2229_v37 = vadd.f32 %v4800_v26, %v2181_v55  ;;  %v3290_v25 = vsel %vm3282_vm5, %v3265_v61, %v2565_v31  ;;  %v3436_v1 = vsel %vm3257_vm4, %v3412_v17, %v3069_v47  ;;  %v633_v24 = vrot.slane %v585_v0, 1 }
 0x23e   : > { %v3315_v57 = vsel %vm3307_vm6, %v3290_v25, %v2637_v29  ;;  %v3460_v42 = vsel %vm3282_vm5, %v3436_v1, %v3141_v34  ;;  %v753_v6 = vrot.slane %v705_v15, 1  ;;  %v5323_v30 = vsub.f32 %v4936_v33, %v500_v46 }
 0x23f   : > { %v5326_v40 = vsel %vm3332_vm7, %v3315_v57, %v2709_v11  ;;  %v3484_v28 = vsel %vm3307_vm6, %v3460_v42, %v2229_v37  ;;  %v873_v39 = vrot.slane %v825_v41, 1  ;;  %v993_v8 = vrot.slane %v945_v56, 1  ;;  %v5361_v37 = vpop.f32.mrb[10].mxu1 }
 0x240   : > { %v5331_v2 = vsel %vm3332_vm7, %v3484_v28, %v4800_v26  ;;  %3765 = vst [vmem:[%s4684_s17 + $0xf0] sm:$0xff] %v5326_v40  ;;  %v1065_v35 = vmul.f32 0.33333334, %v5282_v13  ;;  %v1185_v36 = vmul.f32 0.8, %v5282_v13  ;;  %v681_v43 = vadd.f32 %v4864_v38, %v633_v24 }
 0x241   : > { %v1305_v46 = vmul.f32 0.26666668, %v5282_v13  ;;  %3766 = vst [vmem:[%s4684_s17 + $0xf8] sm:$0xff] %v5331_v2  ;;  %v1425_v44 = vmul.f32 0.73333335, %v5282_v13  ;;  %v801_v31 = vadd.f32 %v4864_v38, %v753_v6  ;;  %v921_v7 = vadd.f32 %v4864_v38, %v873_v39 }
 0x242   : > { %v1545_v3 = vmul.f32 0.2, %v5282_v13  ;;  %v1665_v60 = vmul.f32 0.6666667, %v5282_v13  ;;  %v1113_v26 = vrot.slane %v1065_v35, 1  ;;  %v1233_v58 = vrot.slane %v1185_v36, 1 }
 0x243   : > { %v1353_v49 = vrot.slane %v1305_v46, 1  ;;  %v1785_v50 = vmul.f32 0.13333334, %v5282_v13  ;;  %v1473_v54 = vrot.slane %v1425_v44, 1  ;;  %v1905_v10 = vmul.f32 0.6, %v5282_v13 }
 0x244   : > { %v1593_v55 = vrot.slane %v1545_v3, 1  ;;  %v1713_v63 = vrot.slane %v1665_v60, 1  ;;  %v1041_v48 = vadd.f32 %v4864_v38, %v993_v8  ;;  %v1161_v14 = vadd.f32 %v4864_v38, %v1113_v26 }
 0x245   : > { %v1833_v4 = vrot.slane %v1785_v50, 1  ;;  %v1521_v29 = vadd.f32 %v4864_v38, %v1473_v54  ;;  %v1953_v52 = vrot.slane %v1905_v10, 1  ;;  %v2025_v0 = vmul.f32 0.06666667, %v5282_v13 }
 0x246   : > { %v1641_v62 = vadd.f32 %v4864_v38, %v1593_v55  ;;  %v1761_v47 = vadd.f32 %v4864_v38, %v1713_v63  ;;  %v2145_v15 = vmul.f32 0.53333336, %v5282_v13  ;;  %v1281_v16 = vadd.f32 %v4864_v38, %v1233_v58 }
 0x247   : > { %v1881_v45 = vadd.f32 %v4864_v38, %v1833_v4  ;;  %v5358_v12 = vadd.f32 %v4864_v38, %v1353_v49  ;;  %v2001_v41 = vadd.f32 %v4864_v38, %v1953_v52  ;;  %v2289_v56 = vrot.slane %v681_v43, 7 }
 0x248   : > { %v2073_v11 = vrot.slane %v2025_v0, 1  ;;  %v2361_v34 = vrot.slane %v801_v31, 6  ;;  %v2433_v61 = vrot.slane %v921_v7, 6  ;;  %v2505_v17 = vrot.slane %v1041_v48, 5 }
 0x249   : > { %v2193_v25 = vrot.slane %v2145_v15, 1  ;;  %v2793_v1 = vrot.slane %v1521_v29, 3  ;;  %v2865_v24 = vrot.slane %v1641_v62, 3  ;;  %v2937_v57 = vrot.slane %v1761_v47, 2 }
 0x24a   : > { %v2121_v13 = vadd.f32 %v4864_v38, %v2073_v11  ;;  %v2577_v42 = vrot.slane %v1161_v14, 5  ;;  %v3009_v6 = vrot.slane %v1881_v45, 2  ;;  %v3081_v28 = vrot.slane %v2001_v41, 1 }
 0x24b   : > { %v3202_v39 = vsel %vm3182_vm1, %v4864_v38, %v2289_v56  ;;  %v3376_v8 = vsel %vm3182_vm1, %v2793_v1, %v2865_v24  ;;  %v572_v35 = vmul.f32 0.46666667, %v5323_v30  ;;  %v692_v36 = vmul.f32 0.93333334, %v5323_v30 }
 0x24c   : > { %v3153_v46 = vrot.slane %v2121_v13, 1  ;;  %v3227_v43 = vsel %vm3207_vm2, %v3202_v39, %v2361_v34  ;;  %v3400_v44 = vsel %vm3207_vm2, %v3376_v8, %v2937_v57  ;;  %v812_v3 = vmul.f32 0.4, %v5323_v30 }
 0x24d   : > { %v3252_v60 = vsel %vm3232_vm3, %v3227_v43, %v2433_v61  ;;  %v3424_v26 = vsel %vm3232_vm3, %v3400_v44, %v3009_v6  ;;  %v620_v58 = vrot.slane %v572_v35, 1  ;;  %v740_v49 = vrot.slane %v692_v36, 1 }
 0x24e   : > { %v3277_v50 = vsel %vm3257_vm4, %v3252_v60, %v2505_v17  ;;  %v3448_v54 = vsel %vm3257_vm4, %v3424_v26, %v3081_v28  ;;  %v932_v55 = vmul.f32 0.8666667, %v5323_v30  ;;  %v5380_v63 = vsub.f32 %v4985_v32, %v512_v9 }
 0x24f   : > { %v2649_v10 = vrot.slane %v1281_v16, 4  ;;  %v3302_v31 = vsel %vm3282_vm5, %v3277_v50, %v2577_v42  ;;  %v3472_v7 = vsel %vm3282_vm5, %v3448_v54, %v3153_v46  ;;  %v860_v48 = vrot.slane %v812_v3, 1 }
 0x250   : > { %v2241_v4 = vadd.f32 %v4864_v38, %v2193_v25  ;;  %v2721_v29 = vrot.slane %v5358_v12, 4  ;;  %v668_v62 = vadd.f32 %v620_v58, %v4936_v33  ;;  %v788_v47 = vadd.f32 %v740_v49, %v4936_v33 }
 0x251   : > { %v3327_v52 = vsel %vm3307_vm6, %v3302_v31, %v2649_v10  ;;  %v980_v14 = vrot.slane %v932_v55, 1  ;;  %v1052_v9 = vmul.f32 0.33333334, %v5323_v30  ;;  %v1172_v45 = vmul.f32 0.8, %v5323_v30 }
 0x252   : > { %v5392_v0 = vsel %vm3307_vm6, %v3472_v7, %v2241_v4  ;;  %v1292_v15 = vmul.f32 0.26666668, %v5323_v30  ;;  %v1412_v16 = vmul.f32 0.73333335, %v5323_v30  ;;  %v1532_v12 = vmul.f32 0.2, %v5323_v30 }
 0x253   : > { %v908_v41 = vadd.f32 %v860_v48, %v4936_v33  ;;  %v1100_v56 = vrot.slane %v1052_v9, 1  ;;  %v1652_v11 = vmul.f32 0.6666667, %v5323_v30  ;;  %v1772_v34 = vmul.f32 0.13333334, %v5323_v30  ;;  %v5415_v48 = vpop.f32.mrb[11].mxu0 }
 0x254   : > { %v1220_v61 = vrot.slane %v1172_v45, 1  ;;  %v1460_v17 = vrot.slane %v1412_v16, 1  ;;  %v1580_v25 = vrot.slane %v1532_v12, 1  ;;  %v1892_v1 = vmul.f32 0.6, %v5323_v30 }
 0x255   : > { %v1028_v24 = vadd.f32 %v980_v14, %v4936_v33  ;;  %v1340_v57 = vrot.slane %v1292_v15, 1  ;;  %v1700_v13 = vrot.slane %v1652_v11, 1  ;;  %v1820_v42 = vrot.slane %v1772_v34, 1 }
 0x256   : > { %v1148_v6 = vadd.f32 %v1100_v56, %v4936_v33  ;;  %v1508_v28 = vadd.f32 %v1460_v17, %v4936_v33  ;;  %v1628_v39 = vadd.f32 %v1580_v25, %v4936_v33  ;;  %v1940_v8 = vrot.slane %v1892_v1, 1 }
 0x257   : > { %v1748_v35 = vadd.f32 %v1700_v13, %v4936_v33  ;;  %v1868_v36 = vadd.f32 %v1820_v42, %v4936_v33  ;;  %v2012_v46 = vmul.f32 0.06666667, %v5323_v30  ;;  %v2132_v43 = vmul.f32 0.53333336, %v5323_v30 }
 0x258   : > { %v5410_v44 = vsel %vm3332_vm7, %v3327_v52, %v2721_v29  ;;  %v1268_v3 = vadd.f32 %v1220_v61, %v4936_v33  ;;  %v1988_v60 = vadd.f32 %v1940_v8, %v4936_v33  ;;  %v2276_v26 = vrot.slane %v668_v62, 7 }
 0x259   : > { %v1388_v58 = vadd.f32 %v1340_v57, %v4936_v33  ;;  %v2060_v49 = vrot.slane %v2012_v46, 1  ;;  %v2348_v50 = vrot.slane %v788_v47, 6  ;;  %v2420_v54 = vrot.slane %v908_v41, 6 }
 0x25a   : > { %v2180_v55 = vrot.slane %v2132_v43, 1  ;;  %v2492_v10 = vrot.slane %v1028_v24, 5  ;;  %v2780_v31 = vrot.slane %v1508_v28, 3  ;;  %v2852_v7 = vrot.slane %v1628_v39, 3 }
 0x25b   : > { %v2108_v30 = vadd.f32 %v2060_v49, %v4936_v33  ;;  %v2564_v4 = vrot.slane %v1148_v6, 5  ;;  %v2924_v29 = vrot.slane %v1748_v35, 2  ;;  %v2996_v52 = vrot.slane %v1868_v36, 2 }
 0x25c   : > { %v3068_v14 = vrot.slane %v1988_v60, 1  ;;  %v3189_v62 = vsel %vm3182_vm1, %v4936_v33, %v2276_v26  ;;  %v3363_v9 = vsel %vm3182_vm1, %v2780_v31, %v2852_v7  ;;  %v584_v47 = vmul.f32 0.46666667, %v5380_v63 }
 0x25d   : > { %v3140_v45 = vrot.slane %v2108_v30, 1  ;;  %v3214_v15 = vsel %vm3207_vm2, %v3189_v62, %v2348_v50  ;;  %v3387_v16 = vsel %vm3207_vm2, %v3363_v9, %v2924_v29  ;;  %v704_v12 = vmul.f32 0.93333334, %v5380_v63 }
 0x25e   : > { %v3239_v41 = vsel %vm3232_vm3, %v3214_v15, %v2420_v54  ;;  %v3411_v56 = vsel %vm3232_vm3, %v3387_v16, %v2996_v52  ;;  %v632_v11 = vrot.slane %v584_v47, 1  ;;  %v824_v34 = vmul.f32 0.4, %v5380_v63 }
 0x25f   : > { %v2228_v61 = vadd.f32 %v2180_v55, %v4936_v33  ;;  %v2636_v17 = vrot.slane %v1268_v3, 4  ;;  %v3264_v25 = vsel %vm3257_vm4, %v3239_v41, %v2492_v10  ;;  %v3435_v1 = vsel %vm3257_vm4, %v3411_v56, %v3068_v14 }
 0x260   : > { %v2708_v24 = vrot.slane %v1388_v58, 4  ;;  %v3289_v57 = vsel %vm3282_vm5, %v3264_v25, %v2564_v4  ;;  %v3459_v13 = vsel %vm3282_vm5, %v3435_v1, %v3140_v45  ;;  %v944_v42 = vmul.f32 0.8666667, %v5380_v63 }
 0x261   : > { %v3314_v6 = vsel %vm3307_vm6, %v3289_v57, %v2636_v17  ;;  %v3483_v28 = vsel %vm3307_vm6, %v3459_v13, %v2228_v61  ;;  %v5437_v39 = vadd.f32 %v632_v11, %v4985_v32  ;;  %v752_v8 = vrot.slane %v704_v12, 1 }
 0x262   : > { %v3339_v35 = vsel %vm3332_vm7, %v3314_v6, %v2708_v24  ;;  %v3507_v36 = vsel %vm3332_vm7, %v3483_v28, %v4936_v33  ;;  %v872_v46 = vrot.slane %v824_v34, 1  ;;  %v1064_v43 = vmul.f32 0.33333334, %v5380_v63  ;;  %v5475_v6 = vpop.f32.mrb[11].mxu1 }
 0x263   : > { %v3675_v3 = vsub.f32 %v3339_v35, %v5127_v21  ;;  %v3676_v60 = vsub.f32 %v3507_v36, %v5131_v20  ;;  %v3705_v26 = vsub.f32 %v5326_v40, %v3339_v35  ;;  %v3706_v58 = vsub.f32 %v5331_v2, %v3507_v36 }
 0x264   : > { %v992_v49 = vrot.slane %v944_v42, 1  ;;  %v1112_v50 = vrot.slane %v1064_v43, 1  ;;  %v1184_v54 = vmul.f32 0.8, %v5380_v63  ;;  %v1304_v55 = vmul.f32 0.26666668, %v5380_v63 }
 0x265   : > { %v3681_v10 = vmul.f32 0.13333334, %v3675_v3  ;;  %v3682_v31 = vmul.f32 0.13333334, %v3676_v60  ;;  %v3693_v33 = vmul.f32 0.6, %v3675_v3  ;;  %v5450_v7 = vadd.f32 %v752_v8, %v4985_v32 }
 0x266   : > { %v3694_v30 = vmul.f32 0.6, %v3676_v60  ;;  %v3711_v4 = vmul.f32 0.06666667, %v3705_v26  ;;  %v3712_v40 = vmul.f32 0.06666667, %v3706_v58  ;;  %v5453_v2 = vadd.f32 %v872_v46, %v4985_v32 }
 0x267   : > { %v3687_v29 = vadd.f32 %v3681_v10, %v5127_v21  ;;  %v3688_v52 = vadd.f32 %v3682_v31, %v5131_v20  ;;  %v3699_v14 = vadd.f32 %v3693_v33, %v5127_v21  ;;  %v3723_v62 = vmul.f32 0.53333336, %v3705_v26 }
 0x268   : > { %v3700_v9 = vadd.f32 %v3694_v30, %v5131_v20  ;;  %v3717_v47 = vadd.f32 %v3711_v4, %v3339_v35  ;;  %v3718_v45 = vadd.f32 %v3712_v40, %v3507_v36  ;;  %v3724_v15 = vmul.f32 0.53333336, %v3706_v58 }
 0x269   : > { %v3729_v16 = vadd.f32 %v3723_v62, %v3339_v35  ;;  %3757 = vst [vmem:[%s4684_s17 + $0xb0] sm:$0xff] %v3687_v29  ;;  %3758 = vst [vmem:[%s4684_s17 + $0xb8] sm:$0xff] %v3688_v52  ;;  %v1232_v12 = vrot.slane %v1184_v54, 1  ;;  %v1352_v41 = vrot.slane %v1304_v55, 1  ;;  %v1424_v56 = vmul.f32 0.73333335, %v5380_v63 }
 0x26a   : > { %3759 = vst [vmem:[%s4684_s17 + $0xc0] sm:$0xff] %v3699_v14  ;;  %v3730_v11 = vadd.f32 %v3724_v15, %v3507_v36  ;;  %3760 = vst [vmem:[%s4684_s17 + $0xc8] sm:$0xff] %v3700_v9  ;;  %v1544_v21 = vmul.f32 0.2, %v5380_v63  ;;  %v1664_v20 = vmul.f32 0.6666667, %v5380_v63  ;;  %v1040_v61 = vadd.f32 %v992_v49, %v4985_v32 }
 0x26b   : > { %3761 = vst [vmem:[%s4684_s17 + $0xd0] sm:$0xff] %v3717_v47  ;;  %3762 = vst [vmem:[%s4684_s17 + $0xd8] sm:$0xff] %v3718_v45  ;;  %v1784_v34 = vmul.f32 0.13333334, %v5380_v63  ;;  %v1160_v17 = vadd.f32 %v1112_v50, %v4985_v32  ;;  %v1472_v25 = vrot.slane %v1424_v56, 1  ;;  %v1280_v28 = vadd.f32 %v1232_v12, %v4985_v32 }
 0x26c   : > { %3763 = vst [vmem:[%s4684_s17 + $0xe0] sm:$0xff] %v3729_v16  ;;  %v1904_v1 = vmul.f32 0.6, %v5380_v63  ;;  %3764 = vst [vmem:[%s4684_s17 + $0xe8] sm:$0xff] %v3730_v11  ;;  %v1592_v24 = vrot.slane %v1544_v21, 1  ;;  %v1712_v57 = vrot.slane %v1664_v20, 1  ;;  %v1400_v46 = vadd.f32 %v1352_v41, %v4985_v32 }
 0x26d   : > { %v1832_v13 = vrot.slane %v1784_v34, 1  ;;  %v2024_v42 = vmul.f32 0.06666667, %v5380_v63  ;;  %v1520_v8 = vadd.f32 %v1472_v25, %v4985_v32  ;;  %v2144_v36 = vmul.f32 0.53333336, %v5380_v63 }
 0x26e   : > { %v1952_v35 = vrot.slane %v1904_v1, 1  ;;  %v1640_v43 = vadd.f32 %v1592_v24, %v4985_v32  ;;  %v1760_v3 = vadd.f32 %v1712_v57, %v4985_v32  ;;  %v5486_v26 = vsel %vm3332_vm7, %v5392_v0, %v4864_v38 }
 0x26f   : > { %v2072_v60 = vrot.slane %v2024_v42, 1  ;;  %v1880_v58 = vadd.f32 %v1832_v13, %v4985_v32  ;;  %v2192_v49 = vrot.slane %v2144_v36, 1  ;;  %v2288_v50 = vrot.slane %v5437_v39, 7 }
 0x270   : > { %v2000_v54 = vadd.f32 %v1952_v35, %v4985_v32  ;;  %v2360_v55 = vrot.slane %v5450_v7, 6  ;;  %v2432_v10 = vrot.slane %v5453_v2, 6  ;;  %v2504_v31 = vrot.slane %v1040_v61, 5 }
 0x271   : > { %v2120_v63 = vadd.f32 %v2072_v60, %v4985_v32  ;;  %v2576_v33 = vrot.slane %v1160_v17, 5  ;;  %v2792_v30 = vrot.slane %v1520_v8, 3  ;;  %v2864_v4 = vrot.slane %v1640_v43, 3 }
 0x272   : > { %v2240_v38 = vadd.f32 %v2192_v49, %v4985_v32  ;;  %v2648_v0 = vrot.slane %v1280_v28, 4  ;;  %v2720_v40 = vrot.slane %v1400_v46, 4  ;;  %v2936_v29 = vrot.slane %v1760_v3, 2 }
 0x273   : > { %v3008_v52 = vrot.slane %v1880_v58, 2  ;;  %v3201_v39 = vsel %vm3182_vm1, %v4985_v32, %v2288_v50  ;;  %v3375_v14 = vsel %vm3182_vm1, %v2792_v30, %v2864_v4  ;;  %v503_v62 = vrot.slane %v5066_v5, 7 }
 0x274   : > { %v3080_v7 = vrot.slane %v2000_v54, 1  ;;  %v3152_v9 = vrot.slane %v2120_v63, 1  ;;  %v3226_v2 = vsel %vm3207_vm2, %v3201_v39, %v2360_v55  ;;  %v3399_v47 = vsel %vm3207_vm2, %v3375_v14, %v2936_v29 }
 0x275   : > { %v3251_v45 = vsel %vm3232_vm3, %v3226_v2, %v2432_v10  ;;  %v3423_v15 = vsel %vm3232_vm3, %v3399_v47, %v3008_v52  ;;  %v5504_v16 = vsub.f32 %v5066_v5, %v503_v62  ;;  %v515_v12 = vrot.slane %v5141_v19, 7 }
 0x276   : > { %v3276_v41 = vsel %vm3257_vm4, %v3251_v45, %v2504_v31  ;;  %v3447_v56 = vsel %vm3257_vm4, %v3423_v15, %v3080_v7  ;;  %v502_v11 = vrot.slane %v5189_v53, 7  ;;  %v514_v21 = vrot.slane %v5253_v18, 7 }
 0x277   : > { %v3301_v20 = vsel %vm3282_vm5, %v3276_v41, %v2576_v33  ;;  %v3471_v34 = vsel %vm3282_vm5, %v3447_v56, %v3152_v9  ;;  %v575_v61 = vmul.f32 0.46666667, %v5504_v16  ;;  %v695_v17 = vmul.f32 0.93333334, %v5504_v16 }
 0x278   : > { %v3326_v25 = vsel %vm3307_vm6, %v3301_v20, %v2648_v0  ;;  %v3495_v1 = vsel %vm3307_vm6, %v3471_v34, %v2240_v38  ;;  %v815_v24 = vmul.f32 0.4, %v5504_v16  ;;  %v935_v57 = vmul.f32 0.8666667, %v5504_v16 }
 0x279   : > { %v3351_v13 = vsel %vm3332_vm7, %v3326_v25, %v2720_v40  ;;  %v3519_v42 = vsel %vm3332_vm7, %v3495_v1, %v4985_v32  ;;  %v623_v28 = vrot.slane %v575_v61, 1  ;;  %v743_v8 = vrot.slane %v695_v17, 1 }
 0x27a   : > { %v3559_v35 = vsub.f32 %v3351_v13, %v5239_v23  ;;  %v3560_v36 = vsub.f32 %v3519_v42, %v5244_v59  ;;  %v3589_v46 = vsub.f32 %v5410_v44, %v3351_v13  ;;  %v3590_v43 = vsub.f32 %v5486_v26, %v3519_v42 }
 0x27b   : > { %v863_v3 = vrot.slane %v815_v24, 1  ;;  %v983_v60 = vrot.slane %v935_v57, 1  ;;  %v5527_v58 = vsub.f32 %v5141_v19, %v515_v12  ;;  %v5530_v49 = vsub.f32 %v5189_v53, %v502_v11 }
 0x27c   : > { %v3565_v50 = vmul.f32 0.4, %v3559_v35  ;;  %v3566_v32 = vmul.f32 0.4, %v3560_v36  ;;  %v3577_v54 = vmul.f32 0.8666667, %v3559_v35  ;;  %v5533_v63 = vadd.f32 %v5066_v5, %v623_v28 }
 0x27d   : > { %v3578_v55 = vmul.f32 0.8666667, %v3560_v36  ;;  %v3595_v10 = vmul.f32 0.33333334, %v3589_v46  ;;  %v3596_v31 = vmul.f32 0.33333334, %v3590_v43  ;;  %v5536_v33 = vadd.f32 %v5066_v5, %v743_v8 }
 0x27e   : > { %v3571_v30 = vadd.f32 %v3565_v50, %v5239_v23  ;;  %v3572_v4 = vadd.f32 %v3566_v32, %v5244_v59  ;;  %v3583_v38 = vadd.f32 %v3577_v54, %v5239_v23  ;;  %v3607_v0 = vmul.f32 0.8, %v3589_v46 }
 0x27f   : > { %v3584_v40 = vadd.f32 %v3578_v55, %v5244_v59  ;;  %v3601_v29 = vadd.f32 %v3595_v10, %v3351_v13  ;;  %v3602_v52 = vadd.f32 %v3596_v31, %v3519_v42  ;;  %v3608_v39 = vmul.f32 0.8, %v3590_v43 }
 0x280   : > { %v3613_v14 = vadd.f32 %v3607_v0, %v3351_v13  ;;  %3805 = vst [vmem:[%s4684_s17 + $0x230] sm:$0xff] %v3571_v30  ;;  %3806 = vst [vmem:[%s4684_s17 + $0x238] sm:$0xff] %v3572_v4  ;;  %v911_v62 = vadd.f32 %v5066_v5, %v863_v3  ;;  %v1055_v7 = vmul.f32 0.33333334, %v5504_v16  ;;  %v1175_v9 = vmul.f32 0.8, %v5504_v16 }
 0x281   : > { %3807 = vst [vmem:[%s4684_s17 + $0x240] sm:$0xff] %v3583_v38  ;;  %v3614_v23 = vadd.f32 %v3608_v39, %v3519_v42  ;;  %3808 = vst [vmem:[%s4684_s17 + $0x248] sm:$0xff] %v3584_v40  ;;  %v1295_v59 = vmul.f32 0.26666668, %v5504_v16  ;;  %v1415_v2 = vmul.f32 0.73333335, %v5504_v16  ;;  %v1031_v61 = vadd.f32 %v5066_v5, %v983_v60 }
 0x282   : > { %3809 = vst [vmem:[%s4684_s17 + $0x250] sm:$0xff] %v3601_v29  ;;  %3810 = vst [vmem:[%s4684_s17 + $0x258] sm:$0xff] %v3602_v52  ;;  %v1535_v47 = vmul.f32 0.2, %v5504_v16  ;;  %v1103_v45 = vrot.slane %v1055_v7, 1  ;;  %v1223_v15 = vrot.slane %v1175_v9, 1  ;;  %v5578_v60 = vsub.f32 %v5253_v18, %v514_v21 }
 0x283   : > { %3811 = vst [vmem:[%s4684_s17 + $0x260] sm:$0xff] %v3613_v14  ;;  %v1655_v12 = vmul.f32 0.6666667, %v5504_v16  ;;  %v1775_v41 = vmul.f32 0.13333334, %v5504_v16  ;;  %3812 = vst [vmem:[%s4684_s17 + $0x268] sm:$0xff] %v3614_v23 }
 0x284   : > { %v1343_v56 = vrot.slane %v1295_v59, 1  ;;  %v1463_v11 = vrot.slane %v1415_v2, 1  ;;  %v1583_v20 = vrot.slane %v1535_v47, 1  ;;  %v1895_v34 = vmul.f32 0.6, %v5504_v16 }
 0x285   : > { %v1151_v17 = vadd.f32 %v5066_v5, %v1103_v45  ;;  %v1703_v25 = vrot.slane %v1655_v12, 1  ;;  %v1823_v1 = vrot.slane %v1775_v41, 1  ;;  %v5562_v24 = vadd.f32 %v5066_v5, %v1223_v15 }
 0x286   : > { %v1511_v57 = vadd.f32 %v5066_v5, %v1463_v11  ;;  %v1631_v13 = vadd.f32 %v5066_v5, %v1583_v20  ;;  %v1943_v42 = vrot.slane %v1895_v34, 1  ;;  %v5567_v28 = vadd.f32 %v5066_v5, %v1343_v56 }
 0x287   : > { %v1751_v8 = vadd.f32 %v5066_v5, %v1703_v25  ;;  %v2015_v35 = vmul.f32 0.06666667, %v5504_v16  ;;  %v2135_v36 = vmul.f32 0.53333336, %v5504_v16  ;;  %v1871_v46 = vadd.f32 %v5066_v5, %v1823_v1 }
 0x288   : > { %v1991_v43 = vadd.f32 %v5066_v5, %v1943_v42  ;;  %v2279_v3 = vrot.slane %v5533_v63, 7  ;;  %v2351_v54 = vrot.slane %v5536_v33, 6  ;;  %v2423_v55 = vrot.slane %v911_v62, 6 }
 0x289   : > { %v2063_v50 = vrot.slane %v2015_v35, 1  ;;  %v2183_v32 = vrot.slane %v2135_v36, 1  ;;  %v2495_v10 = vrot.slane %v1031_v61, 5  ;;  %v2567_v31 = vrot.slane %v1151_v17, 5 }
 0x28a   : > { %v2783_v30 = vrot.slane %v1511_v57, 3  ;;  %v2855_v16 = vrot.slane %v1631_v13, 3  ;;  %v2639_v38 = vrot.slane %v5562_v24, 4  ;;  %v2711_v63 = vrot.slane %v5567_v28, 4 }
 0x28b   : > { %v5582_v4 = vadd.f32 %v5066_v5, %v2063_v50  ;;  %v2927_v0 = vrot.slane %v1751_v8, 2  ;;  %v2999_v40 = vrot.slane %v1871_v46, 2  ;;  %v3192_v21 = vsel %vm3182_vm1, %v5066_v5, %v2279_v3 }
 0x28c   : > { %v3366_v29 = vsel %vm3182_vm1, %v2783_v30, %v2855_v16  ;;  %v587_v33 = vmul.f32 0.46666667, %v5527_v58  ;;  %v3071_v52 = vrot.slane %v1991_v43, 1  ;;  %v3217_v39 = vsel %vm3207_vm2, %v3192_v21, %v2351_v54 }
 0x28d   : > { %v3390_v14 = vsel %vm3207_vm2, %v3366_v29, %v2927_v0  ;;  %v707_v62 = vmul.f32 0.93333334, %v5527_v58  ;;  %v3242_v7 = vsel %vm3232_vm3, %v3217_v39, %v2423_v55  ;;  %v827_v59 = vmul.f32 0.4, %v5527_v58 }
 0x28e   : > { %v3414_v9 = vsel %vm3232_vm3, %v3390_v14, %v2999_v40  ;;  %v635_v23 = vrot.slane %v587_v33, 1  ;;  %v5597_v2 = vadd.f32 %v5066_v5, %v2183_v32  ;;  %v3267_v47 = vsel %vm3257_vm4, %v3242_v7, %v2495_v10 }
 0x28f   : > { %v755_v45 = vrot.slane %v707_v62, 1  ;;  %v947_v15 = vmul.f32 0.8666667, %v5527_v58  ;;  %v3143_v12 = vrot.slane %v5582_v4, 1  ;;  %v5603_v41 = vsel %vm3257_vm4, %v3414_v9, %v3071_v52 }
 0x290   : > { %v875_v56 = vrot.slane %v827_v59, 1  ;;  %v1067_v11 = vmul.f32 0.33333334, %v5527_v58  ;;  %v3292_v20 = vsel %vm3282_vm5, %v3267_v47, %v2567_v31  ;;  %v683_v34 = vadd.f32 %v5141_v19, %v635_v23 }
 0x291   : > { %v995_v61 = vrot.slane %v947_v15, 1  ;;  %v1187_v17 = vmul.f32 0.8, %v5527_v58  ;;  %v803_v25 = vadd.f32 %v5141_v19, %v755_v45  ;;  %v1307_v24 = vmul.f32 0.26666668, %v5527_v58 }
 0x292   : > { %v1115_v1 = vrot.slane %v1067_v11, 1  ;;  %v1427_v57 = vmul.f32 0.73333335, %v5527_v58  ;;  %v923_v13 = vadd.f32 %v5141_v19, %v875_v56  ;;  %v1547_v8 = vmul.f32 0.2, %v5527_v58 }
 0x293   : > { %v1235_v42 = vrot.slane %v1187_v17, 1  ;;  %v1667_v35 = vmul.f32 0.6666667, %v5527_v58  ;;  %v1043_v36 = vadd.f32 %v5141_v19, %v995_v61  ;;  %v1355_v46 = vrot.slane %v1307_v24, 1 }
 0x294   : > { %v1475_v43 = vrot.slane %v1427_v57, 1  ;;  %v1787_v3 = vmul.f32 0.13333334, %v5527_v58  ;;  %v1163_v50 = vadd.f32 %v5141_v19, %v1115_v1  ;;  %v1595_v32 = vrot.slane %v1547_v8, 1 }
 0x295   : > { %v1715_v54 = vrot.slane %v1667_v35, 1  ;;  %v1907_v55 = vmul.f32 0.6, %v5527_v58  ;;  %v5620_v10 = vadd.f32 %v5141_v19, %v1235_v42  ;;  %v2027_v16 = vmul.f32 0.06666667, %v5527_v58 }
 0x296   : > { %v1523_v31 = vadd.f32 %v5141_v19, %v1475_v43  ;;  %v1835_v30 = vrot.slane %v1787_v3, 1  ;;  %v1643_v0 = vadd.f32 %v5141_v19, %v1595_v32  ;;  %v2147_v29 = vmul.f32 0.53333336, %v5527_v58 }
 0x297   : > { %v1763_v40 = vadd.f32 %v5141_v19, %v1715_v54  ;;  %v1955_v21 = vrot.slane %v1907_v55, 1  ;;  %v5628_v33 = vadd.f32 %v5141_v19, %v1355_v46  ;;  %v2075_v39 = vrot.slane %v2027_v16, 1 }
 0x298   : > { %v1883_v52 = vadd.f32 %v5141_v19, %v1835_v30  ;;  %v2291_v14 = vrot.slane %v683_v34, 7  ;;  %v5632_v62 = vsel %vm3307_vm6, %v3292_v20, %v2639_v38  ;;  %v2195_v9 = vrot.slane %v2147_v29, 1 }
 0x299   : > { %v5635_v7 = vadd.f32 %v5141_v19, %v1955_v21  ;;  %v2363_v23 = vrot.slane %v803_v25, 6  ;;  %v5638_v59 = vadd.f32 %v5141_v19, %v2075_v39  ;;  %v2435_v47 = vrot.slane %v923_v13, 6 }
 0x29a   : > { %v2507_v58 = vrot.slane %v1043_v36, 5  ;;  %v2579_v45 = vrot.slane %v1163_v50, 5  ;;  %v2651_v15 = vrot.slane %v5620_v10, 4  ;;  %v2795_v56 = vrot.slane %v1523_v31, 3 }
 0x29b   : > { %v2867_v11 = vrot.slane %v1643_v0, 3  ;;  %v2939_v61 = vrot.slane %v1763_v40, 2  ;;  %v5642_v34 = vadd.f32 %v5141_v19, %v2195_v9  ;;  %v3011_v20 = vrot.slane %v1883_v52, 2 }
 0x29c   : > { %v3204_v17 = vsel %vm3182_vm1, %v5141_v19, %v2291_v14  ;;  %v574_v24 = vmul.f32 0.46666667, %v5530_v49  ;;  %v694_v57 = vmul.f32 0.93333334, %v5530_v49  ;;  %v814_v8 = vmul.f32 0.4, %v5530_v49 }
 0x29d   : > { %v3229_v25 = vsel %vm3207_vm2, %v3204_v17, %v2363_v23  ;;  %v3378_v1 = vsel %vm3182_vm1, %v2795_v56, %v2867_v11  ;;  %v934_v35 = vmul.f32 0.8666667, %v5530_v49  ;;  %v3083_v36 = vrot.slane %v5635_v7, 1 }
 0x29e   : > { %v3254_v13 = vsel %vm3232_vm3, %v3229_v25, %v2435_v47  ;;  %v3402_v42 = vsel %vm3207_vm2, %v3378_v1, %v2939_v61  ;;  %v622_v43 = vrot.slane %v574_v24, 1  ;;  %v742_v3 = vrot.slane %v694_v57, 1 }
 0x29f   : > { %v3279_v46 = vsel %vm3257_vm4, %v3254_v13, %v2507_v58  ;;  %v5659_v32 = vsel %vm3232_vm3, %v3402_v42, %v3011_v20  ;;  %v862_v54 = vrot.slane %v814_v8, 1  ;;  %v982_v55 = vrot.slane %v934_v35, 1 }
 0x2a0   : > { %v5662_v31 = vsel %vm3282_vm5, %v3279_v46, %v2579_v45  ;;  %v670_v30 = vadd.f32 %v622_v43, %v5189_v53  ;;  %v790_v16 = vadd.f32 %v742_v3, %v5189_v53  ;;  %v1054_v0 = vmul.f32 0.33333334, %v5530_v49 }
 0x2a1   : > { %v910_v40 = vadd.f32 %v862_v54, %v5189_v53  ;;  %v1030_v21 = vadd.f32 %v982_v55, %v5189_v53  ;;  %v1174_v29 = vmul.f32 0.8, %v5530_v49  ;;  %v1294_v52 = vmul.f32 0.26666668, %v5530_v49 }
 0x2a2   : > { %v1102_v39 = vrot.slane %v1054_v0, 1  ;;  %v1414_v14 = vmul.f32 0.73333335, %v5530_v49  ;;  %v1534_v9 = vmul.f32 0.2, %v5530_v49  ;;  %v2278_v23 = vrot.slane %v670_v30, 7 }
 0x2a3   : > { %v1222_v47 = vrot.slane %v1174_v29, 1  ;;  %v1342_v58 = vrot.slane %v1294_v52, 1  ;;  %v1654_v45 = vmul.f32 0.6666667, %v5530_v49  ;;  %v1774_v56 = vmul.f32 0.13333334, %v5530_v49 }
 0x2a4   : > { %v1150_v11 = vadd.f32 %v1102_v39, %v5189_v53  ;;  %v1462_v61 = vrot.slane %v1414_v14, 1  ;;  %v1582_v20 = vrot.slane %v1534_v9, 1  ;;  %v1894_v17 = vmul.f32 0.6, %v5530_v49 }
 0x2a5   : > { %v1270_v25 = vadd.f32 %v1222_v47, %v5189_v53  ;;  %v1390_v1 = vadd.f32 %v1342_v58, %v5189_v53  ;;  %v1702_v24 = vrot.slane %v1654_v45, 1  ;;  %v1822_v57 = vrot.slane %v1774_v56, 1 }
 0x2a6   : > { %v1510_v13 = vadd.f32 %v1462_v61, %v5189_v53  ;;  %v1630_v42 = vadd.f32 %v1582_v20, %v5189_v53  ;;  %v1942_v8 = vrot.slane %v1894_v17, 1  ;;  %v2014_v35 = vmul.f32 0.06666667, %v5530_v49 }
 0x2a7   : > { %v1750_v46 = vadd.f32 %v1702_v24, %v5189_v53  ;;  %v1870_v43 = vadd.f32 %v1822_v57, %v5189_v53  ;;  %v2134_v3 = vmul.f32 0.53333336, %v5530_v49  ;;  %v2350_v54 = vrot.slane %v790_v16, 6 }
 0x2a8   : > { %v1990_v55 = vadd.f32 %v1942_v8, %v5189_v53  ;;  %v2062_v30 = vrot.slane %v2014_v35, 1  ;;  %v2422_v0 = vrot.slane %v910_v40, 6  ;;  %v2494_v29 = vrot.slane %v1030_v21, 5 }
 0x2a9   : > { %v2182_v52 = vrot.slane %v2134_v3, 1  ;;  %v2566_v39 = vrot.slane %v1150_v11, 5  ;;  %v2638_v14 = vrot.slane %v1270_v25, 4  ;;  %v2710_v9 = vrot.slane %v1390_v1, 4 }
 0x2aa   : > { %v2110_v47 = vadd.f32 %v2062_v30, %v5189_v53  ;;  %v2782_v58 = vrot.slane %v1510_v13, 3  ;;  %v2854_v45 = vrot.slane %v1630_v42, 3  ;;  %v2926_v56 = vrot.slane %v1750_v46, 2 }
 0x2ab   : > { %v2230_v61 = vadd.f32 %v2182_v52, %v5189_v53  ;;  %v2998_v20 = vrot.slane %v1870_v43, 2  ;;  %v3070_v17 = vrot.slane %v1990_v55, 1  ;;  %v3191_v49 = vsel %vm3182_vm1, %v5189_v53, %v2278_v23 }
 0x2ac   : > { %v3142_v16 = vrot.slane %v2110_v47, 1  ;;  %v3216_v40 = vsel %vm3207_vm2, %v3191_v49, %v2350_v54  ;;  %v3365_v21 = vsel %vm3182_vm1, %v2782_v58, %v2854_v45  ;;  %v586_v11 = vmul.f32 0.46666667, %v5578_v60 }
 0x2ad   : > { %v3241_v25 = vsel %vm3232_vm3, %v3216_v40, %v2422_v0  ;;  %v3389_v1 = vsel %vm3207_vm2, %v3365_v21, %v2926_v56  ;;  %v706_v24 = vmul.f32 0.93333334, %v5578_v60  ;;  %v826_v57 = vmul.f32 0.4, %v5578_v60 }
 0x2ae   : > { %v3266_v13 = vsel %vm3257_vm4, %v3241_v25, %v2494_v29  ;;  %v3413_v42 = vsel %vm3232_vm3, %v3389_v1, %v2998_v20  ;;  %v634_v23 = vrot.slane %v586_v11, 1  ;;  %v946_v8 = vmul.f32 0.8666667, %v5578_v60 }
 0x2af   : > { %v3291_v35 = vsel %vm3282_vm5, %v3266_v13, %v2566_v39  ;;  %v3437_v46 = vsel %vm3257_vm4, %v3413_v42, %v3070_v17  ;;  %v754_v43 = vrot.slane %v706_v24, 1  ;;  %v874_v3 = vrot.slane %v826_v57, 1 }
 0x2b0   : > { %v5706_v54 = vsel %vm3307_vm6, %v5662_v31, %v2651_v15  ;;  %v5712_v55 = vsel %vm3257_vm4, %v5659_v32, %v3083_v36  ;;  %v3316_v30 = vsel %vm3307_vm6, %v3291_v35, %v2638_v14  ;;  %v3461_v0 = vsel %vm3282_vm5, %v3437_v46, %v3142_v16 }
 0x2b1   : > { %v5717_v29 = vsel %vm3332_vm7, %v3316_v30, %v2710_v9  ;;  %v3485_v52 = vsel %vm3307_vm6, %v3461_v0, %v2230_v61  ;;  %v682_v10 = vadd.f32 %v634_v23, %v5253_v18  ;;  %v994_v39 = vrot.slane %v946_v8, 1 }
 0x2b2   : > { %v5723_v15 = vsel %vm3332_vm7, %v3485_v52, %v5189_v53  ;;  %3767 = vst [vmem:[%s4684_s17 + $0x100] sm:$0xff] %v5717_v29  ;;  %v802_v7 = vadd.f32 %v754_v43, %v5253_v18  ;;  %v1066_v36 = vmul.f32 0.33333334, %v5578_v60  ;;  %v1186_v32 = vmul.f32 0.8, %v5578_v60 }
 0x2b3   : > { %3768 = vst [vmem:[%s4684_s17 + $0x108] sm:$0xff] %v5723_v15  ;;  %v922_v31 = vadd.f32 %v874_v3, %v5253_v18  ;;  %v1306_v14 = vmul.f32 0.26666668, %v5578_v60  ;;  %v1426_v9 = vmul.f32 0.73333335, %v5578_v60  ;;  %v1042_v16 = vadd.f32 %v994_v39, %v5253_v18 }
 0x2b4   : > { %v1546_v47 = vmul.f32 0.2, %v5578_v60  ;;  %v1114_v53 = vrot.slane %v1066_v36, 1  ;;  %v1234_v58 = vrot.slane %v1186_v32, 1  ;;  %v1666_v45 = vmul.f32 0.6666667, %v5578_v60 }
 0x2b5   : > { %v1786_v56 = vmul.f32 0.13333334, %v5578_v60  ;;  %v1354_v61 = vrot.slane %v1306_v14, 1  ;;  %v1474_v20 = vrot.slane %v1426_v9, 1  ;;  %v1906_v49 = vmul.f32 0.6, %v5578_v60 }
 0x2b6   : > { %v1594_v17 = vrot.slane %v1546_v47, 1  ;;  %v1162_v40 = vadd.f32 %v1114_v53, %v5253_v18  ;;  %v1714_v21 = vrot.slane %v1666_v45, 1  ;;  %v1282_v25 = vadd.f32 %v1234_v58, %v5253_v18 }
 0x2b7   : > { %v1834_v11 = vrot.slane %v1786_v56, 1  ;;  %v1522_v1 = vadd.f32 %v1474_v20, %v5253_v18  ;;  %v1954_v57 = vrot.slane %v1906_v49, 1  ;;  %v1402_v13 = vadd.f32 %v1354_v61, %v5253_v18 }
 0x2b8   : > { %v1642_v24 = vadd.f32 %v1594_v17, %v5253_v18  ;;  %v1762_v42 = vadd.f32 %v1714_v21, %v5253_v18  ;;  %v2026_v23 = vmul.f32 0.06666667, %v5578_v60  ;;  %v2146_v8 = vmul.f32 0.53333336, %v5578_v60 }
 0x2b9   : > { %v1882_v35 = vadd.f32 %v1834_v11, %v5253_v18  ;;  %v2002_v46 = vadd.f32 %v1954_v57, %v5253_v18  ;;  %v2290_v43 = vrot.slane %v682_v10, 7  ;;  %v5754_v3 = vsel %vm3332_vm7, %v5632_v62, %v2711_v63 }
 0x2ba   : > { %v2074_v30 = vrot.slane %v2026_v23, 1  ;;  %v2194_v0 = vrot.slane %v2146_v8, 1  ;;  %v2362_v52 = vrot.slane %v802_v7, 6  ;;  %v2434_v39 = vrot.slane %v922_v31, 6 }
 0x2bb   : > { %v2506_v36 = vrot.slane %v1042_v16, 5  ;;  %v2578_v32 = vrot.slane %v1162_v40, 5  ;;  %v2794_v14 = vrot.slane %v1522_v1, 3  ;;  %v2866_v9 = vrot.slane %v1642_v24, 3 }
 0x2bc   : > { %v2122_v60 = vadd.f32 %v2074_v30, %v5253_v18  ;;  %v2650_v47 = vrot.slane %v1282_v25, 4  ;;  %v2722_v53 = vrot.slane %v1402_v13, 4  ;;  %v2938_v58 = vrot.slane %v1762_v42, 2 }
 0x2bd   : > { %v3010_v10 = vrot.slane %v1882_v35, 2  ;;  %v3203_v28 = vsel %vm3182_vm1, %v5253_v18, %v2290_v43  ;;  %v3377_v63 = vsel %vm3182_vm1, %v2794_v14, %v2866_v9  ;;  %v505_v62 = vrot.slane %v5300_v51, 7 }
 0x2be   : > { %v2242_v7 = vadd.f32 %v2194_v0, %v5253_v18  ;;  %v3082_v31 = vrot.slane %v2002_v46, 1  ;;  %v3228_v45 = vsel %vm3207_vm2, %v3203_v28, %v2362_v52  ;;  %v3401_v56 = vsel %vm3207_vm2, %v3377_v63, %v2938_v58 }
 0x2bf   : > { %v3154_v61 = vrot.slane %v2122_v60, 1  ;;  %v3253_v20 = vsel %vm3232_vm3, %v3228_v45, %v2434_v39  ;;  %v3425_v17 = vsel %vm3232_vm3, %v3401_v56, %v3010_v10  ;;  %v553_v49 = vsub.f32 %v5300_v51, %v505_v62 }
 0x2c0   : > { %v3278_v16 = vsel %vm3257_vm4, %v3253_v20, %v2506_v36  ;;  %v3449_v40 = vsel %vm3257_vm4, %v3425_v17, %v3082_v31  ;;  %v517_v21 = vrot.slane %v5361_v37, 7  ;;  %v504_v11 = vrot.slane %v5415_v48, 7 }
 0x2c1   : > { %v3303_v25 = vsel %vm3282_vm5, %v3278_v16, %v2578_v32  ;;  %v3473_v1 = vsel %vm3282_vm5, %v3449_v40, %v3154_v61  ;;  %v577_v24 = vmul.f32 0.46666667, %v553_v49  ;;  %v697_v57 = vmul.f32 0.93333334, %v553_v49 }
 0x2c2   : > { %v3328_v13 = vsel %vm3307_vm6, %v3303_v25, %v2650_v47  ;;  %v3497_v42 = vsel %vm3307_vm6, %v3473_v1, %v2242_v7  ;;  %v817_v23 = vmul.f32 0.4, %v553_v49  ;;  %v937_v8 = vmul.f32 0.8666667, %v553_v49 }
 0x2c3   : > { %v5776_v35 = vsel %vm3332_vm7, %v3328_v13, %v2722_v53  ;;  %v5780_v46 = vsel %vm3332_vm7, %v3497_v42, %v5253_v18  ;;  %v625_v43 = vrot.slane %v577_v24, 1  ;;  %v745_v30 = vrot.slane %v697_v57, 1 }
 0x2c4   : > { %v3619_v0 = vsub.f32 %v5776_v35, %v5410_v44  ;;  %v3620_v52 = vsub.f32 %v5780_v46, %v5486_v26  ;;  %v5787_v39 = vsub.f32 %v5361_v37, %v517_v21  ;;  %v5793_v36 = vsel %vm3282_vm5, %v5603_v41, %v3143_v12 }
 0x2c5   : > { %v865_v32 = vrot.slane %v817_v23, 1  ;;  %v985_v18 = vrot.slane %v937_v8, 1  ;;  %v1057_v14 = vmul.f32 0.33333334, %v553_v49  ;;  %v1177_v9 = vmul.f32 0.8, %v553_v49 }
 0x2c6   : > { %v3625_v60 = vmul.f32 0.26666668, %v3619_v0  ;;  %v3626_v47 = vmul.f32 0.26666668, %v3620_v52  ;;  %v3637_v53 = vmul.f32 0.73333335, %v3619_v0  ;;  %v673_v58 = vadd.f32 %v5300_v51, %v625_v43 }
 0x2c7   : > { %v3638_v10 = vmul.f32 0.73333335, %v3620_v52  ;;  %v793_v28 = vadd.f32 %v5300_v51, %v745_v30  ;;  %v1105_v4 = vrot.slane %v1057_v14, 1  ;;  %v1225_v63 = vrot.slane %v1177_v9, 1 }
 0x2c8   : > { %v3631_v12 = vadd.f32 %v3625_v60, %v5410_v44  ;;  %v3632_v41 = vadd.f32 %v3626_v47, %v5486_v26  ;;  %v3643_v62 = vadd.f32 %v3637_v53, %v5410_v44  ;;  %v1297_v7 = vmul.f32 0.26666668, %v553_v49 }
 0x2c9   : > { %v3644_v31 = vadd.f32 %v3638_v10, %v5486_v26  ;;  %v913_v45 = vadd.f32 %v5300_v51, %v865_v32  ;;  %v1033_v56 = vadd.f32 %v5300_v51, %v985_v18  ;;  %v1417_v61 = vmul.f32 0.73333335, %v553_v49 }
 0x2ca   : > { %3813 = vst [vmem:[%s4684_s17 + $0x270] sm:$0xff] %v3631_v12  ;;  %3814 = vst [vmem:[%s4684_s17 + $0x278] sm:$0xff] %v3632_v41  ;;  %v1153_v20 = vadd.f32 %v5300_v51, %v1105_v4  ;;  %v1345_v17 = vrot.slane %v1297_v7, 1  ;;  %v1537_v16 = vmul.f32 0.2, %v553_v49  ;;  %v5809_v21 = vadd.f32 %v5300_v51, %v1225_v63 }
 0x2cb   : > { %3815 = vst [vmem:[%s4684_s17 + $0x280] sm:$0xff] %v3643_v62  ;;  %v1657_v40 = vmul.f32 0.6666667, %v553_v49  ;;  %3816 = vst [vmem:[%s4684_s17 + $0x288] sm:$0xff] %v3644_v31  ;;  %v1465_v44 = vrot.slane %v1417_v61, 1  ;;  %v2281_v13 = vrot.slane %v673_v58, 7 }
 0x2cc   : > { %v1777_v25 = vmul.f32 0.13333334, %v553_v49  ;;  %v1897_v26 = vmul.f32 0.6, %v553_v49  ;;  %v1585_v1 = vrot.slane %v1537_v16, 1  ;;  %v5813_v30 = vadd.f32 %v5300_v51, %v1345_v17 }
 0x2cd   : > { %v1705_v24 = vrot.slane %v1657_v40, 1  ;;  %v2017_v57 = vmul.f32 0.06666667, %v553_v49  ;;  %v1513_v42 = vadd.f32 %v5300_v51, %v1465_v44  ;;  %v2137_v43 = vmul.f32 0.53333336, %v553_v49 }
 0x2ce   : > { %v1825_v23 = vrot.slane %v1777_v25, 1  ;;  %v1945_v8 = vrot.slane %v1897_v26, 1  ;;  %v1633_v0 = vadd.f32 %v5300_v51, %v1585_v1  ;;  %v2353_v9 = vrot.slane %v793_v28, 6 }
 0x2cf   : > { %v1753_v52 = vadd.f32 %v5300_v51, %v1705_v24  ;;  %v2065_v32 = vrot.slane %v2017_v57, 1  ;;  %v2425_v60 = vrot.slane %v913_v45, 6  ;;  %v2185_v53 = vrot.slane %v2137_v43, 1 }
 0x2d0   : > { %v1873_v18 = vadd.f32 %v5300_v51, %v1825_v23  ;;  %v1993_v14 = vadd.f32 %v5300_v51, %v1945_v8  ;;  %v2497_v58 = vrot.slane %v1033_v56, 5  ;;  %v2569_v49 = vrot.slane %v1153_v20, 5 }
 0x2d1   : > { %v5820_v47 = vadd.f32 %v5300_v51, %v2065_v32  ;;  %v2641_v10 = vrot.slane %v5809_v21, 4  ;;  %v2785_v4 = vrot.slane %v1513_v42, 3  ;;  %v2857_v63 = vrot.slane %v1633_v0, 3 }
 0x2d2   : > { %v2929_v12 = vrot.slane %v1753_v52, 2  ;;  %v2713_v41 = vrot.slane %v5813_v30, 4  ;;  %v3001_v62 = vrot.slane %v1873_v18, 2  ;;  %v3073_v7 = vrot.slane %v1993_v14, 1 }
 0x2d3   : > { %v3194_v31 = vsel %vm3182_vm1, %v5300_v51, %v2281_v13  ;;  %v3368_v45 = vsel %vm3182_vm1, %v2785_v4, %v2857_v63  ;;  %v589_v61 = vmul.f32 0.46666667, %v5787_v39  ;;  %v709_v56 = vmul.f32 0.93333334, %v5787_v39 }
 0x2d4   : > { %v3219_v28 = vsel %vm3207_vm2, %v3194_v31, %v2353_v9  ;;  %v3392_v17 = vsel %vm3207_vm2, %v3368_v45, %v2929_v12  ;;  %v829_v16 = vmul.f32 0.4, %v5787_v39  ;;  %v949_v40 = vmul.f32 0.8666667, %v5787_v39 }
 0x2d5   : > { %v3244_v20 = vsel %vm3232_vm3, %v3219_v28, %v2425_v60  ;;  %v3416_v44 = vsel %vm3232_vm3, %v3392_v17, %v3001_v62  ;;  %v637_v25 = vrot.slane %v589_v61, 1  ;;  %v757_v26 = vrot.slane %v709_v56, 1 }
 0x2d6   : > { %v3269_v21 = vsel %vm3257_vm4, %v3244_v20, %v2497_v58  ;;  %v5837_v1 = vadd.f32 %v5300_v51, %v2185_v53  ;;  %v3145_v24 = vrot.slane %v5820_v47, 1  ;;  %v877_v57 = vrot.slane %v829_v16, 1 }
 0x2d7   : > { %v997_v13 = vrot.slane %v949_v40, 1  ;;  %v3294_v42 = vsel %vm3282_vm5, %v3269_v21, %v2569_v49  ;;  %v3440_v23 = vsel %vm3257_vm4, %v3416_v44, %v3073_v7  ;;  %v685_v8 = vadd.f32 %v5361_v37, %v637_v25 }
 0x2d8   : > { %v1069_v43 = vmul.f32 0.33333334, %v5787_v39  ;;  %v805_v0 = vadd.f32 %v5361_v37, %v757_v26  ;;  %v925_v52 = vadd.f32 %v5361_v37, %v877_v57  ;;  %v1189_v32 = vmul.f32 0.8, %v5787_v39 }
 0x2d9   : > { %v1309_v18 = vmul.f32 0.26666668, %v5787_v39  ;;  %v1045_v14 = vadd.f32 %v5361_v37, %v997_v13  ;;  %v1429_v60 = vmul.f32 0.73333335, %v5787_v39  ;;  %v1549_v47 = vmul.f32 0.2, %v5787_v39 }
 0x2da   : > { %v1117_v9 = vrot.slane %v1069_v43, 1  ;;  %v1237_v53 = vrot.slane %v1189_v32, 1  ;;  %v1669_v49 = vmul.f32 0.6666667, %v5787_v39  ;;  %v1789_v4 = vmul.f32 0.13333334, %v5787_v39 }
 0x2db   : > { %v1357_v58 = vrot.slane %v1309_v18, 1  ;;  %v1477_v63 = vrot.slane %v1429_v60, 1  ;;  %v1597_v12 = vrot.slane %v1549_v47, 1  ;;  %v1909_v62 = vmul.f32 0.6, %v5787_v39 }
 0x2dc   : > { %v2293_v7 = vrot.slane %v685_v8, 7  ;;  %v1165_v31 = vadd.f32 %v5361_v37, %v1117_v9  ;;  %v5856_v28 = vadd.f32 %v5361_v37, %v1237_v53  ;;  %v1717_v45 = vrot.slane %v1669_v49, 1 }
 0x2dd   : > { %v1837_v61 = vrot.slane %v1789_v4, 1  ;;  %v1525_v56 = vadd.f32 %v5361_v37, %v1477_v63  ;;  %v1645_v20 = vadd.f32 %v5361_v37, %v1597_v12  ;;  %v1957_v17 = vrot.slane %v1909_v62, 1 }
 0x2de   : > { %v2029_v16 = vmul.f32 0.06666667, %v5787_v39  ;;  %v5862_v40 = vadd.f32 %v5361_v37, %v1357_v58  ;;  %v1765_v21 = vadd.f32 %v5361_v37, %v1717_v45  ;;  %v5869_v25 = vmul.f32 0.53333336, %v5787_v39 }
 0x2df   : > { %v5866_v44 = vadd.f32 %v5361_v37, %v1837_v61  ;;  %v3319_v26 = vsel %vm3307_vm6, %v3294_v42, %v2641_v10  ;;  %v5873_v57 = vadd.f32 %v5361_v37, %v1957_v17  ;;  %v2365_v8 = vrot.slane %v805_v0, 6 }
 0x2e0   : > { %v2077_v13 = vrot.slane %v2029_v16, 1  ;;  %v2437_v32 = vrot.slane %v925_v52, 6  ;;  %v2509_v18 = vrot.slane %v1045_v14, 5  ;;  %v2581_v9 = vrot.slane %v1165_v31, 5 }
 0x2e1   : > { %v2653_v60 = vrot.slane %v5856_v28, 4  ;;  %v2797_v47 = vrot.slane %v1525_v56, 3  ;;  %v2869_v53 = vrot.slane %v1645_v20, 3  ;;  %v2941_v58 = vrot.slane %v1765_v21, 2 }
 0x2e2   : > { %v5878_v39 = vadd.f32 %v5361_v37, %v2077_v13  ;;  %v2725_v10 = vrot.slane %v5862_v40, 4  ;;  %v3013_v42 = vrot.slane %v5866_v44, 2  ;;  %v3206_v0 = vsel %vm3182_vm1, %v5361_v37, %v2293_v7 }
 0x2e3   : > { %v3231_v52 = vsel %vm3207_vm2, %v3206_v0, %v2365_v8  ;;  %v3380_v14 = vsel %vm3182_vm1, %v2797_v47, %v2869_v53  ;;  %v552_v4 = vsub.f32 %v5415_v48, %v504_v11  ;;  %v5897_v62 = vsel %vm3332_vm7, %v3319_v26, %v2713_v41 }
 0x2e4   : > { %v3256_v63 = vsel %vm3232_vm3, %v3231_v52, %v2437_v32  ;;  %v5892_v12 = vsel %vm3207_vm2, %v3380_v14, %v2941_v58  ;;  %v3464_v7 = vsel %vm3282_vm5, %v3440_v23, %v3145_v24 }
 0x2e5   : > { %v3281_v31 = vsel %vm3257_vm4, %v3256_v63, %v2509_v18  ;;  %v576_v45 = vmul.f32 0.46666667, %v552_v4  ;;  %v696_v61 = vmul.f32 0.93333334, %v552_v4  ;;  %v816_v56 = vmul.f32 0.4, %v552_v4 }
 0x2e6   : > { %v5902_v20 = vsel %vm3282_vm5, %v3281_v31, %v2581_v9  ;;  %v936_v11 = vmul.f32 0.8666667, %v552_v4  ;;  %v1056_v17 = vmul.f32 0.33333334, %v552_v4  ;;  %v1176_v16 = vmul.f32 0.8, %v552_v4 }
 0x2e7   : > { %v624_v21 = vrot.slane %v576_v45, 1  ;;  %v744_v13 = vrot.slane %v696_v61, 1  ;;  %v864_v8 = vrot.slane %v816_v56, 1  ;;  %v1296_v30 = vmul.f32 0.26666668, %v552_v4 }
 0x2e8   : > { %v984_v32 = vrot.slane %v936_v11, 1  ;;  %v1104_v41 = vrot.slane %v1056_v17, 1  ;;  %v1224_v26 = vrot.slane %v1176_v16, 1  ;;  %v1416_v47 = vmul.f32 0.73333335, %v552_v4 }
 0x2e9   : > { %v672_v24 = vadd.f32 %v624_v21, %v5415_v48  ;;  %v792_v23 = vadd.f32 %v744_v13, %v5415_v48  ;;  %v912_v18 = vadd.f32 %v864_v8, %v5415_v48  ;;  %v1344_v53 = vrot.slane %v1296_v30, 1 }
 0x2ea   : > { %v1032_v9 = vadd.f32 %v984_v32, %v5415_v48  ;;  %v1152_v58 = vadd.f32 %v1104_v41, %v5415_v48  ;;  %v1272_v0 = vadd.f32 %v1224_v26, %v5415_v48  ;;  %v1464_v52 = vrot.slane %v1416_v47, 1 }
 0x2eb   : > { %v1392_v14 = vadd.f32 %v1344_v53, %v5415_v48  ;;  %v1536_v63 = vmul.f32 0.2, %v552_v4  ;;  %v1656_v31 = vmul.f32 0.6666667, %v552_v4  ;;  %v1776_v45 = vmul.f32 0.13333334, %v552_v4 }
 0x2ec   : > { %v1512_v61 = vadd.f32 %v1464_v52, %v5415_v48  ;;  %v1896_v56 = vmul.f32 0.6, %v552_v4  ;;  %v2016_v11 = vmul.f32 0.06666667, %v552_v4  ;;  %v2136_v17 = vmul.f32 0.53333336, %v552_v4 }
 0x2ed   : > { %v1584_v16 = vrot.slane %v1536_v63, 1  ;;  %v1704_v21 = vrot.slane %v1656_v31, 1  ;;  %v1824_v13 = vrot.slane %v1776_v45, 1  ;;  %v2280_v8 = vrot.slane %v672_v24, 7 }
 0x2ee   : > { %v1944_v30 = vrot.slane %v1896_v56, 1  ;;  %v2064_v32 = vrot.slane %v2016_v11, 1  ;;  %v2184_v41 = vrot.slane %v2136_v17, 1  ;;  %v2352_v38 = vrot.slane %v792_v23, 6 }
 0x2ef   : > { %v1632_v26 = vadd.f32 %v1584_v16, %v5415_v48  ;;  %v1752_v47 = vadd.f32 %v1704_v21, %v5415_v48  ;;  %v1872_v53 = vadd.f32 %v1824_v13, %v5415_v48  ;;  %v2424_v49 = vrot.slane %v912_v18, 6 }
 0x2f0   : > { %v1992_v52 = vadd.f32 %v1944_v30, %v5415_v48  ;;  %v2112_v43 = vadd.f32 %v2064_v32, %v5415_v48  ;;  %v2232_v4 = vadd.f32 %v2184_v41, %v5415_v48  ;;  %v2496_v63 = vrot.slane %v1032_v9, 5 }
 0x2f1   : > { %v2568_v31 = vrot.slane %v1152_v58, 5  ;;  %v2640_v24 = vrot.slane %v1272_v0, 4  ;;  %v2712_v45 = vrot.slane %v1392_v14, 4  ;;  %v2784_v56 = vrot.slane %v1512_v61, 3 }
 0x2f2   : > { %v2856_v11 = vrot.slane %v1632_v26, 3  ;;  %v2928_v23 = vrot.slane %v1752_v47, 2  ;;  %v3000_v17 = vrot.slane %v1872_v53, 2  ;;  %v3072_v16 = vrot.slane %v1992_v52, 1 }
 0x2f3   : > { %v3144_v50 = vrot.slane %v2112_v43, 1  ;;  %v3193_v21 = vsel %vm3182_vm1, %v5415_v48, %v2280_v8  ;;  %v3486_v18 = vsel %vm3307_vm6, %v5793_v36, %v5597_v2  ;;  %v3488_v13 = vsel %vm3307_vm6, %v3464_v7, %v5837_v1 }
 0x2f4   : > { %v3218_v9 = vsel %vm3207_vm2, %v3193_v21, %v2352_v38  ;;  %v3367_v58 = vsel %vm3182_vm1, %v2784_v56, %v2856_v11  ;;  %v3510_v0 = vsel %vm3332_vm7, %v3486_v18, %v5066_v5  ;;  %v5931_v43 = vsel %vm3332_vm7, %v3488_v13, %v5300_v51 }
 0x2f5   : > { %v3243_v14 = vsel %vm3232_vm3, %v3218_v9, %v2424_v49  ;;  %v3391_v61 = vsel %vm3207_vm2, %v3367_v58, %v2928_v23  ;;  %v3527_v2 = vsub.f32 %v5754_v3, %v5717_v29  ;;  %v3528_v36 = vsub.f32 %v3510_v0, %v5723_v15 }
 0x2f6   : > { %v3268_v38 = vsel %vm3257_vm4, %v3243_v14, %v2496_v63  ;;  %v3415_v1 = vsel %vm3232_vm3, %v3391_v61, %v3000_v17  ;;  %v3617_v5 = vsub.f32 %v4740_v22, %v5897_v62  ;;  %v3618_v51 = vsub.f32 %v4745_v27, %v5931_v43 }
 0x2f7   : > { %v3293_v7 = vsel %vm3282_vm5, %v3268_v38, %v2568_v31  ;;  %v3439_v49 = vsel %vm3257_vm4, %v3415_v1, %v3072_v16  ;;  %v3533_v8 = vmul.f32 0.46666667, %v3527_v2  ;;  %v3534_v30 = vmul.f32 0.46666667, %v3528_v36 }
 0x2f8   : > { %v3318_v32 = vsel %vm3307_vm6, %v3293_v7, %v2640_v24  ;;  %v3463_v41 = vsel %vm3282_vm5, %v3439_v49, %v3144_v50  ;;  %v3545_v26 = vmul.f32 0.93333334, %v3527_v2  ;;  %v3546_v47 = vmul.f32 0.93333334, %v3528_v36 }
 0x2f9   : > { %v3343_v53 = vsel %vm3332_vm7, %v3318_v32, %v2712_v45  ;;  %v3487_v22 = vsel %vm3307_vm6, %v3463_v41, %v2232_v4  ;;  %v3539_v27 = vadd.f32 %v3533_v8, %v5717_v29  ;;  %v3540_v52 = vadd.f32 %v3534_v30, %v5723_v15 }
 0x2fa   : > { %v3511_v63 = vsel %vm3332_vm7, %v3487_v22, %v5415_v48  ;;  %v3551_v31 = vadd.f32 %v3545_v26, %v5717_v29  ;;  %v3552_v50 = vadd.f32 %v3546_v47, %v5723_v15  ;;  %v3557_v24 = vsub.f32 %v3343_v53, %v5754_v3 }
 0x2fb   : > { %v3558_v56 = vsub.f32 %v3511_v63, %v3510_v0  ;;  %v3587_v45 = vsub.f32 %v5897_v62, %v3343_v53  ;;  %v3588_v4 = vsub.f32 %v5931_v43, %v3511_v63  ;;  %v3623_v11 = vmul.f32 0.26666668, %v3617_v5  ;;  %3769 = vst [vmem:[%s4684_s17 + $0x110] sm:$0xff] %v3539_v27  ;;  %3770 = vst [vmem:[%s4684_s17 + $0x118] sm:$0xff] %v3540_v52 }
 0x2fc   : > { %v3563_v23 = vmul.f32 0.4, %v3557_v24  ;;  %v3575_v17 = vmul.f32 0.8666667, %v3557_v24  ;;  %v3624_v16 = vmul.f32 0.26666668, %v3618_v51  ;;  %v3331_v48 = vsel %vm3307_vm6, %v5902_v20, %v2653_v60 }
 0x2fd   : > { %3771 = vst [vmem:[%s4684_s17 + $0x120] sm:$0xff] %v3551_v31  ;;  %3772 = vst [vmem:[%s4684_s17 + $0x128] sm:$0xff] %v3552_v50  ;;  %v3564_v29 = vmul.f32 0.4, %v3558_v56  ;;  %v3576_v15 = vmul.f32 0.8666667, %v3558_v56  ;;  %v3629_v18 = vadd.f32 %v3623_v11, %v5897_v62 }
 0x2fe   : > { %v3593_v21 = vmul.f32 0.33333334, %v3587_v45  ;;  %v3569_v13 = vadd.f32 %v3563_v23, %v5754_v3  ;;  %v3581_v9 = vadd.f32 %v3575_v17, %v5754_v3  ;;  %v3594_v58 = vmul.f32 0.33333334, %v3588_v4 }
 0x2ff   : > { %v3605_v14 = vmul.f32 0.8, %v3587_v45  ;;  %v3570_v61 = vadd.f32 %v3564_v29, %v3510_v0  ;;  %v3582_v28 = vadd.f32 %v3576_v15, %v3510_v0  ;;  %v3606_v60 = vmul.f32 0.8, %v3588_v4  ;;  %3781 = vst [vmem:[%s4684_s17 + $0x170] sm:$0xff] %v3629_v18 }
 0x300   : > { %v3599_v2 = vadd.f32 %v3593_v21, %v3343_v53  ;;  %v3600_v20 = vadd.f32 %v3594_v58, %v3511_v63  ;;  %v3630_v38 = vadd.f32 %v3624_v16, %v5931_v43  ;;  %v3635_v1 = vmul.f32 0.73333335, %v3617_v5  ;;  %3773 = vst [vmem:[%s4684_s17 + $0x130] sm:$0xff] %v3569_v13  ;;  %3775 = vst [vmem:[%s4684_s17 + $0x140] sm:$0xff] %v3581_v9 }
 0x301   : > { %v3611_v36 = vadd.f32 %v3605_v14, %v3343_v53  ;;  %v3157_v3 = vrot.slane %v5878_v39, 1  ;;  %v3612_v7 = vadd.f32 %v3606_v60, %v3511_v63  ;;  %v3636_v49 = vmul.f32 0.73333335, %v3618_v51  ;;  %3774 = vst [vmem:[%s4684_s17 + $0x138] sm:$0xff] %v3570_v61  ;;  %3776 = vst [vmem:[%s4684_s17 + $0x148] sm:$0xff] %v3582_v28 }
 0x302   : > { %3777 = vst [vmem:[%s4684_s17 + $0x150] sm:$0xff] %v3599_v2  ;;  %v516_v0 = vrot.slane %v5475_v6, 7  ;;  %v3641_v8 = vadd.f32 %v3635_v1, %v5897_v62  ;;  %3778 = vst [vmem:[%s4684_s17 + $0x158] sm:$0xff] %v3600_v20  ;;  %v5986_v39 = vsel %vm3332_vm7, %v3331_v48, %v2725_v10  ;;  %v3428_v5 = vsel %vm3232_vm3, %v5892_v12, %v3013_v42 }
 0x303   : > { %3779 = vst [vmem:[%s4684_s17 + $0x160] sm:$0xff] %v3611_v36  ;;  %3782 = vst [vmem:[%s4684_s17 + $0x178] sm:$0xff] %v3630_v38  ;;  %v6155_v51 = vrot.slane %v5638_v59, 1  ;;  %v6156_v62 = vrot.slane %v5869_v25, 1  ;;  %v3642_v41 = vadd.f32 %v3636_v49, %v5931_v43  ;;  %v6157_v10 = vrot.slane %v5873_v57, 1 }
 0x304   : > { %3780 = vst [vmem:[%s4684_s17 + $0x168] sm:$0xff] %v3612_v7  ;;  %v564_v40 = vsub.f32 %v5475_v6, %v516_v0  ;;  %3829 = vst [vmem:[%s4684_s17 + $0x2f0] sm:$0xff] %v5986_v39  ;;  %v6158_v59 = vrot.slane %v5628_v33, 4 }
 0x305   : > { %v3474_v30 = vsel %vm3282_vm5, %v5712_v55, %v6155_v51  ;;  %v2245_v32 = vadd.f32 %v5361_v37, %v6156_v62  ;;  %v3452_v44 = vsel %vm3257_vm4, %v3428_v5, %v6157_v10  ;;  %3783 = vst [vmem:[%s4684_s17 + $0x180] sm:$0xff] %v3641_v8  ;;  %3784 = vst [vmem:[%s4684_s17 + $0x188] sm:$0xff] %v3642_v41 }
 0x306   : > { %v6012_v55 = vsel %vm3332_vm7, %v5706_v54, %v6158_v59  ;;  %v3476_v25 = vsel %vm3282_vm5, %v3452_v44, %v3157_v3  ;;  %v3498_v42 = vsel %vm3307_vm6, %v3474_v30, %v5642_v34  ;;  %v588_v12 = vmul.f32 0.46666667, %v564_v40 }
 0x307   : > { %v708_v57 = vmul.f32 0.93333334, %v564_v40  ;;  %v828_v43 = vmul.f32 0.4, %v564_v40  ;;  %v3500_v26 = vsel %vm3307_vm6, %v3476_v25, %v2245_v32  ;;  %v948_v47 = vmul.f32 0.8666667, %v564_v40 }
 0x308   : > { %v1068_v53 = vmul.f32 0.33333334, %v564_v40  ;;  %v1188_v22 = vmul.f32 0.8, %v564_v40  ;;  %v6021_v33 = vsel %vm3332_vm7, %v3500_v26, %v5361_v37  ;;  %v636_v54 = vrot.slane %v588_v12, 1 }
 0x309   : > { %v756_v27 = vrot.slane %v708_v57, 1  ;;  %v876_v52 = vrot.slane %v828_v43, 1  ;;  %v1308_v63 = vmul.f32 0.26666668, %v564_v40  ;;  %3830 = vst [vmem:[%s4684_s17 + $0x2f8] sm:$0xff] %v6021_v33  ;;  %v996_v34 = vrot.slane %v948_v47, 1 }
 0x30a   : > { %v1116_v31 = vrot.slane %v1068_v53, 1  ;;  %v1236_v50 = vrot.slane %v1188_v22, 1  ;;  %v1428_v24 = vmul.f32 0.73333335, %v564_v40  ;;  %v684_v56 = vadd.f32 %v636_v54, %v5475_v6 }
 0x30b   : > { %v804_v45 = vadd.f32 %v756_v27, %v5475_v6  ;;  %v6029_v4 = vsel %vm3332_vm7, %v3498_v42, %v5141_v19  ;;  %v3649_v37 = vsub.f32 %v6012_v55, %v5776_v35  ;;  %v924_v11 = vadd.f32 %v876_v52, %v5475_v6 }
 0x30c   : > { %v1044_v23 = vadd.f32 %v996_v34, %v5475_v6  ;;  %v1356_v17 = vrot.slane %v1308_v63, 1  ;;  %v1476_v16 = vrot.slane %v1428_v24, 1  ;;  %v1164_v48 = vadd.f32 %v1116_v31, %v5475_v6 }
 0x30d   : > { %v1548_v29 = vmul.f32 0.2, %v564_v40  ;;  %v1668_v15 = vmul.f32 0.6666667, %v564_v40  ;;  %v1788_v21 = vmul.f32 0.13333334, %v564_v40  ;;  %v1284_v18 = vadd.f32 %v1236_v50, %v5475_v6 }
 0x30e   : > { %v1908_v13 = vmul.f32 0.6, %v564_v40  ;;  %v2028_v9 = vmul.f32 0.06666667, %v564_v40  ;;  %v2148_v19 = vmul.f32 0.53333336, %v564_v40  ;;  %v1524_v58 = vadd.f32 %v1476_v16, %v5475_v6 }
 0x30f   : > { %v1596_v14 = vrot.slane %v1548_v29, 1  ;;  %v1716_v61 = vrot.slane %v1668_v15, 1  ;;  %v1836_v28 = vrot.slane %v1788_v21, 1  ;;  %v1404_v2 = vadd.f32 %v1356_v17, %v5475_v6 }
 0x310   : > { %v1956_v60 = vrot.slane %v1908_v13, 1  ;;  %v2076_v20 = vrot.slane %v2028_v9, 1  ;;  %v2196_v36 = vrot.slane %v2148_v19, 1  ;;  %v2292_v7 = vrot.slane %v684_v56, 7 }
 0x311   : > { %v1644_v38 = vadd.f32 %v1596_v14, %v5475_v6  ;;  %v1764_v1 = vadd.f32 %v1716_v61, %v5475_v6  ;;  %v1884_v3 = vadd.f32 %v1836_v28, %v5475_v6  ;;  %v2364_v8 = vrot.slane %v804_v45, 6 }
 0x312   : > { %v2004_v49 = vadd.f32 %v1956_v60, %v5475_v6  ;;  %v2124_v0 = vadd.f32 %v2076_v20, %v5475_v6  ;;  %v2436_v5 = vrot.slane %v924_v11, 6  ;;  %v2244_v51 = vadd.f32 %v2196_v36, %v5475_v6 }
 0x313   : > { %v2508_v30 = vrot.slane %v1044_v23, 5  ;;  %v2580_v62 = vrot.slane %v1164_v48, 5  ;;  %v2796_v32 = vrot.slane %v1524_v58, 3  ;;  %v2652_v41 = vrot.slane %v1284_v18, 4 }
 0x314   : > { %v2868_v40 = vrot.slane %v1644_v38, 3  ;;  %v2940_v10 = vrot.slane %v1764_v1, 2  ;;  %v3012_v44 = vrot.slane %v1884_v3, 2  ;;  %v3084_v59 = vrot.slane %v2004_v49, 1 }
 0x315   : > { %v3205_v25 = vsel %vm3182_vm1, %v5475_v6, %v2292_v7  ;;  %v3650_v42 = vsub.f32 %v6029_v4, %v5780_v46  ;;  %v3655_v12 = vmul.f32 0.2, %v3649_v37  ;;  %v3156_v57 = vrot.slane %v2124_v0, 1 }
 0x316   : > { %v3230_v43 = vsel %vm3207_vm2, %v3205_v25, %v2364_v8  ;;  %v3379_v26 = vsel %vm3182_vm1, %v2796_v32, %v2868_v40  ;;  %v3667_v47 = vmul.f32 0.6666667, %v3649_v37  ;;  %v2724_v50 = vrot.slane %v1404_v2, 4 }
 0x317   : > { %v3255_v53 = vsel %vm3232_vm3, %v3230_v43, %v2436_v5  ;;  %v3403_v22 = vsel %vm3207_vm2, %v3379_v26, %v2940_v10  ;;  %v3656_v54 = vmul.f32 0.2, %v3650_v42  ;;  %v3661_v27 = vadd.f32 %v3655_v12, %v5776_v35 }
 0x318   : > { %v3280_v52 = vsel %vm3257_vm4, %v3255_v53, %v2508_v30  ;;  %v3427_v63 = vsel %vm3232_vm3, %v3403_v22, %v3012_v44  ;;  %v3668_v34 = vmul.f32 0.6666667, %v3650_v42  ;;  %v3673_v31 = vadd.f32 %v3667_v47, %v5776_v35 }
 0x319   : > { %v3305_v24 = vsel %vm3282_vm5, %v3280_v52, %v2580_v62  ;;  %v3451_v56 = vsel %vm3257_vm4, %v3427_v63, %v3084_v59  ;;  %v3662_v45 = vadd.f32 %v3656_v54, %v5780_v46  ;;  %3817 = vst [vmem:[%s4684_s17 + $0x290] sm:$0xff] %v3661_v27 }
 0x31a   : > { %v3330_v37 = vsel %vm3307_vm6, %v3305_v24, %v2652_v41  ;;  %v3475_v11 = vsel %vm3282_vm5, %v3451_v56, %v3156_v57  ;;  %v3674_v23 = vadd.f32 %v3668_v34, %v5780_v46  ;;  %3819 = vst [vmem:[%s4684_s17 + $0x2a0] sm:$0xff] %v3673_v31 }
 0x31b   : > { %v3355_v35 = vsel %vm3332_vm7, %v3330_v37, %v2724_v50  ;;  %v3499_v17 = vsel %vm3307_vm6, %v3475_v11, %v2244_v51  ;;  %3818 = vst [vmem:[%s4684_s17 + $0x298] sm:$0xff] %v3662_v45 }
 0x31c   : > { %v3523_v16 = vsel %vm3332_vm7, %v3499_v17, %v5475_v6  ;;  %v3679_v48 = vsub.f32 %v3355_v35, %v6012_v55  ;;  %v3709_v29 = vsub.f32 %v5986_v39, %v3355_v35  ;;  %3820 = vst [vmem:[%s4684_s17 + $0x2a8] sm:$0xff] %v3674_v23 }
 0x31d   : > { %v3680_v15 = vsub.f32 %v3523_v16, %v6029_v4  ;;  %v3710_v21 = vsub.f32 %v6021_v33, %v3523_v16 }
 0x31e   : > { %v3685_v46 = vmul.f32 0.13333334, %v3679_v48  ;;  %v3697_v18 = vmul.f32 0.6, %v3679_v48  ;;  %v3715_v13 = vmul.f32 0.06666667, %v3709_v29 }
 0x31f   : > { %v3686_v9 = vmul.f32 0.13333334, %v3680_v15  ;;  %v3698_v19 = vmul.f32 0.6, %v3680_v15  ;;  %v3716_v6 = vmul.f32 0.06666667, %v3710_v21 }
 0x320   : > { %v3691_v58 = vadd.f32 %v3685_v46, %v6012_v55  ;;  %v3703_v39 = vadd.f32 %v3697_v18, %v6012_v55  ;;  %v3721_v14 = vadd.f32 %v3715_v13, %v3355_v35  ;;  %v3727_v33 = vmul.f32 0.53333336, %v3709_v29 }
 0x321   : > { %v3692_v61 = vadd.f32 %v3686_v9, %v6029_v4  ;;  %v3704_v28 = vadd.f32 %v3698_v19, %v6029_v4  ;;  %v3722_v2 = vadd.f32 %v3716_v6, %v3523_v16  ;;  %v3728_v60 = vmul.f32 0.53333336, %v3710_v21 }
 0x322   : > { %v3733_v20 = vadd.f32 %v3727_v33, %v3355_v35  ;;  %3821 = vst [vmem:[%s4684_s17 + $0x2b0] sm:$0xff] %v3691_v58  ;;  %3823 = vst [vmem:[%s4684_s17 + $0x2c0] sm:$0xff] %v3703_v39 }
 0x323   : > { %3825 = vst [vmem:[%s4684_s17 + $0x2d0] sm:$0xff] %v3721_v14  ;;  %v3734_v55 = vadd.f32 %v3728_v60, %v3523_v16  ;;  %3822 = vst [vmem:[%s4684_s17 + $0x2b8] sm:$0xff] %v3692_v61 }
 0x324   : > { %3824 = vst [vmem:[%s4684_s17 + $0x2c8] sm:$0xff] %v3704_v28  ;;  %3826 = vst [vmem:[%s4684_s17 + $0x2d8] sm:$0xff] %v3722_v2 }
 0x325   : > { %3827 = vst [vmem:[%s4684_s17 + $0x2e0] sm:$0xff] %v3733_v20  ;;  %3828 = vst [vmem:[%s4684_s17 + $0x2e8] sm:$0xff] %v3734_v55 }
 0x326   : > { %4214 = shalt.err (!%p4211_p7)
}
 0x327   : > { %s4215_s18 = scalar_lea.hbm %s6084_s22, 12288  ;;  %s4219_s23 = scalar_lea.hbm %s6140_s2, 24576 }
 0x328   : > { %p4216_p9 = scmp.ne.s32.totalorder %s6084_s22, %s4215_s18  ;;  %p4220_p5 = scmp.lt.u32.totalorder %s6084_s22, %s6140_s2 }
 0x329   : > { %p4221_p13 = scmp.lt.u32.totalorder %s4219_s23, %s4215_s18  ;;  %p4223_p4 = scmp.lt.u32.totalorder %s4215_s18, %s6084_s22 }
 0x32a   : > { %p4217_p1 = pnand %p4216_p9, %p4389_p12 }
 0x32b   : > { %p4222_p2 = por %p4221_p13, %p4220_p5 }
 0x32c   : > { %p4218_p0 = pneg %p4217_p1 }
 0x32d   : > { %p4224_p6 = por %p4223_p4, %p4222_p2 }
 0x32f   : > { %p4225_p8 = pnand %p4224_p6, %p4218_p0 }
 0x331   : > { %4228 = shalt.err (!%p4225_p8)
}
 0x332   : > { %s4278_s3 = smov 128   ;;  %s4279_s15 = smov 8  }
 0x333   : > { %4088 = dma.vmem_to_hbm [thread:$0]  (%p4389_p12), %s6089_s5, 12288, %s6084_s22, %s3832_s27, %s4278_s3, %s4278_s3, %s4279_s15  }
 0x334 PF: > { %s3861_s17 = sand.u32 1, %s4259_s9   ;;  %p6159_p10 = scmp.ne.s32.totalorder %s6145_s16, 0 }
 0x335   : > { %p6160_p11 = scmp.ge.s32.totalorder %s4271_s12, 2  ;;  %s3862_s4 = scalar_lea.sflag [#allocation4], %s3861_s17 }
 0x337   : > { %p4099_p3 = pnand %p6160_p11, %p6159_p10 }
 0x339   : > { %4254 = dma.done.wait (!%p4099_p3), %s3862_s4, 12288  }
 0x33a   : > { %4256 = vsyncadd (!%p4099_p3), %s3862_s4, 4294955008  ;;  %p16_p7 = scmp.ge.s32.totalorder %s4351_s21, 4   ;;  %s6161_s9 = smov %s4263_s10 }
 0x33b   : > { %s6162_s10 = smov %s4267_s11  ;;  %s6163_s11 = smov %s4385_s8 }
 0x33c   : > { %s6164_s12 = smov %s4351_s21  ;;  %18 = sbr.rel (!%p16_p7) target bundleno = 6 (0x6), region = 77 }
 0x343   :  { %3867 = vsyncpa [#allocation3], 1 }
 0x344   :  { %3869 = vsyncpa [#allocation3 + $0x1], 1 }
 0x345   :  { %3870 = vsyncpa [#allocation6], 1 }
 0x346   :  { %3871 = vsyncpa [#allocation4], 1 }
 0x347   :  { %3873 = vsyncpa [#allocation4 + $0x1], 1 }

</bundles_post_ra>
